<compile_context>
chip_gen: v7x
topology: tpu7x:2x2x1
jax: 0.10.0
libtpu: 0.0.40
codegen_flags: <defaults>
</compile_context>

<pallas_src>
import functools

import jax
import jax.numpy as jnp
from jax.experimental import pallas as pl
from jax.experimental.pallas import tpu as pltpu


def _graph_layer_kernel(g_ref, h_ref, w_rep_ref, w_in_ref, bias_ref, o_ref,
                        hout_s, *, num_fields, embed_dim):
    F, D = num_fields, embed_dim
    FD = F * D

    # ---- Stage 1: replicated per-field projection on the MXU.
    #      hout_s[b, j*FD + i*D + e] = h_out[b, j, e]  (independent of i)
    hout_s[...] = jnp.dot(h_ref[...], w_rep_ref[...],
                          preferred_element_type=jnp.float32)

    # ---- Stage 2: aggr[b, i*D + d] = sum_j g[b, i, j] * h_out[b, j, d]
    #      F full-lane-width (TB, FD) FMAs against pre-expanded g, f32 accum
    #      with two partial accumulators (tree-ish sum).  All slices are
    #      256-lane aligned -> unmasked full-vreg loads.
    acc0 = None
    acc1 = None
    for j in range(F):
        g_j = g_ref[:, j * FD:(j + 1) * FD].astype(jnp.float32)
        term = g_j * hout_s[:, j * FD:(j + 1) * FD]
        if j % 2 == 0:
            acc0 = term if acc0 is None else acc0 + term
        else:
            acc1 = term if acc1 is None else acc1 + term
    aggr = acc0 if acc1 is None else acc0 + acc1

    # ---- Stage 3: a[b, f, :] = W_in[f] @ aggr[b, f, :] + bias
    #      One dense block-diagonal bf16 MXU matmul, lane-dense f32 store.
    a = jnp.dot(aggr.astype(jnp.bfloat16), w_in_ref[...],
                preferred_element_type=jnp.float32)
    o_ref[...] = (a + bias_ref[...]).astype(o_ref.dtype)


def _block_diag(w):
    # w: (F, E, D) -> BD[f*D + d, f*E + e] = w[f, e, d], so that
    # (x @ BD)[b, f*E + e] = sum_d x[b, f*D + d] * w[f, e, d].
    F, E, D = w.shape
    wt = jnp.swapaxes(w, 1, 2)                     # (F, D, E): wt[f, d, e]
    eye = jnp.eye(F, dtype=w.dtype)
    bd = jnp.einsum('fg,fde->fdge', eye, wt)       # (F, D, F, E)
    return bd.reshape(F * D, F * E)


def _block_diag_replicated(w, reps):
    # w: (F, E, D) -> W[f*D + d, j*(reps*E) + i*E + e] = (f == j) * w[j, e, d]
    # for all i in [0, reps): block-diagonal projection whose per-field output
    # is already replicated `reps` times along the lane axis.
    F, E, D = w.shape
    wt = jnp.swapaxes(w, 1, 2)                     # (F, D, E): wt[f, d, e]
    eye = jnp.eye(F, dtype=w.dtype)
    bd = jnp.einsum('fj,fde->fdje', eye, wt)       # (F, D, F, E)
    bd = jnp.broadcast_to(bd[:, :, :, None, :], (F, D, F, reps, E))
    return bd.reshape(F * D, F * reps * E)


def graph_layer(g, h, w_in, w_out, bias, *, batch_tile=128):
    B, F, D = h.shape
    FD = F * D

    # --- Wrapper-side (plain XLA) layout prep: lane-dense slabs, bf16 operands.
    h_flat = h.reshape(B, FD).astype(jnp.bfloat16)
    # g_exp[b, j*FD + i*D + d] = g[b, i, j]   (lane-dense, bf16)
    g_t = jnp.swapaxes(g, 1, 2)                                    # (B, F, F)
    g_exp = jnp.broadcast_to(g_t[:, :, :, None], (B, F, F, D))
    g_exp = g_exp.reshape(B, F * FD).astype(jnp.bfloat16)
    w_rep = _block_diag_replicated(w_out, F).astype(jnp.bfloat16)  # (FD, F*FD)
    w_in_bd = _block_diag(w_in).astype(jnp.bfloat16)               # (FD, FD)
    bias_flat = jnp.tile(bias, F).reshape(1, FD).astype(jnp.float32)

    # Batch tile: clamp to a multiple of 8 (sublane alignment).  Sweep larger
    # (256-512) on v5e/v6e for large B; on v7x keep B_pad // TB even so both
    # TensorCores get grid steps (for B=256, TB=128 -> grid=(2,) is optimal).
    TB = max(8, (min(batch_tile, B) // 8) * 8)
    B_pad = ((B + TB - 1) // TB) * TB
    if B_pad != B:
        h_flat = jnp.pad(h_flat, ((0, B_pad - B), (0, 0)))
        g_exp = jnp.pad(g_exp, ((0, B_pad - B), (0, 0)))

    kernel = functools.partial(_graph_layer_kernel, num_fields=F, embed_dim=D)

    out_flat = pl.pallas_call(
        kernel,
        out_shape=jax.ShapeDtypeStruct((B_pad, FD), h.dtype),
        grid_spec=pltpu.PrefetchScalarGridSpec(
            num_scalar_prefetch=0,
            grid=(B_pad // TB,),
            in_specs=[
                pl.BlockSpec((TB, F * FD), lambda b: (b, 0)),   # g_exp (lane-dense)
                pl.BlockSpec((TB, FD), lambda b: (b, 0)),       # h (lane-dense)
                pl.BlockSpec((FD, F * FD), lambda b: (0, 0)),   # W_out block-diag, replicated (resident)
                pl.BlockSpec((FD, FD), lambda b: (0, 0)),       # W_in block-diag (resident)
                pl.BlockSpec((1, FD), lambda b: (0, 0)),        # bias (tiled per field)
            ],
            out_specs=pl.BlockSpec((TB, FD), lambda b: (b, 0)),
            scratch_shapes=[
                pltpu.VMEM((TB, F * FD), jnp.float32),          # replicated h_out slab
            ],
        ),
        compiler_params=pltpu.CompilerParams(
            dimension_semantics=("parallel",),
        ),
    )(g_exp, h_flat, w_rep, w_in_bd, bias_flat)

    return out_flat[:B].reshape(B, F, D)


def graph_layer_ref(g, h, w_in, w_out, bias):
    # Pure-JAX reference mirroring the PyTorch semantics (full-precision matmuls).
    hp = jax.lax.Precision.HIGHEST
    h_out = jnp.einsum('fed,bfd->bfe', w_out, h, precision=hp)
    aggr = jnp.einsum('bij,bjd->bid', g, h_out, precision=hp)
    return jnp.einsum('fed,bfd->bfe', w_in, aggr, precision=hp) + bias


if __name__ == "__main__":
    B, F, D = 256, 8, 32   # batch, num_fields, embedding_dim

    key = jax.random.PRNGKey(0)
    k_win, k_wout, k_h, k_g = jax.random.split(key, 4)

    # Deterministic xavier_normal init: std = sqrt(2 / (fan_in + fan_out)) = sqrt(1/D)
    xavier_std = (2.0 / (D + D)) ** 0.5
    w_in = jax.random.normal(k_win, (F, D, D), jnp.float32) * xavier_std
    w_out = jax.random.normal(k_wout, (F, D, D), jnp.float32) * xavier_std
    bias = jnp.zeros((D,), jnp.float32)

    h = jax.random.normal(k_h, (B, F, D), jnp.float32)
    # g is a field-interaction (adjacency/attention) matrix per batch.
    g = jax.nn.softmax(jax.random.normal(k_g, (B, F, F), jnp.float32), axis=-1)

    out = jax.jit(graph_layer)(g, h, w_in, w_out, bias)
    out = jax.block_until_ready(out)

    ref = graph_layer_ref(g, h, w_in, w_out, bias)
    assert out.shape == (B, F, D)
    # bf16 MXU operands vs. an f32 HIGHEST-precision reference -> loose tolerance.
    err = float(jnp.max(jnp.abs(out - ref)))
    assert jnp.allclose(out, ref, atol=5e-2, rtol=5e-2), f"max abs err = {err}"
    print("KERNEL_OK")
</pallas_src>

<mosaic_0001>
module attributes {stable_mosaic.version = 11 : i64} {
  func.func @_graph_layer_kernel(%arg0: i32, %arg1: memref<128x2048xbf16, #tpu.memory_space<vmem>>, %arg2: memref<128x256xbf16, #tpu.memory_space<vmem>>, %arg3: memref<256x2048xbf16, #tpu.memory_space<vmem>>, %arg4: memref<256x256xbf16, #tpu.memory_space<vmem>>, %arg5: memref<1x256xf32, #tpu.memory_space<vmem>>, %arg6: memref<128x256xf32, #tpu.memory_space<vmem>>, %arg7: memref<128x2048xf32, #tpu.memory_space<vmem>>) attributes {dimension_semantics = [#tpu.dimension_semantics<parallel>], iteration_bounds = array<i64: 2>, scalar_prefetch = 0 : i64, scratch_operands = 1 : i64, tpu.core_type = #tpu.core_type<tc>, window_params = [{transform_indices = @transform_0, window_bounds = array<i64: 128, 2048>}, {transform_indices = @transform_1, window_bounds = array<i64: 128, 256>}, {pipeline_mode = #tpu.pipeline_mode<synchronous>, transform_indices = @transform_2, window_bounds = array<i64: 256, 2048>}, {pipeline_mode = #tpu.pipeline_mode<synchronous>, transform_indices = @transform_3, window_bounds = array<i64: 256, 256>}, {pipeline_mode = #tpu.pipeline_mode<synchronous>, transform_indices = @transform_4, window_bounds = array<i64: 1, 256>}, {transform_indices = @transform_5, window_bounds = array<i64: 128, 256>}]} {
    %c0 = arith.constant 0 : index
    %c0_0 = arith.constant 0 : index
    %0 = vector.load %arg2[%c0, %c0_0] : memref<128x256xbf16, #tpu.memory_space<vmem>>, vector<128x256xbf16>
    %c0_1 = arith.constant 0 : index
    %c0_2 = arith.constant 0 : index
    %1 = vector.load %arg3[%c0_1, %c0_2] : memref<256x2048xbf16, #tpu.memory_space<vmem>>, vector<256x2048xbf16>
    %cst = arith.constant dense<0.000000e+00> : vector<128x2048xf32>
    %2 = tpu.matmul %0, %1, %cst {dimension_numbers = #tpu.dot_dimension_numbers<[1], [0], [0], [1], [0, 0, 1, 1], [], []>} : vector<128x256xbf16>, vector<256x2048xbf16>, vector<128x2048xf32> -> vector<128x2048xf32>
    %c0_3 = arith.constant 0 : index
    %c0_4 = arith.constant 0 : index
    %3 = vector.load %arg7[%c0_3, %c0_4] : memref<128x2048xf32, #tpu.memory_space<vmem>>, vector<128x2048xf32>
    tpu.vector_store %arg7[%c0_3, %c0_4], %2 {strides = array<i32>} : memref<128x2048xf32, #tpu.memory_space<vmem>>, vector<128x2048xf32>,
    %c0_5 = arith.constant 0 : index
    %c0_6 = arith.constant 0 : index
    %4 = vector.load %arg1[%c0_5, %c0_6] : memref<128x2048xbf16, #tpu.memory_space<vmem>>, vector<128x256xbf16>
    %5 = arith.extf %4 : vector<128x256xbf16> to vector<128x256xf32>
    %c0_7 = arith.constant 0 : index
    %c0_8 = arith.constant 0 : index
    %6 = vector.load %arg7[%c0_7, %c0_8] : memref<128x2048xf32, #tpu.memory_space<vmem>>, vector<128x256xf32>
    %7 = arith.mulf %5, %6 : vector<128x256xf32>
    %c0_9 = arith.constant 0 : index
    %c256 = arith.constant 256 : index
    %8 = vector.load %arg1[%c0_9, %c256] : memref<128x2048xbf16, #tpu.memory_space<vmem>>, vector<128x256xbf16>
    %9 = arith.extf %8 : vector<128x256xbf16> to vector<128x256xf32>
    %c0_10 = arith.constant 0 : index
    %c256_11 = arith.constant 256 : index
    %10 = vector.load %arg7[%c0_10, %c256_11] : memref<128x2048xf32, #tpu.memory_space<vmem>>, vector<128x256xf32>
    %11 = arith.mulf %9, %10 : vector<128x256xf32>
    %c0_12 = arith.constant 0 : index
    %c512 = arith.constant 512 : index
    %12 = vector.load %arg1[%c0_12, %c512] : memref<128x2048xbf16, #tpu.memory_space<vmem>>, vector<128x256xbf16>
    %13 = arith.extf %12 : vector<128x256xbf16> to vector<128x256xf32>
    %c0_13 = arith.constant 0 : index
    %c512_14 = arith.constant 512 : index
    %14 = vector.load %arg7[%c0_13, %c512_14] : memref<128x2048xf32, #tpu.memory_space<vmem>>, vector<128x256xf32>
    %15 = arith.mulf %13, %14 : vector<128x256xf32>
    %16 = arith.addf %7, %15 : vector<128x256xf32>
    %c0_15 = arith.constant 0 : index
    %c768 = arith.constant 768 : index
    %17 = vector.load %arg1[%c0_15, %c768] : memref<128x2048xbf16, #tpu.memory_space<vmem>>, vector<128x256xbf16>
    %18 = arith.extf %17 : vector<128x256xbf16> to vector<128x256xf32>
    %c0_16 = arith.constant 0 : index
    %c768_17 = arith.constant 768 : index
    %19 = vector.load %arg7[%c0_16, %c768_17] : memref<128x2048xf32, #tpu.memory_space<vmem>>, vector<128x256xf32>
    %20 = arith.mulf %18, %19 : vector<128x256xf32>
    %21 = arith.addf %11, %20 : vector<128x256xf32>
    %c0_18 = arith.constant 0 : index
    %c1024 = arith.constant 1024 : index
    %22 = vector.load %arg1[%c0_18, %c1024] : memref<128x2048xbf16, #tpu.memory_space<vmem>>, vector<128x256xbf16>
    %23 = arith.extf %22 : vector<128x256xbf16> to vector<128x256xf32>
    %c0_19 = arith.constant 0 : index
    %c1024_20 = arith.constant 1024 : index
    %24 = vector.load %arg7[%c0_19, %c1024_20] : memref<128x2048xf32, #tpu.memory_space<vmem>>, vector<128x256xf32>
    %25 = arith.mulf %23, %24 : vector<128x256xf32>
    %26 = arith.addf %16, %25 : vector<128x256xf32>
    %c0_21 = arith.constant 0 : index
    %c1280 = arith.constant 1280 : index
    %27 = vector.load %arg1[%c0_21, %c1280] : memref<128x2048xbf16, #tpu.memory_space<vmem>>, vector<128x256xbf16>
    %28 = arith.extf %27 : vector<128x256xbf16> to vector<128x256xf32>
    %c0_22 = arith.constant 0 : index
    %c1280_23 = arith.constant 1280 : index
    %29 = vector.load %arg7[%c0_22, %c1280_23] : memref<128x2048xf32, #tpu.memory_space<vmem>>, vector<128x256xf32>
    %30 = arith.mulf %28, %29 : vector<128x256xf32>
    %31 = arith.addf %21, %30 : vector<128x256xf32>
    %c0_24 = arith.constant 0 : index
    %c1536 = arith.constant 1536 : index
    %32 = vector.load %arg1[%c0_24, %c1536] : memref<128x2048xbf16, #tpu.memory_space<vmem>>, vector<128x256xbf16>
    %33 = arith.extf %32 : vector<128x256xbf16> to vector<128x256xf32>
    %c0_25 = arith.constant 0 : index
    %c1536_26 = arith.constant 1536 : index
    %34 = vector.load %arg7[%c0_25, %c1536_26] : memref<128x2048xf32, #tpu.memory_space<vmem>>, vector<128x256xf32>
    %35 = arith.mulf %33, %34 : vector<128x256xf32>
    %36 = arith.addf %26, %35 : vector<128x256xf32>
    %c0_27 = arith.constant 0 : index
    %c1792 = arith.constant 1792 : index
    %37 = vector.load %arg1[%c0_27, %c1792] : memref<128x2048xbf16, #tpu.memory_space<vmem>>, vector<128x256xbf16>
    %38 = arith.extf %37 : vector<128x256xbf16> to vector<128x256xf32>
    %c0_28 = arith.constant 0 : index
    %c1792_29 = arith.constant 1792 : index
    %39 = vector.load %arg7[%c0_28, %c1792_29] : memref<128x2048xf32, #tpu.memory_space<vmem>>, vector<128x256xf32>
    %40 = arith.mulf %38, %39 : vector<128x256xf32>
    %41 = arith.addf %31, %40 : vector<128x256xf32>
    %42 = arith.addf %36, %41 : vector<128x256xf32>
    %43 = arith.truncf %42 : vector<128x256xf32> to vector<128x256xbf16>
    %c0_30 = arith.constant 0 : index
    %c0_31 = arith.constant 0 : index
    %44 = vector.load %arg4[%c0_30, %c0_31] : memref<256x256xbf16, #tpu.memory_space<vmem>>, vector<256x256xbf16>
    %cst_32 = arith.constant dense<0.000000e+00> : vector<128x256xf32>
    %45 = tpu.matmul %43, %44, %cst_32 {dimension_numbers = #tpu.dot_dimension_numbers<[1], [0], [0], [1], [0, 0, 1, 1], [], []>} : vector<128x256xbf16>, vector<256x256xbf16>, vector<128x256xf32> -> vector<128x256xf32>
    %c0_33 = arith.constant 0 : index
    %c0_34 = arith.constant 0 : index
    %46 = vector.load %arg5[%c0_33, %c0_34] : memref<1x256xf32, #tpu.memory_space<vmem>>, vector<1x256xf32>
    %47 = vector.broadcast %46 : vector<1x256xf32> to vector<128x256xf32>
    %48 = arith.addf %45, %47 : vector<128x256xf32>
    %c0_35 = arith.constant 0 : index
    %c0_36 = arith.constant 0 : index
    %49 = vector.load %arg6[%c0_35, %c0_36] : memref<128x256xf32, #tpu.memory_space<vmem>>, vector<128x256xf32>
    tpu.vector_store %arg6[%c0_35, %c0_36], %48 {strides = array<i32>} : memref<128x256xf32, #tpu.memory_space<vmem>>, vector<128x256xf32>,
    return
  }
  func.func @transform_0(%arg0: i32) -> (i32, i32) {
    %c0_i32 = arith.constant 0 : i32
    %c0_i32_0 = arith.constant 0 : i32
    return %arg0, %c0_i32 : i32, i32
  }
  func.func @transform_1(%arg0: i32) -> (i32, i32) {
    %c0_i32 = arith.constant 0 : i32
    %c0_i32_0 = arith.constant 0 : i32
    return %arg0, %c0_i32 : i32, i32
  }
  func.func @transform_2(%arg0: i32) -> (i32, i32) {
    %c0_i32 = arith.constant 0 : i32
    %c0_i32_0 = arith.constant 0 : i32
    %c0_i32_1 = arith.constant 0 : i32
    return %c0_i32, %c0_i32_0 : i32, i32
  }
  func.func @transform_3(%arg0: i32) -> (i32, i32) {
    %c0_i32 = arith.constant 0 : i32
    %c0_i32_0 = arith.constant 0 : i32
    %c0_i32_1 = arith.constant 0 : i32
    return %c0_i32, %c0_i32_0 : i32, i32
  }
  func.func @transform_4(%arg0: i32) -> (i32, i32) {
    %c0_i32 = arith.constant 0 : i32
    %c0_i32_0 = arith.constant 0 : i32
    %c0_i32_1 = arith.constant 0 : i32
    return %c0_i32, %c0_i32_0 : i32, i32
  }
  func.func @transform_5(%arg0: i32) -> (i32, i32) {
    %c0_i32 = arith.constant 0 : i32
    %c0_i32_0 = arith.constant 0 : i32
    return %arg0, %c0_i32 : i32, i32
  }
}

</mosaic_0001>

<bundles_post_ra>
// kernel: tile.8
= control target key start
LH: loop header
LB: loop body
LE: loop exit
PB: predicated region body
PF: predicated region fallthrough
CT: control target
= control target key end

     0   :  { %s22_s0 = inlined_call_operand.vmem [shape: f32[32], index: 0, kind: input, shape index: {}]   ;;  %s23_s1 = inlined_call_operand.vmem [shape: f32[8,32], index: 1, kind: output, shape index: {}]  }
   0x1   :  { %v4_v0 = vld [vmem:[%s22_s0] ss:$0 sm:$0xff] }
   0x2   :  { %5 = vst [vmem:[%s23_s1] sm:$0xff] %v4_v0 }

// kernel: tile.9
= control target key start
LH: loop header
LB: loop body
LE: loop exit
PB: predicated region body
PF: predicated region fallthrough
CT: control target
= control target key end

     0   :  { %s7_s6 = smov 3  ;;  %s14_s9 = smov 3  ;;  %vm4_vm0 = vcmask 261120   ;;  %vm11_vm1 = vcmask 1048320   ;;  %vm18_vm2 = vcmask 785920   ;;  %vm25_vm3 = vcmask 523520   ;;  %s76_s0 = inlined_call_operand.vmem [shape: f32[8,32], index: 0, kind: input, shape index: {}]   ;;  %s77_s1 = inlined_call_operand.vmem [shape: f32[1,256], index: 1, kind: output, shape index: {}]  }
   0x1   :  { %v38_v0 = vld [vmem:[%s76_s0 + $0x3] ss:$4 sm:%s7_s6]   ;;  %s45_s10 = smov 96   ;;  %s21_s11 = smov 3  ;;  %v39_v1 = vld [vmem:[%s76_s0 + $0x2] ss:$4 sm:%s14_s9]  }
   0x2   :  { %9 = vrot.lane.b32.xlu0 %v38_v0, %s45_s10  ;;  %v40_v2 = vld [vmem:[%s76_s0 + $0x1] ss:$4 sm:%s21_s11]   ;;  %s2_s16 = smov 3  ;;  %s46_s17 = smov 32  }
   0x3   :  { %23 = vrot.lane.b32.xlu1 %v40_v2, %s46_s17  ;;  %v3_v3 = vld [vmem:[%s76_s0] ss:$4 sm:%s2_s16]   ;;  %s47_s0 = smov 64  }
   0x4   :  { %5 = vst.msk [vmem:[#allocation0] ss:$8 sm:$0x3] %vm4_vm0, %v3_v3  }
   0x6   :  { %16 = vrot.lane.b32.xlu0 %v39_v1, %s47_s0 }
  0x74   :  { %v10_v4 = vpop.permute.xlu0 %9  }
  0x75   :  { %12 = vst.msk [vmem:[#allocation0] ss:$8 sm:$0x3] %vm11_vm1, %v10_v4   ;;  %v24_v5 = vpop.permute.xlu1 %23  }
  0x78   :  { %v17_v6 = vpop.permute.xlu0 %16  }
  0x79   :  { %19 = vst.msk [vmem:[#allocation0] ss:$8 sm:$0x3] %vm18_vm2, %v17_v6  }
  0x7a   :  { %26 = vst.msk [vmem:[#allocation0] ss:$8 sm:$0x3] %vm25_vm3, %v24_v5  }
  0x81   :  { %v30_v7 = vld [vmem:[#allocation0] sm:$0x1]  ;;  %v34_v8 = vld [vmem:[#allocation0 + $0x8] sm:$0x1] }
  0x82   :  { %32 = vst [vmem:[%s77_s1] sm:$0x1] %v30_v7  ;;  %41 = vst [vmem:[%s77_s1 + $0x1] sm:$0x1] %v34_v8 }

// kernel: graph_layer.1
= control target key start
LH: loop header
LB: loop body
LE: loop exit
PB: predicated region body
PF: predicated region fallthrough
CT: control target
= control target key end

     0   :  { %s5094_s18 = smov 0   ;;  %s7222_s0 = inlined_call_operand.vmem [shape: bf16[256,2048], index: 0, kind: input, shape index: {}]   ;;  %s7223_s1 = inlined_call_operand.vmem [shape: bf16[256,256], index: 1, kind: input, shape index: {}]   ;;  %s7224_s2 = inlined_call_operand.vmem [shape: bf16[256,2048], index: 2, kind: input, shape index: {}]   ;;  %s7225_s3 = inlined_call_operand.vmem [shape: bf16[256,256], index: 3, kind: input, shape index: {}]   ;;  %s7226_s4 = inlined_call_operand.vmem [shape: f32[1,256], index: 4, kind: input, shape index: {}]   ;;  %s7227_s5 = inlined_call_operand.vmem [shape: f32[256,256], index: 5, kind: output, shape index: {}]  }
   0x1 LB: > { %s4605_s19 = sadd.s32 4294967295, %s5062_s18   ;;  %p4609_p0 = scmp.ge.s32.totalorder %s5062_s18, 1  ;;  %s5062_s18 = sphi %s5094_s18, %s15_s18  }
   0x2   : > { %p201_p1 = scmp.lt.s32.totalorder %s5062_s18, 3 }
   0x4   : > { %p202_p2 = pnand %p4609_p0, %p201_p1 }
   0x6   : > { %205 = sbr.rel (%p202_p2) target bundleno = 771 (0x303), region = 40 }
   0xd   : > { %v274_v0 = vld [vmem:[%s7224_s2] sm:$0xff]  ;;  %v275_v2 = vld [vmem:[%s7224_s2 + $0x8] sm:$0xff]  ;;  %s4610_s21 = sshll.u32 %s4605_s19, 4 }
   0xe   : > { %v282_v1 = vld [vmem:[%s7224_s2 + $0x40] sm:$0xff]  ;;  %v283_v4 = vld [vmem:[%s7224_s2 + $0x48] sm:$0xff]  ;;  %p238_p3 = scmp.lt.s32.totalorder %s4610_s21, 31 }
   0xf   : > { %v4636_v3 = vcombine.high %v274_v0, %v282_v1  ;;  %v4635_v5 = vcombine.low %v274_v0, %v282_v1  ;;  %v290_v6 = vld [vmem:[%s7224_s2 + $0x80] sm:$0xff]  ;;  %v4638_v8 = vcombine.high %v275_v2, %v283_v4  ;;  %v4637_v9 = vcombine.low %v275_v2, %v283_v4  ;;  %v291_v11 = vld [vmem:[%s7224_s2 + $0x88] sm:$0xff] }
  0x10   : > { %v298_v7 = vld [vmem:[%s7224_s2 + $0xc0] sm:$0xff]  ;;  %v299_v12 = vld [vmem:[%s7224_s2 + $0xc8] sm:$0xff]  ;;  %s7555_s21 = smov (!%p238_p3, %s4610_s21), 31 }
  0x11   : > { %v4652_v10 = vcombine.high %v290_v6, %v298_v7  ;;  %v306_v13 = vld [vmem:[%s7224_s2 + $0x100] sm:$0xff]  ;;  %1890 = vmatprep.subr.bf16.mxu0 %v4636_v3  ;;  %v4654_v14 = vcombine.high %v291_v11, %v299_v12  ;;  %v307_v16 = vld [vmem:[%s7224_s2 + $0x108] sm:$0xff]  ;;  %2003 = vmatprep.subr.bf16.mxu1 %v4638_v8  ;;  %v4651_v18 = vcombine.low %v290_v6, %v298_v7  ;;  %s4926_s23 = sshll.u32 %s7555_s21, 3  ;;  %s4925_s6 = sshll.u32 %s7555_s21, 6 }
  0x12   : > { %v314_v15 = vld [vmem:[%s7224_s2 + $0x140] sm:$0xff]  ;;  %v315_v17 = vld [vmem:[%s7224_s2 + $0x148] sm:$0xff]  ;;  %1891 = vmatpush1.bf16.msra.mxu0 %v4635_v5  ;;  %2004 = vmatpush1.bf16.msra.mxu1 %v4637_v9  ;;  %v4653_v19 = vcombine.low %v291_v11, %v299_v12  ;;  %s5194_s8 = scalar_lea.vmem %s7223_s1, %s4926_s23  ;;  %s6174_s12 = scalar_lea.vmem %s7222_s0, %s4925_s6 }
  0x13   : > { %1892 = vmatprep.subr.bf16.mxu0 %v4652_v10  ;;  %v4668_v20 = vcombine.high %v306_v13, %v314_v15  ;;  %2005 = vmatprep.subr.bf16.mxu1 %v4654_v14  ;;  %v4670_v21 = vcombine.high %v307_v16, %v315_v17  ;;  %v322_v22 = vld [vmem:[%s7224_s2 + $0x180] sm:$0xff]  ;;  %v323_v24 = vld [vmem:[%s7224_s2 + $0x188] sm:$0xff]  ;;  %v4667_v26 = vcombine.low %v306_v13, %v314_v15  ;;  %s4927_s19 = sshll.u32 %s7555_s21, 4 }
  0x14   : > { %v330_v23 = vld [vmem:[%s7224_s2 + $0x1c0] sm:$0xff]  ;;  %v331_v25 = vld [vmem:[%s7224_s2 + $0x1c8] sm:$0xff]  ;;  %v4669_v27 = vcombine.low %v307_v16, %v315_v17  ;;  %s7153_s7 = scalar_lea.vmem %s7227_s5, %s4927_s19 }
  0x15   : > { %v4684_v28 = vcombine.high %v322_v22, %v330_v23  ;;  %v4686_v29 = vcombine.high %v323_v24, %v331_v25  ;;  %v338_v30 = vld [vmem:[%s7224_s2 + $0x200] sm:$0xff]  ;;  %v339_v32 = vld [vmem:[%s7224_s2 + $0x208] sm:$0xff]  ;;  %v4683_v34 = vcombine.low %v322_v22, %v330_v23  ;;  %v4685_v35 = vcombine.low %v323_v24, %v331_v25 }
  0x16   : > { %1893 = vmatpush1.bf16.msra.mxu0 %v4651_v18  ;;  %2006 = vmatpush1.bf16.msra.mxu1 %v4653_v19  ;;  %v346_v31 = vld [vmem:[%s7224_s2 + $0x240] sm:$0xff]  ;;  %v347_v33 = vld [vmem:[%s7224_s2 + $0x248] sm:$0xff] }
  0x17   : > { %1894 = vmatprep.subr.bf16.mxu0 %v4668_v20  ;;  %2007 = vmatprep.subr.bf16.mxu1 %v4670_v21  ;;  %v4700_v36 = vcombine.high %v338_v30, %v346_v31  ;;  %v4702_v37 = vcombine.high %v339_v32, %v347_v33  ;;  %v354_v38 = vld [vmem:[%s7224_s2 + $0x280] sm:$0xff]  ;;  %v355_v40 = vld [vmem:[%s7224_s2 + $0x288] sm:$0xff]  ;;  %v4699_v42 = vcombine.low %v338_v30, %v346_v31 }
  0x18   : > { %v362_v39 = vld [vmem:[%s7224_s2 + $0x2c0] sm:$0xff]  ;;  %v363_v41 = vld [vmem:[%s7224_s2 + $0x2c8] sm:$0xff]  ;;  %v4701_v43 = vcombine.low %v339_v32, %v347_v33 }
  0x19   : > { %v4716_v44 = vcombine.high %v354_v38, %v362_v39  ;;  %v4718_v45 = vcombine.high %v355_v40, %v363_v41  ;;  %v370_v46 = vld [vmem:[%s7224_s2 + $0x300] sm:$0xff]  ;;  %v371_v48 = vld [vmem:[%s7224_s2 + $0x308] sm:$0xff]  ;;  %v4715_v50 = vcombine.low %v354_v38, %v362_v39  ;;  %v4717_v51 = vcombine.low %v355_v40, %v363_v41 }
  0x1a   : > { %1895 = vmatpush1.bf16.msra.mxu0 %v4667_v26  ;;  %2008 = vmatpush1.bf16.msra.mxu1 %v4669_v27  ;;  %v378_v47 = vld [vmem:[%s7224_s2 + $0x340] sm:$0xff]  ;;  %v379_v49 = vld [vmem:[%s7224_s2 + $0x348] sm:$0xff] }
  0x1b   : > { %1896 = vmatprep.subr.bf16.mxu0 %v4684_v28  ;;  %2009 = vmatprep.subr.bf16.mxu1 %v4686_v29  ;;  %v4732_v52 = vcombine.high %v370_v46, %v378_v47  ;;  %v4734_v53 = vcombine.high %v371_v48, %v379_v49  ;;  %v386_v54 = vld [vmem:[%s7224_s2 + $0x380] sm:$0xff]  ;;  %v387_v57 = vld [vmem:[%s7224_s2 + $0x388] sm:$0xff]  ;;  %v4731_v59 = vcombine.low %v370_v46, %v378_v47 }
  0x1c   : > { %v394_v55 = vld [vmem:[%s7224_s2 + $0x3c0] sm:$0xff]  ;;  %v395_v58 = vld [vmem:[%s7224_s2 + $0x3c8] sm:$0xff]  ;;  %v4733_v60 = vcombine.low %v371_v48, %v379_v49 }
  0x1d   : > { %v5203_v56 = vld [vmem:[%s5194_s8 + $0x4] ss:$8 sps:$4 sm:$0xff]   ;;  %v4748_v61 = vcombine.high %v386_v54, %v394_v55  ;;  %v4750_v62 = vcombine.high %v387_v57, %v395_v58  ;;  %v4747_v3 = vcombine.low %v386_v54, %v394_v55  ;;  %v4749_v4 = vcombine.low %v387_v57, %v395_v58 }
  0x1e   : > { %1897 = vmatpush1.bf16.msra.mxu0 %v4683_v34  ;;  %2010 = vmatpush1.bf16.msra.mxu1 %v4685_v35  ;;  %v402_v63 = vld [vmem:[%s7224_s2 + $0x400] sm:$0xff]  ;;  %v403_v1 = vld [vmem:[%s7224_s2 + $0x408] sm:$0xff] }
  0x1f   : > { %1898 = vmatprep.subr.bf16.mxu0 %v4700_v36  ;;  %2011 = vmatprep.subr.bf16.mxu1 %v4702_v37  ;;  %v410_v0 = vld [vmem:[%s7224_s2 + $0x440] sm:$0xff]  ;;  %v411_v2 = vld [vmem:[%s7224_s2 + $0x448] sm:$0xff] }
  0x20   : > { %1922 = vmatprep.mubr.bf16.mxu0 %v5203_v56  ;;  %2035 = vmatprep.mubr.bf16.mxu1 %v5203_v56  ;;  %v4764_v5 = vcombine.high %v402_v63, %v410_v0  ;;  %v4766_v6 = vcombine.high %v403_v1, %v411_v2  ;;  %v418_v7 = vld [vmem:[%s7224_s2 + $0x480] sm:$0xff]  ;;  %v419_v9 = vld [vmem:[%s7224_s2 + $0x488] sm:$0xff]  ;;  %v4763_v11 = vcombine.low %v402_v63, %v410_v0  ;;  %v276_v0 = vld [vmem:[%s7224_s2 + $0x10] sm:$0xff] }
  0x21   : > { %v426_v8 = vld [vmem:[%s7224_s2 + $0x4c0] sm:$0xff]  ;;  %v427_v10 = vld [vmem:[%s7224_s2 + $0x4c8] sm:$0xff]  ;;  %v4765_v12 = vcombine.low %v403_v1, %v411_v2  ;;  %v284_v1 = vld [vmem:[%s7224_s2 + $0x50] sm:$0xff] }
  0x22   : > { %1899 = vmatpush1.bf16.msra.mxu0 %v4699_v42  ;;  %2012 = vmatpush1.bf16.msra.mxu1 %v4701_v43  ;;  %v4780_v13 = vcombine.high %v418_v7, %v426_v8  ;;  %v4782_v14 = vcombine.high %v419_v9, %v427_v10  ;;  %v434_v15 = vld [vmem:[%s7224_s2 + $0x500] sm:$0xff]  ;;  %v435_v17 = vld [vmem:[%s7224_s2 + $0x508] sm:$0xff]  ;;  %v4779_v19 = vcombine.low %v418_v7, %v426_v8  ;;  %v277_v2 = vld [vmem:[%s7224_s2 + $0x18] sm:$0xff] }
  0x23   : > { %1900 = vmatprep.subr.bf16.mxu0 %v4716_v44  ;;  %2013 = vmatprep.subr.bf16.mxu1 %v4718_v45  ;;  %v442_v16 = vld [vmem:[%s7224_s2 + $0x540] sm:$0xff]  ;;  %v443_v18 = vld [vmem:[%s7224_s2 + $0x548] sm:$0xff]  ;;  %v4781_v20 = vcombine.low %v419_v9, %v427_v10  ;;  %v292_v8 = vld [vmem:[%s7224_s2 + $0x90] sm:$0xff] }
  0x24   : > { %v4796_v21 = vcombine.high %v434_v15, %v442_v16  ;;  %v4798_v22 = vcombine.high %v435_v17, %v443_v18  ;;  %v450_v23 = vld [vmem:[%s7224_s2 + $0x580] sm:$0xff]  ;;  %v451_v25 = vld [vmem:[%s7224_s2 + $0x588] sm:$0xff]  ;;  %v4795_v27 = vcombine.low %v434_v15, %v442_v16  ;;  %v4797_v28 = vcombine.low %v435_v17, %v443_v18  ;;  %v300_v9 = vld [vmem:[%s7224_s2 + $0xd0] sm:$0xff] }
  0x25   : > { %v458_v24 = vld [vmem:[%s7224_s2 + $0x5c0] sm:$0xff]  ;;  %v459_v26 = vld [vmem:[%s7224_s2 + $0x5c8] sm:$0xff]  ;;  %v4656_v15 = vcombine.high %v292_v8, %v300_v9  ;;  %v5337_v17 = vld [vmem:[%s5194_s8 + $0x14] ss:$8 sps:$4 sm:$0xff]  }
  0x26   : > { %1901 = vmatpush1.bf16.msra.mxu0 %v4715_v50  ;;  %2014 = vmatpush1.bf16.msra.mxu1 %v4717_v51  ;;  %v4812_v29 = vcombine.high %v450_v23, %v458_v24  ;;  %v4814_v30 = vcombine.high %v451_v25, %v459_v26  ;;  %v466_v31 = vld [vmem:[%s7224_s2 + $0x600] sm:$0xff]  ;;  %v467_v33 = vld [vmem:[%s7224_s2 + $0x608] sm:$0xff]  ;;  %v4811_v35 = vcombine.low %v450_v23, %v458_v24  ;;  %v308_v18 = vld [vmem:[%s7224_s2 + $0x110] sm:$0xff] }
  0x27   : > { %1902 = vmatprep.subr.bf16.mxu0 %v4732_v52  ;;  %2015 = vmatprep.subr.bf16.mxu1 %v4734_v53  ;;  %v474_v32 = vld [vmem:[%s7224_s2 + $0x640] sm:$0xff]  ;;  %v475_v34 = vld [vmem:[%s7224_s2 + $0x648] sm:$0xff]  ;;  %v4813_v36 = vcombine.low %v451_v25, %v459_v26  ;;  %v324_v26 = vld [vmem:[%s7224_s2 + $0x190] sm:$0xff] }
  0x28   : > { %v4828_v37 = vcombine.high %v466_v31, %v474_v32  ;;  %v4830_v38 = vcombine.high %v467_v33, %v475_v34  ;;  %v482_v39 = vld [vmem:[%s7224_s2 + $0x680] sm:$0xff]  ;;  %v483_v41 = vld [vmem:[%s7224_s2 + $0x688] sm:$0xff]  ;;  %v4827_v43 = vcombine.low %v466_v31, %v474_v32  ;;  %v4829_v44 = vcombine.low %v467_v33, %v475_v34 }
  0x29   : > { %v490_v40 = vld [vmem:[%s7224_s2 + $0x6c0] sm:$0xff]  ;;  %v491_v42 = vld [vmem:[%s7224_s2 + $0x6c8] sm:$0xff] }
  0x2a   : > { %1903 = vmatpush1.bf16.msra.mxu0 %v4731_v59  ;;  %2016 = vmatpush1.bf16.msra.mxu1 %v4733_v60  ;;  %v4844_v45 = vcombine.high %v482_v39, %v490_v40  ;;  %v4846_v46 = vcombine.high %v483_v41, %v491_v42  ;;  %v498_v47 = vld [vmem:[%s7224_s2 + $0x700] sm:$0xff]  ;;  %v499_v49 = vld [vmem:[%s7224_s2 + $0x708] sm:$0xff]  ;;  %v4843_v51 = vcombine.low %v482_v39, %v490_v40  ;;  %v349_v39 = vld [vmem:[%s7224_s2 + $0x258] sm:$0xff] }
  0x2b   : > { %1904 = vmatprep.subr.bf16.mxu0 %v4748_v61  ;;  %2017 = vmatprep.subr.bf16.mxu1 %v4750_v62  ;;  %v506_v48 = vld [vmem:[%s7224_s2 + $0x740] sm:$0xff]  ;;  %v507_v50 = vld [vmem:[%s7224_s2 + $0x748] sm:$0xff]  ;;  %v4845_v52 = vcombine.low %v483_v41, %v491_v42 }
  0x2c   : > { %v4860_v53 = vcombine.high %v498_v47, %v506_v48  ;;  %v4862_v54 = vcombine.high %v499_v49, %v507_v50  ;;  %v514_v55 = vld [vmem:[%s7224_s2 + $0x780] sm:$0xff]  ;;  %v515_v58 = vld [vmem:[%s7224_s2 + $0x788] sm:$0xff]  ;;  %v4859_v60 = vcombine.low %v498_v47, %v506_v48  ;;  %v4861_v61 = vcombine.low %v499_v49, %v507_v50  ;;  %v357_v47 = vld [vmem:[%s7224_s2 + $0x298] sm:$0xff] }
  0x2d   : > { %v522_v57 = vld [vmem:[%s7224_s2 + $0x7c0] sm:$0xff]  ;;  %v523_v59 = vld [vmem:[%s7224_s2 + $0x7c8] sm:$0xff]  ;;  %v365_v48 = vld [vmem:[%s7224_s2 + $0x2d8] sm:$0xff] }
  0x2e   : > { %1905 = vmatpush1.bf16.msra.mxu0 %v4747_v3  ;;  %2018 = vmatpush1.bf16.msra.mxu1 %v4749_v4  ;;  %v4876_v62 = vcombine.high %v514_v55, %v522_v57  ;;  %v4878_v63 = vcombine.high %v515_v58, %v523_v59  ;;  %v285_v3 = vld [vmem:[%s7224_s2 + $0x58] sm:$0xff]  ;;  %v4875_v4 = vcombine.low %v514_v55, %v522_v57  ;;  %v5328_v10 = vld [vmem:[%s5194_s8] ss:$8 sps:$4 sm:$0xff]  }
  0x2f   : > { %1906 = vmatprep.subr.bf16.mxu0 %v4764_v5  ;;  %2019 = vmatprep.subr.bf16.mxu1 %v4766_v6  ;;  %v4877_v5 = vcombine.low %v515_v58, %v523_v59  ;;  %v4640_v6 = vcombine.high %v276_v0, %v284_v1  ;;  %v4642_v7 = vcombine.high %v277_v2, %v285_v3  ;;  %v5405_v50 = vld [vmem:[%s5194_s8 + $0x34] ss:$8 sps:$4 sm:$0xff]  }
  0x30   : > { %v373_v55 = vld [vmem:[%s7224_s2 + $0x318] sm:$0xff]  ;;  %v4722_v57 = vcombine.high %v357_v47, %v365_v48 }
  0x31   : > { %v381_v58 = vld [vmem:[%s7224_s2 + $0x358] sm:$0xff] }
  0x32   : > { %1907 = vmatpush1.bf16.msra.mxu0 %v4763_v11  ;;  %2020 = vmatpush1.bf16.msra.mxu1 %v4765_v12  ;;  %v293_v11 = vld [vmem:[%s7224_s2 + $0x98] sm:$0xff] }
  0x33   : > { %1908 = vmatprep.subr.bf16.mxu0 %v4780_v13  ;;  %2021 = vmatprep.subr.bf16.mxu1 %v4782_v14  ;;  %v301_v12 = vld [vmem:[%s7224_s2 + $0xd8] sm:$0xff]  ;;  %v4639_v13 = vcombine.low %v276_v0, %v284_v1  ;;  %v4641_v14 = vcombine.low %v277_v2, %v285_v3  ;;  %v396_v0 = vld [vmem:[%s7224_s2 + $0x3d0] sm:$0xff]  ;;  %v4738_v2 = vcombine.high %v373_v55, %v381_v58 }
  0x34   : > { %v4658_v16 = vcombine.high %v293_v11, %v301_v12  ;;  %v4657_v23 = vcombine.low %v293_v11, %v301_v12  ;;  %v389_v1 = vld [vmem:[%s7224_s2 + $0x398] sm:$0xff] }
  0x35   : > { %v397_v3 = vld [vmem:[%s7224_s2 + $0x3d8] sm:$0xff] }
  0x36   : > { %1909 = vmatpush1.bf16.msra.mxu0 %v4779_v19  ;;  %2022 = vmatpush1.bf16.msra.mxu1 %v4781_v20  ;;  %v316_v19 = vld [vmem:[%s7224_s2 + $0x150] sm:$0xff]  ;;  %v309_v20 = vld [vmem:[%s7224_s2 + $0x118] sm:$0xff]  ;;  %v4754_v12 = vcombine.high %v389_v1, %v397_v3 }
  0x37   : > { %1910 = vmatprep.subr.bf16.mxu0 %v4796_v21  ;;  %2023 = vmatprep.subr.bf16.mxu1 %v4798_v22  ;;  %v317_v21 = vld [vmem:[%s7224_s2 + $0x158] sm:$0xff]  ;;  %v4655_v22 = vcombine.low %v292_v8, %v300_v9  ;;  %v4672_v24 = vcombine.high %v308_v18, %v316_v19  ;;  %v4671_v31 = vcombine.low %v308_v18, %v316_v19  ;;  %v404_v8 = vld [vmem:[%s7224_s2 + $0x410] sm:$0xff] }
  0x38   : > { %v4674_v25 = vcombine.high %v309_v20, %v317_v21  ;;  %v4673_v32 = vcombine.low %v309_v20, %v317_v21  ;;  %v412_v9 = vld [vmem:[%s7224_s2 + $0x450] sm:$0xff]  ;;  %v405_v11 = vld [vmem:[%s7224_s2 + $0x418] sm:$0xff] }
  0x39   : > { %v4768_v18 = vcombine.high %v404_v8, %v412_v9  ;;  %v420_v19 = vld [vmem:[%s7224_s2 + $0x490] sm:$0xff]  ;;  %v421_v21 = vld [vmem:[%s7224_s2 + $0x498] sm:$0xff] }
  0x3a   : > { %1911 = vmatpush1.bf16.msra.mxu0 %v4795_v27  ;;  %2024 = vmatpush1.bf16.msra.mxu1 %v4797_v28  ;;  %v332_v27 = vld [vmem:[%s7224_s2 + $0x1d0] sm:$0xff] }
  0x3b   : > { %1912 = vmatprep.subr.bf16.mxu0 %v4812_v29  ;;  %2025 = vmatprep.subr.bf16.mxu1 %v4814_v30  ;;  %v5362_v28 = vld [vmem:[%s5194_s8 + $0x10] ss:$8 sps:$4 sm:$0xff]   ;;  %v4688_v33 = vcombine.high %v324_v26, %v332_v27  ;;  %v4687_v40 = vcombine.low %v324_v26, %v332_v27 }
  0x3c   : > { %v325_v29 = vld [vmem:[%s7224_s2 + $0x198] sm:$0xff]  ;;  %v428_v20 = vld [vmem:[%s7224_s2 + $0x4d0] sm:$0xff] }
  0x3d   : > { %v333_v30 = vld [vmem:[%s7224_s2 + $0x1d8] sm:$0xff]  ;;  %v4784_v26 = vcombine.high %v420_v19, %v428_v20 }
  0x3e   : > { %1913 = vmatpush1.bf16.msra.mxu0 %v4811_v35  ;;  %2026 = vmatpush1.bf16.msra.mxu1 %v4813_v36  ;;  %v4690_v34 = vcombine.high %v325_v29, %v333_v30  ;;  %v5371_v35 = vld [vmem:[%s5194_s8 + $0x24] ss:$8 sps:$4 sm:$0xff]   ;;  %v340_v36 = vld [vmem:[%s7224_s2 + $0x210] sm:$0xff]  ;;  %v4689_v41 = vcombine.low %v325_v29, %v333_v30 }
  0x3f   : > { %1914 = vmatprep.subr.bf16.mxu0 %v4828_v37  ;;  %2027 = vmatprep.subr.bf16.mxu1 %v4830_v38  ;;  %v348_v37 = vld [vmem:[%s7224_s2 + $0x250] sm:$0xff]  ;;  %v341_v38 = vld [vmem:[%s7224_s2 + $0x218] sm:$0xff] }
  0x40   : > { %v4704_v42 = vcombine.high %v340_v36, %v348_v37  ;;  %v4703_v49 = vcombine.low %v340_v36, %v348_v37  ;;  %v5473_v29 = vld [vmem:[%s5194_s8 + $0x54] ss:$8 sps:$4 sm:$0xff]  }
  0x41   : > { %v436_v30 = vld [vmem:[%s7224_s2 + $0x510] sm:$0xff] }
  0x42   : > { %1915 = vmatpush1.bf16.msra.mxu0 %v4827_v43  ;;  %2028 = vmatpush1.bf16.msra.mxu1 %v4829_v44  ;;  %v4706_v43 = vcombine.high %v341_v38, %v349_v39  ;;  %v356_v44 = vld [vmem:[%s7224_s2 + $0x290] sm:$0xff] }
  0x43   : > { %1916 = vmatprep.subr.bf16.mxu0 %v4844_v45  ;;  %2029 = vmatprep.subr.bf16.mxu1 %v4846_v46  ;;  %v364_v45 = vld [vmem:[%s7224_s2 + $0x2d0] sm:$0xff]  ;;  %v5396_v46 = vld [vmem:[%s5194_s8 + $0x20] ss:$8 sps:$4 sm:$0xff]  }
  0x44   : > { %v4719_v59 = vcombine.low %v356_v44, %v364_v45 }
  0x46   : > { %1917 = vmatpush1.bf16.msra.mxu0 %v4843_v51  ;;  %2030 = vmatpush1.bf16.msra.mxu1 %v4845_v52  ;;  %v4705_v51 = vcombine.low %v341_v38, %v349_v39  ;;  %v4720_v52 = vcombine.high %v356_v44, %v364_v45  ;;  %v452_v39 = vld [vmem:[%s7224_s2 + $0x590] sm:$0xff] }
  0x47   : > { %1918 = vmatprep.subr.bf16.mxu0 %v4860_v53  ;;  %2031 = vmatprep.subr.bf16.mxu1 %v4862_v54  ;;  %v372_v53 = vld [vmem:[%s7224_s2 + $0x310] sm:$0xff] }
  0x48   : > { %v380_v54 = vld [vmem:[%s7224_s2 + $0x350] sm:$0xff] }
  0x4a   : > { %1919 = vmatpush1.bf16.msra.mxu0 %v4859_v60  ;;  %2032 = vmatpush1.bf16.msra.mxu1 %v4861_v61  ;;  %v4721_v60 = vcombine.low %v357_v47, %v365_v48  ;;  %v5422_v61 = vld [vmem:[%s5194_s8 + $0x30] ss:$8 sps:$4 sm:$0xff]  }
  0x4b   : > { %1920 = vmatprep.subr.bf16.mxu0 %v4876_v62  ;;  %2033 = vmatprep.subr.bf16.mxu1 %v4878_v63  ;;  %v4736_v62 = vcombine.high %v372_v53, %v380_v54  ;;  %v388_v63 = vld [vmem:[%s7224_s2 + $0x390] sm:$0xff] }
  0x4e   : > { %1921 = vmatpush1.bf16.msra.mxu0 %v4875_v4  ;;  %2034 = vmatpush1.bf16.msra.mxu1 %v4877_v5  ;;  %v4735_v4 = vcombine.low %v372_v53, %v380_v54  ;;  %v5439_v5 = vld [vmem:[%s5194_s8 + $0x44] ss:$8 sps:$4 sm:$0xff]   ;;  %v469_v53 = vld [vmem:[%s7224_s2 + $0x618] sm:$0xff] }
  0x4f   : > { %2116 = vmatprep.subr.bf16.mxu0 %v4640_v6  ;;  %2229 = vmatprep.subr.bf16.mxu1 %v4642_v7  ;;  %v4737_v6 = vcombine.low %v373_v55, %v381_v58  ;;  %v4752_v7 = vcombine.high %v388_v63, %v396_v0  ;;  %v477_v54 = vld [vmem:[%s7224_s2 + $0x658] sm:$0xff] }
  0x51   : > { %1923 = vmatmul.mubr.bf16.vlgmr.msra.gmra.mrb[0].mxu0 %v5328_v10  ;;  %2036 = vmatmul.mubr.bf16.vlgmr.msra.gmra.mrb[0].mxu1 %v5328_v10 }
  0x52   : > { %2117 = vmatpush1.bf16.msra.mxu0 %v4639_v13  ;;  %2230 = vmatpush1.bf16.msra.mxu1 %v4641_v14  ;;  %v413_v13 = vld [vmem:[%s7224_s2 + $0x458] sm:$0xff]  ;;  %v4751_v14 = vcombine.low %v388_v63, %v396_v0  ;;  %v5532_v63 = vld [vmem:[%s5194_s8 + $0x60] ss:$8 sps:$4 sm:$0xff]  }
  0x53   : > { %2118 = vmatprep.subr.bf16.mxu0 %v4656_v15  ;;  %2231 = vmatprep.subr.bf16.mxu1 %v4658_v16  ;;  %v4753_v15 = vcombine.low %v389_v1, %v397_v3  ;;  %v5456_v16 = vld [vmem:[%s5194_s8 + $0x40] ss:$8 sps:$4 sm:$0xff]   ;;  %v485_v0 = vld [vmem:[%s7224_s2 + $0x698] sm:$0xff]  ;;  %v4833_v3 = vcombine.low %v469_v53, %v477_v54 }
  0x54   : > { %1932 = vmatprep.mubr.bf16.mxu0 %v5337_v17  ;;  %2045 = vmatprep.mubr.bf16.mxu1 %v5337_v17  ;;  %v493_v1 = vld [vmem:[%s7224_s2 + $0x6d8] sm:$0xff] }
  0x56   : > { %2119 = vmatpush1.bf16.msra.mxu0 %v4655_v22  ;;  %2232 = vmatpush1.bf16.msra.mxu1 %v4657_v23  ;;  %v4770_v22 = vcombine.high %v405_v11, %v413_v13  ;;  %v429_v23 = vld [vmem:[%s7224_s2 + $0x4d8] sm:$0xff] }
  0x57   : > { %2120 = vmatprep.subr.bf16.mxu0 %v4672_v24  ;;  %2233 = vmatprep.subr.bf16.mxu1 %v4674_v25  ;;  %v4767_v24 = vcombine.low %v404_v8, %v412_v9  ;;  %v4769_v25 = vcombine.low %v405_v11, %v413_v13  ;;  %v4786_v27 = vcombine.high %v421_v21, %v429_v23  ;;  %v500_v8 = vld [vmem:[%s7224_s2 + $0x710] sm:$0xff]  ;;  %v501_v11 = vld [vmem:[%s7224_s2 + $0x718] sm:$0xff] }
  0x58   : > { %v4785_v36 = vcombine.low %v421_v21, %v429_v23  ;;  %v508_v9 = vld [vmem:[%s7224_s2 + $0x750] sm:$0xff]  ;;  %v525_v23 = vld [vmem:[%s7224_s2 + $0x7d8] sm:$0xff] }
  0x59   : > { %1933 = vmatmul.mubr.bf16.gmra.mrb[4].mxu0 %v5362_v28  ;;  %2046 = vmatmul.mubr.bf16.gmra.mrb[4].mxu1 %v5362_v28  ;;  %v5566_v21 = vld [vmem:[%s5194_s8 + $0x70] ss:$8 sps:$4 sm:$0xff]  }
  0x5a   : > { %2121 = vmatpush1.bf16.msra.mxu0 %v4671_v31  ;;  %2234 = vmatpush1.bf16.msra.mxu1 %v4673_v32  ;;  %v444_v31 = vld [vmem:[%s7224_s2 + $0x550] sm:$0xff]  ;;  %v437_v32 = vld [vmem:[%s7224_s2 + $0x518] sm:$0xff] }
  0x5b   : > { %2122 = vmatprep.subr.bf16.mxu0 %v4688_v33  ;;  %2235 = vmatprep.subr.bf16.mxu1 %v4690_v34  ;;  %v445_v33 = vld [vmem:[%s7224_s2 + $0x558] sm:$0xff]  ;;  %v4783_v34 = vcombine.low %v420_v19, %v428_v20  ;;  %v4800_v37 = vcombine.high %v436_v30, %v444_v31  ;;  %v4799_v44 = vcombine.low %v436_v30, %v444_v31  ;;  %v516_v19 = vld [vmem:[%s7224_s2 + $0x790] sm:$0xff]  ;;  %v278_v30 = vld [vmem:[%s7224_s2 + $0x20] sm:$0xff] }
  0x5c   : > { %1942 = vmatprep.mubr.bf16.mxu0 %v5371_v35  ;;  %2055 = vmatprep.mubr.bf16.mxu1 %v5371_v35  ;;  %v4802_v38 = vcombine.high %v437_v32, %v445_v33  ;;  %v4801_v45 = vcombine.low %v437_v32, %v445_v33  ;;  %v524_v20 = vld [vmem:[%s7224_s2 + $0x7d0] sm:$0xff]  ;;  %v286_v31 = vld [vmem:[%s7224_s2 + $0x60] sm:$0xff]  ;;  %v279_v32 = vld [vmem:[%s7224_s2 + $0x28] sm:$0xff] }
  0x5d   : > { %v287_v33 = vld [vmem:[%s7224_s2 + $0x68] sm:$0xff] }
  0x5e   : > { %2123 = vmatpush1.bf16.msra.mxu0 %v4687_v40  ;;  %2236 = vmatpush1.bf16.msra.mxu1 %v4689_v41  ;;  %v460_v40 = vld [vmem:[%s7224_s2 + $0x5d0] sm:$0xff] }
  0x5f   : > { %2124 = vmatprep.subr.bf16.mxu0 %v4704_v42  ;;  %2237 = vmatprep.subr.bf16.mxu1 %v4706_v43  ;;  %v5498_v41 = vld [vmem:[%s5194_s8 + $0x50] ss:$8 sps:$4 sm:$0xff]   ;;  %v4816_v47 = vcombine.high %v452_v39, %v460_v40  ;;  %v4815_v55 = vcombine.low %v452_v39, %v460_v40  ;;  %v294_v39 = vld [vmem:[%s7224_s2 + $0xa0] sm:$0xff] }
  0x60   : > { %v453_v42 = vld [vmem:[%s7224_s2 + $0x598] sm:$0xff]  ;;  %v302_v40 = vld [vmem:[%s7224_s2 + $0xe0] sm:$0xff] }
  0x61   : > { %1943 = vmatmul.mubr.bf16.gmra.mrb[8].mxu0 %v5396_v46  ;;  %2056 = vmatmul.mubr.bf16.gmra.mrb[8].mxu1 %v5396_v46  ;;  %v461_v43 = vld [vmem:[%s7224_s2 + $0x5d8] sm:$0xff] }
  0x62   : > { %2125 = vmatpush1.bf16.msra.mxu0 %v4703_v49  ;;  %2238 = vmatpush1.bf16.msra.mxu1 %v4705_v51  ;;  %v4818_v48 = vcombine.high %v453_v42, %v461_v43  ;;  %v5507_v49 = vld [vmem:[%s5194_s8 + $0x64] ss:$8 sps:$4 sm:$0xff]   ;;  %v468_v51 = vld [vmem:[%s7224_s2 + $0x610] sm:$0xff] }
  0x63   : > { %2126 = vmatprep.subr.bf16.mxu0 %v4720_v52  ;;  %2239 = vmatprep.subr.bf16.mxu1 %v4722_v57  ;;  %v476_v52 = vld [vmem:[%s7224_s2 + $0x650] sm:$0xff]  ;;  %v4817_v57 = vcombine.low %v453_v42, %v461_v43  ;;  %v295_v42 = vld [vmem:[%s7224_s2 + $0xa8] sm:$0xff] }
  0x64   : > { %1952 = vmatprep.mubr.bf16.mxu0 %v5405_v50  ;;  %2065 = vmatprep.mubr.bf16.mxu1 %v5405_v50  ;;  %v4832_v58 = vcombine.high %v468_v51, %v476_v52  ;;  %v303_v43 = vld [vmem:[%s7224_s2 + $0xe8] sm:$0xff] }
  0x66   : > { %2127 = vmatpush1.bf16.msra.mxu0 %v4719_v59  ;;  %2240 = vmatpush1.bf16.msra.mxu1 %v4721_v60  ;;  %v4834_v59 = vcombine.high %v469_v53, %v477_v54  ;;  %v484_v60 = vld [vmem:[%s7224_s2 + $0x690] sm:$0xff]  ;;  %v319_v53 = vld [vmem:[%s7224_s2 + $0x168] sm:$0xff]  ;;  %v4659_v54 = vcombine.low %v294_v39, %v302_v40 }
  0x67   : > { %2128 = vmatprep.subr.bf16.mxu0 %v4736_v62  ;;  %2241 = vmatprep.subr.bf16.mxu1 %v4738_v2  ;;  %v492_v62 = vld [vmem:[%s7224_s2 + $0x6d0] sm:$0xff]  ;;  %v4831_v2 = vcombine.low %v468_v51, %v476_v52  ;;  %v318_v51 = vld [vmem:[%s7224_s2 + $0x160] sm:$0xff]  ;;  %v311_v52 = vld [vmem:[%s7224_s2 + $0x128] sm:$0xff] }
  0x68   : > { %v4847_v13 = vcombine.low %v484_v60, %v492_v62 }
  0x69   : > { %1953 = vmatmul.mubr.bf16.gmra.mrb[12].mxu0 %v5422_v61  ;;  %2066 = vmatmul.mubr.bf16.gmra.mrb[12].mxu1 %v5422_v61 }
  0x6a   : > { %2129 = vmatpush1.bf16.msra.mxu0 %v4735_v4  ;;  %2242 = vmatpush1.bf16.msra.mxu1 %v4737_v6  ;;  %v4848_v4 = vcombine.high %v484_v60, %v492_v62  ;;  %v4850_v6 = vcombine.high %v485_v0, %v493_v1  ;;  %v334_v60 = vld [vmem:[%s7224_s2 + $0x1e0] sm:$0xff]  ;;  %v327_v62 = vld [vmem:[%s7224_s2 + $0x1a8] sm:$0xff] }
  0x6b   : > { %2130 = vmatprep.subr.bf16.mxu0 %v4752_v7  ;;  %2243 = vmatprep.subr.bf16.mxu1 %v4754_v12  ;;  %v5541_v7 = vld [vmem:[%s5194_s8 + $0x74] ss:$8 sps:$4 sm:$0xff]  }
  0x6c   : > { %1962 = vmatprep.mubr.bf16.mxu0 %v5439_v5  ;;  %2075 = vmatprep.mubr.bf16.mxu1 %v5439_v5  ;;  %v509_v12 = vld [vmem:[%s7224_s2 + $0x758] sm:$0xff] }
  0x6e   : > { %2131 = vmatpush1.bf16.msra.mxu0 %v4751_v14  ;;  %2244 = vmatpush1.bf16.msra.mxu1 %v4753_v15  ;;  %v4849_v14 = vcombine.low %v485_v0, %v493_v1  ;;  %v4864_v15 = vcombine.high %v500_v8, %v508_v9  ;;  %v335_v0 = vld [vmem:[%s7224_s2 + $0x1e8] sm:$0xff] }
  0x6f   : > { %2132 = vmatprep.subr.bf16.mxu0 %v4768_v18  ;;  %2245 = vmatprep.subr.bf16.mxu1 %v4770_v22  ;;  %v4866_v18 = vcombine.high %v501_v11, %v509_v12  ;;  %v517_v22 = vld [vmem:[%s7224_s2 + $0x798] sm:$0xff] }
  0x71   : > { %1963 = vmatmul.mubr.bf16.gmra.mrb[16].mxu0 %v5456_v16  ;;  %2076 = vmatmul.mubr.bf16.gmra.mrb[16].mxu1 %v5456_v16 }
  0x72   : > { %2133 = vmatpush1.bf16.msra.mxu0 %v4767_v24  ;;  %2246 = vmatpush1.bf16.msra.mxu1 %v4769_v25  ;;  %v4863_v24 = vcombine.low %v500_v8, %v508_v9  ;;  %v4865_v25 = vcombine.low %v501_v11, %v509_v12  ;;  %v350_v8 = vld [vmem:[%s7224_s2 + $0x260] sm:$0xff]  ;;  %v343_v9 = vld [vmem:[%s7224_s2 + $0x228] sm:$0xff] }
  0x73   : > { %2134 = vmatprep.subr.bf16.mxu0 %v4784_v26  ;;  %2247 = vmatprep.subr.bf16.mxu1 %v4786_v27  ;;  %v4880_v26 = vcombine.high %v516_v19, %v524_v20  ;;  %v4882_v27 = vcombine.high %v517_v22, %v525_v23  ;;  %v351_v11 = vld [vmem:[%s7224_s2 + $0x268] sm:$0xff] }
  0x74   : > { %1972 = vmatprep.mubr.bf16.mxu0 %v5473_v29  ;;  %2085 = vmatprep.mubr.bf16.mxu1 %v5473_v29 }
  0x76   : > { %2135 = vmatpush1.bf16.msra.mxu0 %v4783_v34  ;;  %2248 = vmatpush1.bf16.msra.mxu1 %v4785_v36  ;;  %v4879_v34 = vcombine.low %v516_v19, %v524_v20  ;;  %v4881_v36 = vcombine.low %v517_v22, %v525_v23  ;;  %v366_v19 = vld [vmem:[%s7224_s2 + $0x2e0] sm:$0xff]  ;;  %v359_v20 = vld [vmem:[%s7224_s2 + $0x2a8] sm:$0xff] }
  0x77   : > { %2136 = vmatprep.subr.bf16.mxu0 %v4800_v37  ;;  %2249 = vmatprep.subr.bf16.mxu1 %v4802_v38  ;;  %v4644_v37 = vcombine.high %v278_v30, %v286_v31  ;;  %v4646_v38 = vcombine.high %v279_v32, %v287_v33  ;;  %v367_v22 = vld [vmem:[%s7224_s2 + $0x2e8] sm:$0xff] }
  0x79   : > { %1973 = vmatmul.mubr.bf16.gmra.mrb[20].mxu0 %v5498_v41  ;;  %2086 = vmatmul.mubr.bf16.gmra.mrb[20].mxu1 %v5498_v41 }
  0x7a   : > { %2137 = vmatpush1.bf16.msra.mxu0 %v4799_v44  ;;  %2250 = vmatpush1.bf16.msra.mxu1 %v4801_v45  ;;  %v4643_v44 = vcombine.low %v278_v30, %v286_v31  ;;  %v4645_v45 = vcombine.low %v279_v32, %v287_v33  ;;  %v382_v30 = vld [vmem:[%s7224_s2 + $0x360] sm:$0xff]  ;;  %v375_v31 = vld [vmem:[%s7224_s2 + $0x328] sm:$0xff] }
  0x7b   : > { %2138 = vmatprep.subr.bf16.mxu0 %v4816_v47  ;;  %2251 = vmatprep.subr.bf16.mxu1 %v4818_v48  ;;  %v4660_v47 = vcombine.high %v294_v39, %v302_v40  ;;  %v4662_v48 = vcombine.high %v295_v42, %v303_v43  ;;  %v383_v32 = vld [vmem:[%s7224_s2 + $0x368] sm:$0xff]  ;;  %v398_v39 = vld [vmem:[%s7224_s2 + $0x3e0] sm:$0xff] }
  0x7c   : > { %1982 = vmatprep.mubr.bf16.mxu0 %v5507_v49  ;;  %2095 = vmatprep.mubr.bf16.mxu1 %v5507_v49  ;;  %v391_v40 = vld [vmem:[%s7224_s2 + $0x3a8] sm:$0xff] }
  0x7e   : > { %2139 = vmatpush1.bf16.msra.mxu0 %v4815_v55  ;;  %2252 = vmatpush1.bf16.msra.mxu1 %v4817_v57  ;;  %v4661_v55 = vcombine.low %v295_v42, %v303_v43  ;;  %v399_v42 = vld [vmem:[%s7224_s2 + $0x3e8] sm:$0xff] }
  0x7f   : > { %2140 = vmatprep.subr.bf16.mxu0 %v4832_v58  ;;  %2253 = vmatprep.subr.bf16.mxu1 %v4834_v59  ;;  %v4678_v58 = vcombine.high %v311_v52, %v319_v53  ;;  %v326_v59 = vld [vmem:[%s7224_s2 + $0x1a0] sm:$0xff] }
  0x80   : > { %v4691_v12 = vcombine.low %v326_v59, %v334_v60 }
  0x81   : > { %1983 = vmatmul.mubr.bf16.gmra.mrb[24].mxu0 %v5532_v63  ;;  %2096 = vmatmul.mubr.bf16.gmra.mrb[24].mxu1 %v5532_v63 }
  0x82   : > { %2141 = vmatpush1.bf16.msra.mxu0 %v4831_v2  ;;  %2254 = vmatpush1.bf16.msra.mxu1 %v4833_v3  ;;  %v4677_v2 = vcombine.low %v311_v52, %v319_v53  ;;  %v4692_v3 = vcombine.high %v326_v59, %v334_v60  ;;  %v415_v52 = vld [vmem:[%s7224_s2 + $0x468] sm:$0xff]  ;;  %v430_v59 = vld [vmem:[%s7224_s2 + $0x4e0] sm:$0xff] }
  0x83   : > { %2142 = vmatprep.subr.bf16.mxu0 %v4848_v4  ;;  %2255 = vmatprep.subr.bf16.mxu1 %v4850_v6  ;;  %v4694_v4 = vcombine.high %v327_v62, %v335_v0  ;;  %v342_v6 = vld [vmem:[%s7224_s2 + $0x220] sm:$0xff]  ;;  %v423_v60 = vld [vmem:[%s7224_s2 + $0x4a8] sm:$0xff] }
  0x84   : > { %1992 = vmatprep.mubr.bf16.mxu0 %v5541_v7  ;;  %2105 = vmatprep.mubr.bf16.mxu1 %v5541_v7  ;;  %v4707_v23 = vcombine.low %v342_v6, %v350_v8 }
  0x86   : > { %2143 = vmatpush1.bf16.msra.mxu0 %v4847_v13  ;;  %2256 = vmatpush1.bf16.msra.mxu1 %v4849_v14  ;;  %v4693_v13 = vcombine.low %v327_v62, %v335_v0  ;;  %v4708_v14 = vcombine.high %v342_v6, %v350_v8  ;;  %v431_v62 = vld [vmem:[%s7224_s2 + $0x4e8] sm:$0xff]  ;;  %v446_v6 = vld [vmem:[%s7224_s2 + $0x560] sm:$0xff] }
  0x87   : > { %2144 = vmatprep.subr.bf16.mxu0 %v4864_v15  ;;  %2257 = vmatprep.subr.bf16.mxu1 %v4866_v18  ;;  %v4710_v15 = vcombine.high %v343_v9, %v351_v11  ;;  %v358_v18 = vld [vmem:[%s7224_s2 + $0x2a0] sm:$0xff]  ;;  %v439_v8 = vld [vmem:[%s7224_s2 + $0x528] sm:$0xff] }
  0x88   : > { %v4723_v33 = vcombine.low %v358_v18, %v366_v19 }
  0x89   : > { %1993 = vmatmul.mubr.bf16.gmra.mrb[28].mxu0 %v5566_v21  ;;  %2106 = vmatmul.mubr.bf16.gmra.mrb[28].mxu1 %v5566_v21 }
  0x8a   : > { %2145 = vmatpush1.bf16.msra.mxu0 %v4863_v24  ;;  %2258 = vmatpush1.bf16.msra.mxu1 %v4865_v25  ;;  %v4709_v24 = vcombine.low %v343_v9, %v351_v11  ;;  %v4724_v25 = vcombine.high %v358_v18, %v366_v19  ;;  %v447_v9 = vld [vmem:[%s7224_s2 + $0x568] sm:$0xff]  ;;  %v462_v18 = vld [vmem:[%s7224_s2 + $0x5e0] sm:$0xff] }
  0x8b   : > { %2146 = vmatprep.subr.bf16.mxu0 %v4880_v26  ;;  %2259 = vmatprep.subr.bf16.mxu1 %v4882_v27  ;;  %v4726_v26 = vcombine.high %v359_v20, %v367_v22  ;;  %v374_v27 = vld [vmem:[%s7224_s2 + $0x320] sm:$0xff]  ;;  %v455_v19 = vld [vmem:[%s7224_s2 + $0x5a8] sm:$0xff] }
  0x8c   : > { %2148 = vmatprep.mubr.bf16.mxu0 %v5203_v56  ;;  %2261 = vmatprep.mubr.bf16.mxu1 %v5203_v56  ;;  %v310_v56 = vld [vmem:[%s7224_s2 + $0x120] sm:$0xff]  ;;  %v4739_v43 = vcombine.low %v374_v27, %v382_v30 }
  0x8d   : > { %v4676_v57 = vcombine.high %v310_v56, %v318_v51  ;;  %v4675_v1 = vcombine.low %v310_v56, %v318_v51  ;;  %v414_v56 = vld [vmem:[%s7224_s2 + $0x460] sm:$0xff]  ;;  %v407_v51 = vld [vmem:[%s7224_s2 + $0x428] sm:$0xff] }
  0x8e   : > { %2147 = vmatpush1.bf16.msra.mxu0 %v4879_v34  ;;  %2260 = vmatpush1.bf16.msra.mxu1 %v4881_v36  ;;  %v4725_v34 = vcombine.low %v359_v20, %v367_v22  ;;  %v4740_v36 = vcombine.high %v374_v27, %v382_v30  ;;  %v463_v20 = vld [vmem:[%s7224_s2 + $0x5e8] sm:$0xff]  ;;  %v478_v27 = vld [vmem:[%s7224_s2 + $0x660] sm:$0xff] }
  0x8f   : > { %2342 = vmatprep.subr.bf16.mxu0 %v4644_v37  ;;  %2455 = vmatprep.subr.bf16.mxu1 %v4646_v38  ;;  %v4742_v37 = vcombine.high %v375_v31, %v383_v32  ;;  %v390_v38 = vld [vmem:[%s7224_s2 + $0x3a0] sm:$0xff]  ;;  %v471_v30 = vld [vmem:[%s7224_s2 + $0x628] sm:$0xff] }
  0x90   : > { %v4755_v53 = vcombine.low %v390_v38, %v398_v39 }
  0x91   : > { %2149 = vmatmul.mubr.bf16.vlgmr.msra.gmra.mrb[32].mxu0 %v5328_v10  ;;  %2262 = vmatmul.mubr.bf16.vlgmr.msra.gmra.mrb[32].mxu1 %v5328_v10 }
  0x92   : > { %2343 = vmatpush1.bf16.msra.mxu0 %v4643_v44  ;;  %2456 = vmatpush1.bf16.msra.mxu1 %v4645_v45  ;;  %v4741_v44 = vcombine.low %v375_v31, %v383_v32  ;;  %v4756_v45 = vcombine.high %v390_v38, %v398_v39  ;;  %v479_v31 = vld [vmem:[%s7224_s2 + $0x668] sm:$0xff]  ;;  %v494_v38 = vld [vmem:[%s7224_s2 + $0x6e0] sm:$0xff] }
  0x93   : > { %2344 = vmatprep.subr.bf16.mxu0 %v4660_v47  ;;  %2457 = vmatprep.subr.bf16.mxu1 %v4662_v48  ;;  %v4758_v47 = vcombine.high %v391_v40, %v399_v42  ;;  %v406_v48 = vld [vmem:[%s7224_s2 + $0x420] sm:$0xff]  ;;  %v487_v39 = vld [vmem:[%s7224_s2 + $0x6a8] sm:$0xff] }
  0x94   : > { %2158 = vmatprep.mubr.bf16.mxu0 %v5337_v17  ;;  %2271 = vmatprep.mubr.bf16.mxu1 %v5337_v17  ;;  %v4771_v0 = vcombine.low %v406_v48, %v414_v56 }
  0x96   : > { %2345 = vmatpush1.bf16.msra.mxu0 %v4659_v54  ;;  %2458 = vmatpush1.bf16.msra.mxu1 %v4661_v55  ;;  %v4757_v54 = vcombine.low %v391_v40, %v399_v42  ;;  %v4772_v55 = vcombine.high %v406_v48, %v414_v56  ;;  %v495_v40 = vld [vmem:[%s7224_s2 + $0x6e8] sm:$0xff]  ;;  %v510_v48 = vld [vmem:[%s7224_s2 + $0x760] sm:$0xff] }
  0x97   : > { %2346 = vmatprep.subr.bf16.mxu0 %v4676_v57  ;;  %2459 = vmatprep.subr.bf16.mxu1 %v4678_v58  ;;  %v4774_v57 = vcombine.high %v407_v51, %v415_v52  ;;  %v422_v58 = vld [vmem:[%s7224_s2 + $0x4a0] sm:$0xff]  ;;  %v503_v56 = vld [vmem:[%s7224_s2 + $0x728] sm:$0xff] }
  0x98   : > { %v4787_v11 = vcombine.low %v422_v58, %v430_v59 }
  0x99   : > { %2159 = vmatmul.mubr.bf16.gmra.mrb[36].mxu0 %v5362_v28  ;;  %2272 = vmatmul.mubr.bf16.gmra.mrb[36].mxu1 %v5362_v28 }
  0x9a   : > { %2347 = vmatpush1.bf16.msra.mxu0 %v4675_v1  ;;  %2460 = vmatpush1.bf16.msra.mxu1 %v4677_v2  ;;  %v4773_v1 = vcombine.low %v407_v51, %v415_v52  ;;  %v4788_v2 = vcombine.high %v422_v58, %v430_v59  ;;  %v511_v51 = vld [vmem:[%s7224_s2 + $0x768] sm:$0xff]  ;;  %v526_v58 = vld [vmem:[%s7224_s2 + $0x7e0] sm:$0xff] }
  0x9b   : > { %2348 = vmatprep.subr.bf16.mxu0 %v4692_v3  ;;  %2461 = vmatprep.subr.bf16.mxu1 %v4694_v4  ;;  %v4790_v3 = vcombine.high %v423_v60, %v431_v62  ;;  %v438_v4 = vld [vmem:[%s7224_s2 + $0x520] sm:$0xff]  ;;  %v519_v59 = vld [vmem:[%s7224_s2 + $0x7a8] sm:$0xff] }
  0x9c   : > { %2168 = vmatprep.mubr.bf16.mxu0 %v5371_v35  ;;  %2281 = vmatprep.mubr.bf16.mxu1 %v5371_v35  ;;  %v4803_v22 = vcombine.low %v438_v4, %v446_v6 }
  0x9e   : > { %2349 = vmatpush1.bf16.msra.mxu0 %v4691_v12  ;;  %2462 = vmatpush1.bf16.msra.mxu1 %v4693_v13  ;;  %v4789_v12 = vcombine.low %v423_v60, %v431_v62  ;;  %v4804_v13 = vcombine.high %v438_v4, %v446_v6  ;;  %v527_v60 = vld [vmem:[%s7224_s2 + $0x7e8] sm:$0xff]  ;;  %v288_v4 = vld [vmem:[%s7224_s2 + $0x70] sm:$0xff]  ;;  %v281_v6 = vld [vmem:[%s7224_s2 + $0x38] sm:$0xff] }
  0x9f   : > { %2350 = vmatprep.subr.bf16.mxu0 %v4708_v14  ;;  %2463 = vmatprep.subr.bf16.mxu1 %v4710_v15  ;;  %v4806_v14 = vcombine.high %v439_v8, %v447_v9  ;;  %v454_v15 = vld [vmem:[%s7224_s2 + $0x5a0] sm:$0xff] }
  0xa0   : > { %v4819_v32 = vcombine.low %v454_v15, %v462_v18 }
  0xa1   : > { %2169 = vmatmul.mubr.bf16.gmra.mrb[40].mxu0 %v5396_v46  ;;  %2282 = vmatmul.mubr.bf16.gmra.mrb[40].mxu1 %v5396_v46 }
  0xa2   : > { %2351 = vmatpush1.bf16.msra.mxu0 %v4707_v23  ;;  %2464 = vmatpush1.bf16.msra.mxu1 %v4709_v24  ;;  %v4805_v23 = vcombine.low %v439_v8, %v447_v9  ;;  %v4820_v24 = vcombine.high %v454_v15, %v462_v18  ;;  %v289_v8 = vld [vmem:[%s7224_s2 + $0x78] sm:$0xff]  ;;  %v296_v15 = vld [vmem:[%s7224_s2 + $0xb0] sm:$0xff] }
  0xa3   : > { %2352 = vmatprep.subr.bf16.mxu0 %v4724_v25  ;;  %2465 = vmatprep.subr.bf16.mxu1 %v4726_v26  ;;  %v4822_v25 = vcombine.high %v455_v19, %v463_v20  ;;  %v470_v26 = vld [vmem:[%s7224_s2 + $0x620] sm:$0xff]  ;;  %v304_v18 = vld [vmem:[%s7224_s2 + $0xf0] sm:$0xff] }
  0xa4   : > { %2178 = vmatprep.mubr.bf16.mxu0 %v5405_v50  ;;  %2291 = vmatprep.mubr.bf16.mxu1 %v5405_v50  ;;  %v4835_v42 = vcombine.low %v470_v26, %v478_v27 }
  0xa6   : > { %2353 = vmatpush1.bf16.msra.mxu0 %v4723_v33  ;;  %2466 = vmatpush1.bf16.msra.mxu1 %v4725_v34  ;;  %v4821_v33 = vcombine.low %v455_v19, %v463_v20  ;;  %v4836_v34 = vcombine.high %v470_v26, %v478_v27  ;;  %v297_v19 = vld [vmem:[%s7224_s2 + $0xb8] sm:$0xff]  ;;  %v312_v26 = vld [vmem:[%s7224_s2 + $0x130] sm:$0xff] }
  0xa7   : > { %2354 = vmatprep.subr.bf16.mxu0 %v4740_v36  ;;  %2467 = vmatprep.subr.bf16.mxu1 %v4742_v37  ;;  %v4838_v36 = vcombine.high %v471_v30, %v479_v31  ;;  %v486_v37 = vld [vmem:[%s7224_s2 + $0x6a0] sm:$0xff]  ;;  %v305_v20 = vld [vmem:[%s7224_s2 + $0xf8] sm:$0xff]  ;;  %v320_v27 = vld [vmem:[%s7224_s2 + $0x170] sm:$0xff] }
  0xa8   : > { %v4851_v52 = vcombine.low %v486_v37, %v494_v38 }
  0xa9   : > { %2179 = vmatmul.mubr.bf16.gmra.mrb[44].mxu0 %v5422_v61  ;;  %2292 = vmatmul.mubr.bf16.gmra.mrb[44].mxu1 %v5422_v61 }
  0xaa   : > { %2355 = vmatpush1.bf16.msra.mxu0 %v4739_v43  ;;  %2468 = vmatpush1.bf16.msra.mxu1 %v4741_v44  ;;  %v4837_v43 = vcombine.low %v471_v30, %v479_v31  ;;  %v4852_v44 = vcombine.high %v486_v37, %v494_v38  ;;  %v313_v30 = vld [vmem:[%s7224_s2 + $0x138] sm:$0xff]  ;;  %v328_v37 = vld [vmem:[%s7224_s2 + $0x1b0] sm:$0xff] }
  0xab   : > { %2356 = vmatprep.subr.bf16.mxu0 %v4756_v45  ;;  %2469 = vmatprep.subr.bf16.mxu1 %v4758_v47  ;;  %v4854_v45 = vcombine.high %v487_v39, %v495_v40  ;;  %v502_v47 = vld [vmem:[%s7224_s2 + $0x720] sm:$0xff]  ;;  %v321_v31 = vld [vmem:[%s7224_s2 + $0x178] sm:$0xff]  ;;  %v336_v38 = vld [vmem:[%s7224_s2 + $0x1f0] sm:$0xff] }
  0xac   : > { %2188 = vmatprep.mubr.bf16.mxu0 %v5439_v5  ;;  %2301 = vmatprep.mubr.bf16.mxu1 %v5439_v5  ;;  %v4867_v62 = vcombine.low %v502_v47, %v510_v48 }
  0xae   : > { %2357 = vmatpush1.bf16.msra.mxu0 %v4755_v53  ;;  %2470 = vmatpush1.bf16.msra.mxu1 %v4757_v54  ;;  %v4853_v53 = vcombine.low %v487_v39, %v495_v40  ;;  %v4868_v54 = vcombine.high %v502_v47, %v510_v48  ;;  %v337_v39 = vld [vmem:[%s7224_s2 + $0x1f8] sm:$0xff]  ;;  %v4679_v40 = vcombine.low %v312_v26, %v320_v27 }
  0xaf   : > { %2358 = vmatprep.subr.bf16.mxu0 %v4772_v55  ;;  %2471 = vmatprep.subr.bf16.mxu1 %v4774_v57  ;;  %v4870_v55 = vcombine.high %v503_v56, %v511_v51  ;;  %v518_v57 = vld [vmem:[%s7224_s2 + $0x7a0] sm:$0xff]  ;;  %v345_v47 = vld [vmem:[%s7224_s2 + $0x238] sm:$0xff] }
  0xb0   : > { %v4883_v9 = vcombine.low %v518_v57, %v526_v58  ;;  %v353_v48 = vld [vmem:[%s7224_s2 + $0x278] sm:$0xff] }
  0xb1   : > { %2189 = vmatmul.mubr.bf16.gmra.mrb[48].mxu0 %v5456_v16  ;;  %2302 = vmatmul.mubr.bf16.gmra.mrb[48].mxu1 %v5456_v16 }
  0xb2   : > { %2359 = vmatpush1.bf16.msra.mxu0 %v4771_v0  ;;  %2472 = vmatpush1.bf16.msra.mxu1 %v4773_v1  ;;  %v4869_v0 = vcombine.low %v503_v56, %v511_v51  ;;  %v4884_v1 = vcombine.high %v518_v57, %v526_v58  ;;  %v4695_v56 = vcombine.low %v328_v37, %v336_v38  ;;  %v369_v57 = vld [vmem:[%s7224_s2 + $0x2f8] sm:$0xff] }
  0xb3   : > { %2360 = vmatprep.subr.bf16.mxu0 %v4788_v2  ;;  %2473 = vmatprep.subr.bf16.mxu1 %v4790_v3  ;;  %v4886_v2 = vcombine.high %v519_v59, %v527_v60  ;;  %v280_v3 = vld [vmem:[%s7224_s2 + $0x30] sm:$0xff] }
  0xb4   : > { %2198 = vmatprep.mubr.bf16.mxu0 %v5473_v29  ;;  %2311 = vmatprep.mubr.bf16.mxu1 %v5473_v29 }
  0xb6   : > { %2361 = vmatpush1.bf16.msra.mxu0 %v4787_v11  ;;  %2474 = vmatpush1.bf16.msra.mxu1 %v4789_v12  ;;  %v4885_v11 = vcombine.low %v519_v59, %v527_v60  ;;  %v4648_v12 = vcombine.high %v280_v3, %v288_v4  ;;  %v4713_v59 = vcombine.low %v345_v47, %v353_v48 }
  0xb7   : > { %2362 = vmatprep.subr.bf16.mxu0 %v4804_v13  ;;  %2475 = vmatprep.subr.bf16.mxu1 %v4806_v14  ;;  %v5813_v13 = vld [vmem:[%s5194_s8 + $0x4] ss:$8 sps:$4 sm:$0xff]   ;;  %v4650_v14 = vcombine.high %v281_v6, %v289_v8 }
  0xb9   : > { %2199 = vmatmul.mubr.bf16.gmra.mrb[52].mxu0 %v5498_v41  ;;  %2312 = vmatmul.mubr.bf16.gmra.mrb[52].mxu1 %v5498_v41 }
  0xba   : > { %2363 = vmatpush1.bf16.msra.mxu0 %v4803_v22  ;;  %2476 = vmatpush1.bf16.msra.mxu1 %v4805_v23  ;;  %v4647_v22 = vcombine.low %v280_v3, %v288_v4  ;;  %v4649_v23 = vcombine.low %v281_v6, %v289_v8 }
  0xbb   : > { %2364 = vmatprep.subr.bf16.mxu0 %v4820_v24  ;;  %2477 = vmatprep.subr.bf16.mxu1 %v4822_v25  ;;  %v4664_v24 = vcombine.high %v296_v15, %v304_v18  ;;  %v4666_v25 = vcombine.high %v297_v19, %v305_v20 }
  0xbc   : > { %2208 = vmatprep.mubr.bf16.mxu0 %v5507_v49  ;;  %2321 = vmatprep.mubr.bf16.mxu1 %v5507_v49 }
  0xbe   : > { %2365 = vmatpush1.bf16.msra.mxu0 %v4819_v32  ;;  %2478 = vmatpush1.bf16.msra.mxu1 %v4821_v33  ;;  %v4663_v32 = vcombine.low %v296_v15, %v304_v18  ;;  %v4665_v33 = vcombine.low %v297_v19, %v305_v20  ;;  %v408_v20 = vld [vmem:[%s7224_s2 + $0x430] sm:$0xff] }
  0xbf   : > { %2366 = vmatprep.subr.bf16.mxu0 %v4836_v34  ;;  %2479 = vmatprep.subr.bf16.mxu1 %v4838_v36  ;;  %v4680_v34 = vcombine.high %v312_v26, %v320_v27  ;;  %v4682_v36 = vcombine.high %v313_v30, %v321_v31 }
  0xc1   : > { %2209 = vmatmul.mubr.bf16.gmra.mrb[56].mxu0 %v5532_v63  ;;  %2322 = vmatmul.mubr.bf16.gmra.mrb[56].mxu1 %v5532_v63 }
  0xc2   : > { %2367 = vmatpush1.bf16.msra.mxu0 %v4835_v42  ;;  %2480 = vmatpush1.bf16.msra.mxu1 %v4837_v43  ;;  %v4681_v42 = vcombine.low %v313_v30, %v321_v31  ;;  %v4696_v43 = vcombine.high %v328_v37, %v336_v38  ;;  %v424_v31 = vld [vmem:[%s7224_s2 + $0x4b0] sm:$0xff] }
  0xc3   : > { %2368 = vmatprep.subr.bf16.mxu0 %v4852_v44  ;;  %2481 = vmatprep.subr.bf16.mxu1 %v4854_v45  ;;  %v352_v45 = vld [vmem:[%s7224_s2 + $0x270] sm:$0xff] }
  0xc4   : > { %2218 = vmatprep.mubr.bf16.mxu0 %v5541_v7  ;;  %2331 = vmatprep.mubr.bf16.mxu1 %v5541_v7 }
  0xc6   : > { %2369 = vmatpush1.bf16.msra.mxu0 %v4851_v52  ;;  %2482 = vmatpush1.bf16.msra.mxu1 %v4853_v53  ;;  %v4714_v53 = vcombine.high %v345_v47, %v353_v48  ;;  %v464_v47 = vld [vmem:[%s7224_s2 + $0x5f0] sm:$0xff]  ;;  %v465_v48 = vld [vmem:[%s7224_s2 + $0x5f8] sm:$0xff] }
  0xc7   : > { %2370 = vmatprep.subr.bf16.mxu0 %v4868_v54  ;;  %2483 = vmatprep.subr.bf16.mxu1 %v4870_v55  ;;  %v360_v54 = vld [vmem:[%s7224_s2 + $0x2b0] sm:$0xff] }
  0xc8   : > { %v368_v55 = vld [vmem:[%s7224_s2 + $0x2f0] sm:$0xff] }
  0xc9   : > { %2219 = vmatmul.mubr.bf16.gmra.mrb[60].mxu0 %v5566_v21  ;;  %2332 = vmatmul.mubr.bf16.gmra.mrb[60].mxu1 %v5566_v21  ;;  %v4728_v60 = vcombine.high %v360_v54, %v368_v55  ;;  %v4727_v3 = vcombine.low %v360_v54, %v368_v55  ;;  %v480_v54 = vld [vmem:[%s7224_s2 + $0x670] sm:$0xff]  ;;  %v473_v55 = vld [vmem:[%s7224_s2 + $0x638] sm:$0xff] }
  0xca   : > { %2371 = vmatpush1.bf16.msra.mxu0 %v4867_v62  ;;  %2484 = vmatpush1.bf16.msra.mxu1 %v4869_v0  ;;  %v384_v0 = vld [vmem:[%s7224_s2 + $0x370] sm:$0xff] }
  0xcb   : > { %2372 = vmatprep.subr.bf16.mxu0 %v4884_v1  ;;  %2485 = vmatprep.subr.bf16.mxu1 %v4886_v2  ;;  %v377_v1 = vld [vmem:[%s7224_s2 + $0x338] sm:$0xff] }
  0xcc   : > { %2374 = vmatprep.mubr.bf16.mxu0 %v5813_v13  ;;  %2487 = vmatprep.mubr.bf16.mxu1 %v5813_v13  ;;  %v385_v2 = vld [vmem:[%s7224_s2 + $0x378] sm:$0xff] }
  0xcd   : > { %v4746_v8 = vcombine.high %v377_v1, %v385_v2  ;;  %v4745_v15 = vcombine.low %v377_v1, %v385_v2 }
  0xce   : > { %2373 = vmatpush1.bf16.msra.mxu0 %v4883_v9  ;;  %2486 = vmatpush1.bf16.msra.mxu1 %v4885_v11  ;;  %v392_v9 = vld [vmem:[%s7224_s2 + $0x3b0] sm:$0xff] }
  0xcf   : > { %2568 = vmatprep.subr.bf16.mxu0 %v4648_v12  ;;  %2681 = vmatprep.subr.bf16.mxu1 %v4650_v14  ;;  %v400_v11 = vld [vmem:[%s7224_s2 + $0x3f0] sm:$0xff] }
  0xd0   : > { %v5907_v12 = vld [vmem:[%s5194_s8 + $0x34] ss:$8 sps:$4 sm:$0xff]   ;;  %v4760_v18 = vcombine.high %v392_v9, %v400_v11 }
  0xd1   : > { %2375 = vmatmul.mubr.bf16.vlgmr.msra.gmra.mrb[64].mxu0 %v5328_v10  ;;  %2488 = vmatmul.mubr.bf16.vlgmr.msra.gmra.mrb[64].mxu1 %v5328_v10  ;;  %v329_v10 = vld [vmem:[%s7224_s2 + $0x1b8] sm:$0xff] }
  0xd2   : > { %2569 = vmatpush1.bf16.msra.mxu0 %v4647_v22  ;;  %2682 = vmatpush1.bf16.msra.mxu1 %v4649_v23  ;;  %v4698_v44 = vcombine.high %v329_v10, %v337_v39  ;;  %v4697_v51 = vcombine.low %v329_v10, %v337_v39  ;;  %v416_v22 = vld [vmem:[%s7224_s2 + $0x470] sm:$0xff]  ;;  %v409_v23 = vld [vmem:[%s7224_s2 + $0x438] sm:$0xff] }
  0xd3   : > { %2570 = vmatprep.subr.bf16.mxu0 %v4664_v24  ;;  %2683 = vmatprep.subr.bf16.mxu1 %v4666_v25  ;;  %v417_v24 = vld [vmem:[%s7224_s2 + $0x478] sm:$0xff]  ;;  %v4759_v25 = vcombine.low %v392_v9, %v400_v11  ;;  %v4776_v27 = vcombine.high %v408_v20, %v416_v22  ;;  %v448_v10 = vld [vmem:[%s7224_s2 + $0x570] sm:$0xff] }
  0xd4   : > { %2384 = vmatprep.mubr.bf16.mxu0 %v5337_v17  ;;  %2497 = vmatprep.mubr.bf16.mxu1 %v5337_v17  ;;  %v344_v17 = vld [vmem:[%s7224_s2 + $0x230] sm:$0xff]  ;;  %v4778_v30 = vcombine.high %v409_v23, %v417_v24  ;;  %v441_v39 = vld [vmem:[%s7224_s2 + $0x538] sm:$0xff] }
  0xd5   : > { %v4712_v52 = vcombine.high %v344_v17, %v352_v45  ;;  %v4711_v58 = vcombine.low %v344_v17, %v352_v45  ;;  %v456_v45 = vld [vmem:[%s7224_s2 + $0x5b0] sm:$0xff]  ;;  %v513_v9 = vld [vmem:[%s7224_s2 + $0x778] sm:$0xff] }
  0xd6   : > { %2571 = vmatpush1.bf16.msra.mxu0 %v4663_v32  ;;  %2684 = vmatpush1.bf16.msra.mxu1 %v4665_v33  ;;  %v432_v32 = vld [vmem:[%s7224_s2 + $0x4f0] sm:$0xff]  ;;  %v433_v33 = vld [vmem:[%s7224_s2 + $0x4f8] sm:$0xff] }
  0xd7   : > { %2572 = vmatprep.subr.bf16.mxu0 %v4680_v34  ;;  %2685 = vmatprep.subr.bf16.mxu1 %v4682_v36  ;;  %v4775_v34 = vcombine.low %v408_v20, %v416_v22  ;;  %v4777_v36 = vcombine.low %v409_v23, %v417_v24  ;;  %v4792_v37 = vcombine.high %v424_v31, %v432_v32 }
  0xd9   : > { %2385 = vmatmul.mubr.bf16.gmra.mrb[68].mxu0 %v5362_v28  ;;  %2498 = vmatmul.mubr.bf16.gmra.mrb[68].mxu1 %v5362_v28  ;;  %v361_v28 = vld [vmem:[%s7224_s2 + $0x2b8] sm:$0xff] }
  0xda   : > { %2573 = vmatpush1.bf16.msra.mxu0 %v4679_v40  ;;  %2686 = vmatpush1.bf16.msra.mxu1 %v4681_v42  ;;  %v4730_v62 = vcombine.high %v361_v28, %v369_v57  ;;  %v4729_v4 = vcombine.low %v361_v28, %v369_v57  ;;  %v449_v40 = vld [vmem:[%s7224_s2 + $0x578] sm:$0xff]  ;;  %v4791_v42 = vcombine.low %v424_v31, %v432_v32  ;;  %v5046_v31 = vld [vmem:[%s5194_s8 + $0x20] ss:$8 sps:$4 sm:$0xff]  }
  0xdb   : > { %2574 = vmatprep.subr.bf16.mxu0 %v4696_v43  ;;  %2687 = vmatprep.subr.bf16.mxu1 %v4698_v44  ;;  %v4810_v17 = vcombine.high %v441_v39, %v449_v40  ;;  %v481_v28 = vld [vmem:[%s7224_s2 + $0x678] sm:$0xff]  ;;  %v4823_v57 = vcombine.low %v456_v45, %v464_v47 }
  0xdc   : > { %2394 = vmatprep.mubr.bf16.mxu0 %v5371_v35  ;;  %2507 = vmatprep.mubr.bf16.mxu1 %v5371_v35  ;;  %v376_v35 = vld [vmem:[%s7224_s2 + $0x330] sm:$0xff]  ;;  %v4841_v2 = vcombine.low %v473_v55, %v481_v28 }
  0xdd   : > { %v4744_v6 = vcombine.high %v376_v35, %v384_v0  ;;  %v4743_v14 = vcombine.low %v376_v35, %v384_v0  ;;  %v496_v35 = vld [vmem:[%s7224_s2 + $0x6f0] sm:$0xff]  ;;  %v497_v0 = vld [vmem:[%s7224_s2 + $0x6f8] sm:$0xff] }
  0xde   : > { %2575 = vmatpush1.bf16.msra.mxu0 %v4695_v56  ;;  %2688 = vmatpush1.bf16.msra.mxu1 %v4697_v51  ;;  %v4809_v51 = vcombine.low %v441_v39, %v449_v40 }
  0xdf   : > { %2576 = vmatprep.subr.bf16.mxu0 %v4712_v52  ;;  %2689 = vmatprep.subr.bf16.mxu1 %v4714_v53  ;;  %v4824_v52 = vcombine.high %v456_v45, %v464_v47  ;;  %v4994_v47 = vld [vmem:[%s7225_s3 + $0x4] ss:$8 sps:$4 sm:$0xff]  }
  0xe1   : > { %2395 = vmatmul.mubr.bf16.gmra.mrb[72].mxu0 %v5396_v46  ;;  %2508 = vmatmul.mubr.bf16.gmra.mrb[72].mxu1 %v5396_v46  ;;  %v393_v46 = vld [vmem:[%s7224_s2 + $0x3b8] sm:$0xff] }
  0xe2   : > { %2577 = vmatpush1.bf16.msra.mxu0 %v4711_v58  ;;  %2690 = vmatpush1.bf16.msra.mxu1 %v4713_v59 }
  0xe3   : > { %2578 = vmatprep.subr.bf16.mxu0 %v4728_v60  ;;  %2691 = vmatprep.subr.bf16.mxu1 %v4730_v62  ;;  %v4842_v60 = vcombine.high %v473_v55, %v481_v28  ;;  %v488_v62 = vld [vmem:[%s7224_s2 + $0x6b0] sm:$0xff] }
  0xe4   : > { %2404 = vmatprep.mubr.bf16.mxu0 %v5405_v50  ;;  %2517 = vmatprep.mubr.bf16.mxu1 %v5907_v12  ;;  %v401_v50 = vld [vmem:[%s7224_s2 + $0x3f8] sm:$0xff]  ;;  %v4855_v11 = vcombine.low %v488_v62, %v496_v35 }
  0xe5   : > { %v4762_v19 = vcombine.high %v393_v46, %v401_v50  ;;  %v4761_v26 = vcombine.low %v393_v46, %v401_v50 }
  0xe6   : > { %2579 = vmatpush1.bf16.msra.mxu0 %v4727_v3  ;;  %2692 = vmatpush1.bf16.msra.mxu1 %v4729_v4  ;;  %v4856_v3 = vcombine.high %v488_v62, %v496_v35  ;;  %v5051_v62 = vld [vmem:[%s5194_s8 + $0x50] ss:$8 sps:$4 sm:$0xff]   ;;  %v4998_v35 = vld [vmem:[%s7225_s3 + $0x20] ss:$8 sps:$4 sm:$0xff]  }
  0xe7   : > { %2580 = vmatprep.subr.bf16.mxu0 %v4744_v6  ;;  %2693 = vmatprep.subr.bf16.mxu1 %v4746_v8  ;;  %v512_v6 = vld [vmem:[%s7224_s2 + $0x770] sm:$0xff]  ;;  %v505_v8 = vld [vmem:[%s7224_s2 + $0x738] sm:$0xff] }
  0xe8   : > { %v4873_v22 = vcombine.low %v505_v8, %v513_v9 }
  0xe9   : > { %2405 = vmatmul.mubr.bf16.gmra.mrb[76].mxu0 %v5422_v61  ;;  %2518 = vmatmul.mubr.bf16.gmra.mrb[76].mxu1 %v5422_v61  ;;  %v425_v61 = vld [vmem:[%s7224_s2 + $0x4b8] sm:$0xff] }
  0xea   : > { %2581 = vmatpush1.bf16.msra.mxu0 %v4743_v14  ;;  %2694 = vmatpush1.bf16.msra.mxu1 %v4745_v15  ;;  %v4794_v38 = vcombine.high %v425_v61, %v433_v33  ;;  %v4793_v43 = vcombine.low %v425_v61, %v433_v33  ;;  %v4874_v14 = vcombine.high %v505_v8, %v513_v9  ;;  %v520_v15 = vld [vmem:[%s7224_s2 + $0x7b0] sm:$0xff] }
  0xeb   : > { %2582 = vmatprep.subr.bf16.mxu0 %v4760_v18  ;;  %2695 = vmatprep.subr.bf16.mxu1 %v4762_v19  ;;  %v528_v18 = vld [vmem:[%s7224_s2 + $0x7f0] sm:$0xff]  ;;  %v529_v19 = vld [vmem:[%s7224_s2 + $0x7f8] sm:$0xff] }
  0xec   : > { %2414 = vmatprep.mubr.bf16.mxu0 %v5439_v5  ;;  %2527 = vmatprep.mubr.bf16.mxu1 %v5439_v5  ;;  %v440_v5 = vld [vmem:[%s7224_s2 + $0x530] sm:$0xff]  ;;  %v4888_v23 = vcombine.high %v520_v15, %v528_v18 }
  0xed   : > { %v4808_v44 = vcombine.high %v440_v5, %v448_v10  ;;  %v4807_v56 = vcombine.low %v440_v5, %v448_v10  ;;  %v5047_v5 = vld [vmem:[%s5194_s8 + $0x30] ss:$8 sps:$4 sm:$0xff]  }
  0xee   : > { %2583 = vmatpush1.bf16.msra.mxu0 %v4759_v25  ;;  %2696 = vmatpush1.bf16.msra.mxu1 %v4761_v26  ;;  %v5042_v26 = vld [vmem:[%s5194_s8] ss:$8 sps:$4 sm:$0xff]  }
  0xef   : > { %2584 = vmatprep.subr.bf16.mxu0 %v4776_v27  ;;  %2697 = vmatprep.subr.bf16.mxu1 %v4778_v30  ;;  %v5043_v27 = vld [vmem:[%s5194_s8 + $0x14] ss:$8 sps:$4 sm:$0xff]   ;;  %v5045_v30 = vld [vmem:[%s5194_s8 + $0x24] ss:$8 sps:$4 sm:$0xff]  }
  0xf1   : > { %2415 = vmatmul.mubr.bf16.gmra.mrb[80].mxu0 %v5456_v16  ;;  %2528 = vmatmul.mubr.bf16.gmra.mrb[80].mxu1 %v5456_v16  ;;  %v457_v16 = vld [vmem:[%s7224_s2 + $0x5b8] sm:$0xff] }
  0xf2   : > { %2585 = vmatpush1.bf16.msra.mxu0 %v4775_v34  ;;  %2698 = vmatpush1.bf16.msra.mxu1 %v4777_v36  ;;  %v4826_v53 = vcombine.high %v457_v16, %v465_v48  ;;  %v4825_v58 = vcombine.low %v457_v16, %v465_v48  ;;  %v5049_v16 = vld [vmem:[%s5194_s8 + $0x40] ss:$8 sps:$4 sm:$0xff]  }
  0xf3   : > { %2586 = vmatprep.subr.bf16.mxu0 %v4792_v37  ;;  %2699 = vmatprep.subr.bf16.mxu1 %v4794_v38  ;;  %v4992_v48 = vld [vmem:[%s7225_s3] ss:$8 sps:$4 sm:$0xff]  }
  0xf4   : > { %2424 = vmatprep.mubr.bf16.mxu0 %v5473_v29  ;;  %2537 = vmatprep.mubr.bf16.mxu1 %v5473_v29  ;;  %v472_v29 = vld [vmem:[%s7224_s2 + $0x630] sm:$0xff] }
  0xf5   : > { %v4840_v59 = vcombine.high %v472_v29, %v480_v54  ;;  %v4839_v1 = vcombine.low %v472_v29, %v480_v54  ;;  %v4995_v54 = vld [vmem:[%s7225_s3 + $0x10] ss:$8 sps:$4 sm:$0xff]  }
  0xf6   : > { %2587 = vmatpush1.bf16.msra.mxu0 %v4791_v42  ;;  %2700 = vmatpush1.bf16.msra.mxu1 %v4793_v43 }
  0xf7   : > { %2588 = vmatprep.subr.bf16.mxu0 %v4808_v44  ;;  %2701 = vmatprep.subr.bf16.mxu1 %v4810_v17 }
  0xf9   : > { %2425 = vmatmul.mubr.bf16.gmra.mrb[84].mxu0 %v5498_v41  ;;  %2538 = vmatmul.mubr.bf16.gmra.mrb[84].mxu1 %v5498_v41  ;;  %v489_v41 = vld [vmem:[%s7224_s2 + $0x6b8] sm:$0xff] }
  0xfa   : > { %2589 = vmatpush1.bf16.msra.mxu0 %v4807_v56  ;;  %2702 = vmatpush1.bf16.msra.mxu1 %v4809_v51  ;;  %v4858_v4 = vcombine.high %v489_v41, %v497_v0  ;;  %v4857_v46 = vcombine.low %v489_v41, %v497_v0  ;;  %v5050_v56 = vld [vmem:[%s5194_s8 + $0x54] ss:$8 sps:$4 sm:$0xff]   ;;  %v5052_v41 = vld [vmem:[%s5194_s8 + $0x64] ss:$8 sps:$4 sm:$0xff]  }
  0xfb   : > { %2590 = vmatprep.subr.bf16.mxu0 %v4824_v52  ;;  %2703 = vmatprep.subr.bf16.mxu1 %v4826_v53  ;;  %v4997_v52 = vld [vmem:[%s7225_s3 + $0x14] ss:$8 sps:$4 sm:$0xff]  }
  0xfc   : > { %2434 = vmatprep.mubr.bf16.mxu0 %v5507_v49  ;;  %2547 = vmatprep.mubr.bf16.mxu1 %v5507_v49  ;;  %v504_v49 = vld [vmem:[%s7224_s2 + $0x730] sm:$0xff] }
  0xfd   : > { %v4872_v50 = vcombine.high %v504_v49, %v512_v6  ;;  %v4871_v20 = vcombine.low %v504_v49, %v512_v6 }
  0xfe   : > { %2591 = vmatpush1.bf16.msra.mxu0 %v4823_v57  ;;  %2704 = vmatpush1.bf16.msra.mxu1 %v4825_v58 }
  0xff   : > { %2592 = vmatprep.subr.bf16.mxu0 %v4840_v59  ;;  %2705 = vmatprep.subr.bf16.mxu1 %v4842_v60  ;;  %v5000_v60 = vld [vmem:[%s7225_s3 + $0x24] ss:$8 sps:$4 sm:$0xff]  }
 0x101   : > { %2435 = vmatmul.mubr.bf16.gmra.mrb[88].mxu0 %v5532_v63  ;;  %2548 = vmatmul.mubr.bf16.gmra.mrb[88].mxu1 %v5532_v63  ;;  %v521_v63 = vld [vmem:[%s7224_s2 + $0x7b8] sm:$0xff] }
 0x102   : > { %2593 = vmatpush1.bf16.msra.mxu0 %v4839_v1  ;;  %2706 = vmatpush1.bf16.msra.mxu1 %v4841_v2  ;;  %v4890_v24 = vcombine.high %v521_v63, %v529_v19  ;;  %v4889_v25 = vcombine.low %v521_v63, %v529_v19  ;;  %v5003_v1 = vld [vmem:[%s7225_s3 + $0x34] ss:$8 sps:$4 sm:$0xff]  }
 0x103   : > { %2594 = vmatprep.subr.bf16.mxu0 %v4856_v3  ;;  %2707 = vmatprep.subr.bf16.mxu1 %v4858_v4  ;;  %v5001_v4 = vld [vmem:[%s7225_s3 + $0x30] ss:$8 sps:$4 sm:$0xff]   ;;  %v5009_v63 = vld [vmem:[%s7225_s3 + $0x54] ss:$8 sps:$4 sm:$0xff]  }
 0x104   : > { %2444 = vmatprep.mubr.bf16.mxu0 %v5541_v7  ;;  %2557 = vmatprep.mubr.bf16.mxu1 %v5541_v7  ;;  %v4887_v7 = vcombine.low %v520_v15, %v528_v18  ;;  %v5054_v15 = vld [vmem:[%s5194_s8 + $0x74] ss:$8 sps:$4 sm:$0xff]  }
 0x106   : > { %2595 = vmatpush1.bf16.msra.mxu0 %v4855_v11  ;;  %2708 = vmatpush1.bf16.msra.mxu1 %v4857_v46  ;;  %v5006_v46 = vld [vmem:[%s7225_s3 + $0x44] ss:$8 sps:$4 sm:$0xff]  }
 0x107   : > { %2596 = vmatprep.subr.bf16.mxu0 %v4872_v50  ;;  %2709 = vmatprep.subr.bf16.mxu1 %v4874_v14  ;;  %v5053_v50 = vld [vmem:[%s5194_s8 + $0x60] ss:$8 sps:$4 sm:$0xff]  }
 0x108   : > { %v5004_v14 = vld [vmem:[%s7225_s3 + $0x40] ss:$8 sps:$4 sm:$0xff]  }
 0x109   : > { %2445 = vmatmul.mubr.bf16.gmra.mrb[92].mxu0 %v5566_v21  ;;  %2558 = vmatmul.mubr.bf16.gmra.mrb[92].mxu1 %v5566_v21  ;;  %v5044_v21 = vld [vmem:[%s5194_s8 + $0x10] ss:$8 sps:$4 sm:$0xff]  }
 0x10a   : > { %2597 = vmatpush1.bf16.msra.mxu0 %v4871_v20  ;;  %2710 = vmatpush1.bf16.msra.mxu1 %v4873_v22  ;;  %v5007_v22 = vld [vmem:[%s7225_s3 + $0x50] ss:$8 sps:$4 sm:$0xff]  }
 0x10b   : > { %2598 = vmatprep.subr.bf16.mxu0 %v4888_v23  ;;  %2711 = vmatprep.subr.bf16.mxu1 %v4890_v24 }
 0x10c   : > { %2600 = vmatprep.mubr.bf16.mxu0 %v5813_v13  ;;  %2713 = vmatprep.mubr.bf16.mxu1 %v5813_v13 }
 0x10e   : > { %2599 = vmatpush1.bf16.msra.mxu0 %v4887_v7  ;;  %2712 = vmatpush1.bf16.msra.mxu1 %v4889_v25 }
 0x10f   : > { %4390 = vmatprep.subr.bf16.mxu0 %v4994_v47  ;;  %4928 = vmatprep.subr.bf16.mxu1 %v4994_v47 }
 0x111   : > { %2601 = vmatmul.mubr.bf16.vlgmr.msra.gmra.mrb[96].mxu0 %v5042_v26  ;;  %2714 = vmatmul.mubr.bf16.vlgmr.msra.gmra.mrb[96].mxu1 %v5042_v26 }
 0x112   : > { %2610 = vmatprep.mubr.bf16.mxu0 %v5043_v27  ;;  %2723 = vmatprep.mubr.bf16.mxu1 %v5043_v27  ;;  %v5012_v27 = vld [vmem:[%s7225_s3 + $0x64] ss:$8 sps:$4 sm:$0xff]  }
 0x113   : > { %4391 = vmatpush1.bf16.msra.mxu0 %v4992_v48  ;;  %4944 = vmatpush1.bf16.msra.mxu1 %v4992_v48 }
 0x114   : > { %4392 = vmatprep.subr.bf16.mxu0 %v4997_v52  ;;  %4929 = vmatprep.subr.bf16.mxu1 %v4997_v52  ;;  %v6193_v52 = vld [vmem:[%s6174_s12] sm:$0xff] }
 0x117   : > { %4393 = vmatpush1.bf16.msra.mxu0 %v4995_v54  ;;  %4945 = vmatpush1.bf16.msra.mxu1 %v4995_v54  ;;  %v6196_v54 = vld [vmem:[%s6174_s12 + $0x8] sm:$0xff] }
 0x118   : > { %4394 = vmatprep.subr.bf16.mxu0 %v5000_v60  ;;  %4930 = vmatprep.subr.bf16.mxu1 %v5000_v60 }
 0x119   : > { %2611 = vmatmul.mubr.bf16.gmra.mrb[100].mxu0 %v5044_v21  ;;  %2724 = vmatmul.mubr.bf16.gmra.mrb[100].mxu1 %v5044_v21  ;;  %v5055_v21 = vld [vmem:[%s5194_s8 + $0x70] ss:$8 sps:$4 sm:$0xff]  }
 0x11a   : > { %2620 = vmatprep.mubr.bf16.mxu0 %v5045_v30  ;;  %2733 = vmatprep.mubr.bf16.mxu1 %v5045_v30  ;;  %v5010_v30 = vld [vmem:[%s7225_s3 + $0x60] ss:$8 sps:$4 sm:$0xff]  }
 0x11b   : > { %4395 = vmatpush1.bf16.msra.mxu0 %v4998_v35  ;;  %4946 = vmatpush1.bf16.msra.mxu1 %v4998_v35  ;;  %v6203_v35 = vld [vmem:[%s6174_s12 + $0x40] sm:$0xff] }
 0x11c   : > { %4396 = vmatprep.subr.bf16.mxu0 %v5003_v1  ;;  %4931 = vmatprep.subr.bf16.mxu1 %v5003_v1 }
 0x11f   : > { %4397 = vmatpush1.bf16.msra.mxu0 %v5001_v4  ;;  %4947 = vmatpush1.bf16.msra.mxu1 %v5001_v4  ;;  %v5018_v4 = vld [vmem:[%s7225_s3 + $0x84] ss:$8 sps:$4 sm:$0xff]  }
 0x120   : > { %4398 = vmatprep.subr.bf16.mxu0 %v5006_v46  ;;  %4932 = vmatprep.subr.bf16.mxu1 %v5006_v46  ;;  %v6214_v46 = vld [vmem:[%s6174_s12 + $0x80] sm:$0xff] }
 0x121   : > { %2621 = vmatmul.mubr.bf16.gmra.mrb[104].mxu0 %v5046_v31  ;;  %2734 = vmatmul.mubr.bf16.gmra.mrb[104].mxu1 %v5046_v31 }
 0x122   : > { %2630 = vmatprep.mubr.bf16.mxu0 %v5907_v12  ;;  %2743 = vmatprep.mubr.bf16.mxu1 %v5907_v12  ;;  %v5048_v12 = vld [vmem:[%s5194_s8 + $0x44] ss:$8 sps:$4 sm:$0xff]  }
 0x123   : > { %4399 = vmatpush1.bf16.msra.mxu0 %v5004_v14  ;;  %4948 = vmatpush1.bf16.msra.mxu1 %v5004_v14  ;;  %v5016_v14 = vld [vmem:[%s7225_s3 + $0x80] ss:$8 sps:$4 sm:$0xff]  }
 0x124   : > { %v6039_v13 = vpop.f32.mrb[0].mxu0  ;;  %v6041_v32 = vpop.f32.mrb[0].mxu1  ;;  %4400 = vmatprep.subr.bf16.mxu0 %v5009_v63  ;;  %4933 = vmatprep.subr.bf16.mxu1 %v5009_v63  ;;  %v6238_v63 = vld [vmem:[%s6174_s12 + $0x108] sm:$0xff] }
 0x125   : > { %v6043_v61 = vpop.f32.mrb[1].mxu0  ;;  %v6045_v33 = vpop.f32.mrb[1].mxu1 }
 0x126   : > { %v6047_v34 = vpop.f32.mrb[2].mxu0  ;;  %v6049_v36 = vpop.f32.mrb[2].mxu1 }
 0x127   : > { %v6051_v37 = vpop.f32.mrb[3].mxu0  ;;  %v6053_v38 = vpop.f32.mrb[3].mxu1  ;;  %4401 = vmatpush1.bf16.msra.mxu0 %v5007_v22  ;;  %4949 = vmatpush1.bf16.msra.mxu1 %v5007_v22  ;;  %v6225_v22 = vld [vmem:[%s6174_s12 + $0xc0] sm:$0xff] }
 0x128   : > { %4402 = vmatprep.subr.bf16.mxu0 %v5012_v27  ;;  %4934 = vmatprep.subr.bf16.mxu1 %v5012_v27  ;;  %v6228_v27 = vld [vmem:[%s6174_s12 + $0xc8] sm:$0xff] }
 0x129   : > { %2631 = vmatmul.mubr.bf16.gmra.mrb[108].mxu0 %v5047_v5  ;;  %2744 = vmatmul.mubr.bf16.gmra.mrb[108].mxu1 %v5047_v5  ;;  %v5015_v5 = vld [vmem:[%s7225_s3 + $0x74] ss:$8 sps:$4 sm:$0xff]  }
 0x12a   : > { %2640 = vmatprep.mubr.bf16.mxu0 %v5048_v12  ;;  %2753 = vmatprep.mubr.bf16.mxu1 %v5048_v12 }
 0x12b   : > { %4403 = vmatpush1.bf16.msra.mxu0 %v5010_v30  ;;  %4950 = vmatpush1.bf16.msra.mxu1 %v5010_v30  ;;  %v6248_v30 = vld [vmem:[%s6174_s12 + $0x148] sm:$0xff] }
 0x12c   : > { %v6057_v10 = vpop.f32.mrb[4].mxu0  ;;  %v6059_v39 = vpop.f32.mrb[4].mxu1  ;;  %4404 = vmatprep.subr.bf16.mxu0 %v5015_v5  ;;  %4935 = vmatprep.subr.bf16.mxu1 %v5015_v5 }
 0x12d   : > { %v6061_v40 = vpop.f32.mrb[5].mxu0  ;;  %v6063_v42 = vpop.f32.mrb[5].mxu1 }
 0x12e   : > { %v6065_v43 = vpop.f32.mrb[6].mxu0  ;;  %v6067_v44 = vpop.f32.mrb[6].mxu1 }
 0x12f   : > { %v6069_v17 = vpop.f32.mrb[7].mxu0  ;;  %v6071_v45 = vpop.f32.mrb[7].mxu1 }
 0x131   : > { %2641 = vmatmul.mubr.bf16.gmra.mrb[112].mxu0 %v5049_v16  ;;  %2754 = vmatmul.mubr.bf16.gmra.mrb[112].mxu1 %v5049_v16  ;;  %v5013_v16 = vld [vmem:[%s7225_s3 + $0x70] ss:$8 sps:$4 sm:$0xff]  }
 0x132   : > { %2650 = vmatprep.mubr.bf16.mxu0 %v5050_v56  ;;  %2763 = vmatprep.mubr.bf16.mxu1 %v5050_v56 }
 0x133   : > { %4405 = vmatpush1.bf16.msra.mxu0 %v5013_v16  ;;  %4951 = vmatpush1.bf16.msra.mxu1 %v5013_v16  ;;  %v5021_v16 = vld [vmem:[%s7225_s3 + $0x94] ss:$8 sps:$4 sm:$0xff]  }
 0x134   : > { %v6081_v51 = vpop.f32.mrb[8].mxu0  ;;  %v6086_v53 = vpop.f32.mrb[8].mxu1  ;;  %4406 = vmatprep.subr.bf16.mxu0 %v5018_v4  ;;  %4936 = vmatprep.subr.bf16.mxu1 %v5018_v4  ;;  %v6333_v4 = vld [vmem:[%s6174_s12 + $0x2c0] sm:$0xff] }
 0x135   : > { %v6088_v29 = vpop.f32.mrb[9].mxu0  ;;  %v6093_v55 = vpop.f32.mrb[9].mxu1  ;;  %7306 = vst [vmem:[#allocation43_spill] sm:$0xff] %v6333_v4 }
 0x136   : > { %v6095_v28 = vpop.f32.mrb[10].mxu0  ;;  %v6097_v57 = vpop.f32.mrb[10].mxu1 }
 0x137   : > { %v6099_v58 = vpop.f32.mrb[11].mxu0  ;;  %v6101_v59 = vpop.f32.mrb[11].mxu1  ;;  %4407 = vmatpush1.bf16.msra.mxu0 %v5016_v14  ;;  %4952 = vmatpush1.bf16.msra.mxu1 %v5016_v14  ;;  %v6343_v14 = vld [vmem:[%s6174_s12 + $0x300] sm:$0xff] }
 0x138   : > { %4408 = vmatprep.subr.bf16.mxu0 %v5021_v16  ;;  %4937 = vmatprep.subr.bf16.mxu1 %v5021_v16  ;;  %7308 = vst [vmem:[#allocation45_spill] sm:$0xff] %v6343_v14  ;;  %v5027_v16 = vld [vmem:[%s7225_s3 + $0xb4] ss:$8 sps:$4 sm:$0xff]   ;;  %v7324_v14 = vunpack.c.l.bf16 %v6193_v52 }
 0x139   : > { %2651 = vmatmul.mubr.bf16.gmra.mrb[116].mxu0 %v5051_v62  ;;  %2764 = vmatmul.mubr.bf16.gmra.mrb[116].mxu1 %v5051_v62 }
 0x13a   : > { %2660 = vmatprep.mubr.bf16.mxu0 %v5052_v41  ;;  %2773 = vmatprep.mubr.bf16.mxu1 %v5052_v41  ;;  %v6206_v41 = vld [vmem:[%s6174_s12 + $0x48] sm:$0xff] }
 0x13c   : > { %v6111_v0 = vpop.f32.mrb[12].mxu0  ;;  %v6116_v2 = vpop.f32.mrb[12].mxu1 }
 0x13d   : > { %7266 = vst [vmem:[#allocation3_spill] sm:$0xff] %v6116_v2  ;;  %v6118_v3 = vpop.f32.mrb[13].mxu0  ;;  %v6123_v49 = vpop.f32.mrb[13].mxu1  ;;  %v3277_v2 = vld [vmem:[%s6174_s12 + $0xd0] sm:$0xff] }
 0x13e   : > { %7267 = vst [vmem:[#allocation4_spill] sm:$0xff] %v6118_v3  ;;  %7268 = vst [vmem:[#allocation5_spill] sm:$0xff] %v6123_v49  ;;  %v6125_v6 = vpop.f32.mrb[14].mxu0  ;;  %v6127_v8 = vpop.f32.mrb[14].mxu1 }
 0x13f   : > { %7269 = vst [vmem:[#allocation6_spill] sm:$0xff] %v6125_v6  ;;  %7270 = vst [vmem:[#allocation7_spill] sm:$0xff] %v6127_v8  ;;  %v6129_v9 = vpop.f32.mrb[15].mxu0  ;;  %v6131_v11 = vpop.f32.mrb[15].mxu1  ;;  %v5031_v6 = vld [vmem:[%s7225_s3 + $0xd0] ss:$8 sps:$4 sm:$0xff]  }
 0x140   : > { %7271 = vst [vmem:[#allocation8_spill] sm:$0xff] %v6129_v9  ;;  %7272 = vst [vmem:[#allocation9_spill] sm:$0xff] %v6131_v11  ;;  %v6346_v11 = vld [vmem:[%s6174_s12 + $0x308] sm:$0xff]  ;;  %v3275_v9 = vld [vmem:[%s6174_s12 + $0x50] sm:$0xff] }
 0x141   : > { %2661 = vmatmul.mubr.bf16.gmra.mrb[120].mxu0 %v5053_v50  ;;  %2774 = vmatmul.mubr.bf16.gmra.mrb[120].mxu1 %v5053_v50  ;;  %v6217_v50 = vld [vmem:[%s6174_s12 + $0x88] sm:$0xff]  ;;  %7309 = vst [vmem:[#allocation46_spill] sm:$0xff] %v6346_v11  ;;  %v6412_v11 = vld [vmem:[%s6174_s12 + $0x58] sm:$0xff]  ;;  %v3292_v4 = vunpack.c.l.bf16 %v3275_v9 }
 0x142   : > { %2670 = vmatprep.mubr.bf16.mxu0 %v5054_v15  ;;  %2783 = vmatprep.mubr.bf16.mxu1 %v5054_v15  ;;  %v6235_v15 = vld [vmem:[%s6174_s12 + $0x100] sm:$0xff]  ;;  %v3436_v8 = vunpack.c.l.bf16 %v6412_v11 }
 0x144   : > { %v6141_v18 = vpop.f32.mrb[16].mxu0  ;;  %v6146_v19 = vpop.f32.mrb[16].mxu1 }
 0x145   : > { %7273 = vst [vmem:[#allocation10_spill] sm:$0xff] %v6141_v18  ;;  %7274 = vst [vmem:[#allocation11_spill] sm:$0xff] %v6146_v19  ;;  %v6148_v20 = vpop.f32.mrb[17].mxu0  ;;  %v6153_v23 = vpop.f32.mrb[17].mxu1  ;;  %v6336_v19 = vld [vmem:[%s6174_s12 + $0x2c8] sm:$0xff] }
 0x146   : > { %7275 = vst [vmem:[#allocation12_spill] sm:$0xff] %v6148_v20  ;;  %7276 = vst [vmem:[#allocation13_spill] sm:$0xff] %v6153_v23  ;;  %v6155_v24 = vpop.f32.mrb[18].mxu0  ;;  %v6157_v7 = vpop.f32.mrb[18].mxu1  ;;  %v6323_v23 = vld [vmem:[%s6174_s12 + $0x288] sm:$0xff] }
 0x147   : > { %7277 = vst [vmem:[#allocation14_spill] sm:$0xff] %v6155_v24  ;;  %7278 = vst [vmem:[#allocation15_spill] sm:$0xff] %v6157_v7  ;;  %v6159_v25 = vpop.f32.mrb[19].mxu0  ;;  %v6161_v26 = vpop.f32.mrb[19].mxu1  ;;  %v6305_v7 = vld [vmem:[%s6174_s12 + $0x240] sm:$0xff] }
 0x148   : > { %7279 = vst [vmem:[#allocation16_spill] sm:$0xff] %v6159_v25  ;;  %7280 = vst [vmem:[#allocation17_spill] sm:$0xff] %v6161_v26  ;;  %v6294_v25 = vld [vmem:[%s6174_s12 + $0x208] sm:$0xff] }
 0x149   : > { %2671 = vmatmul.mubr.bf16.gmra.mrb[124].mxu0 %v5055_v21  ;;  %2784 = vmatmul.mubr.bf16.gmra.mrb[124].mxu1 %v5055_v21  ;;  %7298 = vst [vmem:[#allocation35_spill] sm:$0xff] %v6294_v25  ;;  %7301 = vst [vmem:[#allocation38_spill] sm:$0xff] %v6305_v7  ;;  %v6368_v21 = vld [vmem:[%s6174_s12 + $0x380] sm:$0xff]  ;;  %v5025_v25 = vld [vmem:[%s7225_s3 + $0xb0] ss:$8 sps:$4 sm:$0xff]  }
 0x14a   : > { %7305 = vst [vmem:[#allocation42_spill] sm:$0xff] %v6323_v23  ;;  %7307 = vst [vmem:[#allocation44_spill] sm:$0xff] %v6336_v19  ;;  %v3418_v19 = vld [vmem:[%s6174_s12 + $0x18] sm:$0xff]  ;;  %v5030_v18 = vld [vmem:[%s7225_s3 + $0xc4] ss:$8 sps:$4 sm:$0xff]  }
 0x14b   : > { %7313 = vst [vmem:[#allocation50_spill] sm:$0xff] %v6368_v21  ;;  %v3435_v21 = vunpack.c.h.bf16 %v3418_v19 }
 0x14c   : > { %v6176_v31 = vpop.f32.mrb[20].mxu0  ;;  %v6181_v12 = vpop.f32.mrb[20].mxu1 }
 0x14d   : > { %7281 = vst [vmem:[#allocation18_spill] sm:$0xff] %v6176_v31  ;;  %7282 = vst [vmem:[#allocation19_spill] sm:$0xff] %v6181_v12  ;;  %v6183_v47 = vpop.f32.mrb[21].mxu0  ;;  %v6188_v48 = vpop.f32.mrb[21].mxu1  ;;  %v5019_v12 = vld [vmem:[%s7225_s3 + $0x90] ss:$8 sps:$4 sm:$0xff]  }
 0x14e   : > { %7283 = vst [vmem:[#allocation20_spill] sm:$0xff] %v6183_v47  ;;  %7284 = vst [vmem:[#allocation21_spill] sm:$0xff] %v6188_v48  ;;  %v6190_v56 = vpop.f32.mrb[22].mxu0  ;;  %v6198_v60 = vpop.f32.mrb[22].mxu1  ;;  %v6263_v48 = vld [vmem:[%s6174_s12 + $0x188] sm:$0xff]  ;;  %v6277_v31 = vld [vmem:[%s6174_s12 + $0x1c0] sm:$0xff]  ;;  %4409 = vmatpush1.bf16.msra.mxu0 %v5019_v12  ;;  %4953 = vmatpush1.bf16.msra.mxu1 %v5019_v12 }
 0x14f   : > { %7285 = vst [vmem:[#allocation22_spill] sm:$0xff] %v6190_v56  ;;  %7286 = vst [vmem:[#allocation23_spill] sm:$0xff] %v6198_v60  ;;  %v6200_v62 = vpop.f32.mrb[23].mxu0  ;;  %v6208_v1 = vpop.f32.mrb[23].mxu1  ;;  %v6245_v60 = vld [vmem:[%s6174_s12 + $0x140] sm:$0xff]  ;;  %v6356_v12 = vld [vmem:[%s6174_s12 + $0x348] sm:$0xff] }
 0x150   : > { %7287 = vst [vmem:[#allocation24_spill] sm:$0xff] %v6200_v62  ;;  %7288 = vst [vmem:[#allocation25_spill] sm:$0xff] %v6208_v1  ;;  %v6260_v56 = vld [vmem:[%s6174_s12 + $0x180] sm:$0xff]  ;;  %v6308_v1 = vld [vmem:[%s6174_s12 + $0x248] sm:$0xff] }
 0x151   : > { %7290 = vst [vmem:[#allocation27_spill] sm:$0xff] %v6263_v48  ;;  %7293 = vst [vmem:[#allocation30_spill] sm:$0xff] %v6277_v31  ;;  %v6291_v62 = vld [vmem:[%s6174_s12 + $0x200] sm:$0xff] }
 0x152   : > { %7297 = vst [vmem:[#allocation34_spill] sm:$0xff] %v6291_v62  ;;  %7302 = vst [vmem:[#allocation39_spill] sm:$0xff] %v6308_v1  ;;  %v6353_v62 = vld [vmem:[%s6174_s12 + $0x340] sm:$0xff] }
 0x153   : > { %7310 = vst [vmem:[#allocation47_spill] sm:$0xff] %v6353_v62  ;;  %7311 = vst [vmem:[#allocation48_spill] sm:$0xff] %v6356_v12  ;;  %v3434_v12 = vunpack.c.l.bf16 %v3418_v19  ;;  %v5033_v19 = vld [vmem:[%s7225_s3 + $0xd4] ss:$8 sps:$4 sm:$0xff]  }
 0x154   : > { %v6250_v5 = vpop.f32.mrb[24].mxu0 }
 0x155   : > { %7289 = vst [vmem:[#allocation26_spill] sm:$0xff] %v6250_v5  ;;  %v6265_v5 = vpop.f32.mrb[24].mxu1  ;;  %v6267_v47 = vpop.f32.mrb[25].mxu0 }
 0x156   : > { %7291 = vst [vmem:[#allocation28_spill] sm:$0xff] %v6265_v5  ;;  %7292 = vst [vmem:[#allocation29_spill] sm:$0xff] %v6267_v47  ;;  %v6280_v5 = vld [vmem:[%s6174_s12 + $0x1c8] sm:$0xff]  ;;  %v6282_v47 = vpop.f32.mrb[25].mxu1  ;;  %v6284_v26 = vpop.f32.mrb[26].mxu0 }
 0x157   : > { %7294 = vst [vmem:[#allocation31_spill] sm:$0xff] %v6280_v5  ;;  %7295 = vst [vmem:[#allocation32_spill] sm:$0xff] %v6282_v47  ;;  %v6296_v47 = vpop.f32.mrb[26].mxu1  ;;  %v3274_v5 = vld [vmem:[%s6174_s12 + $0x10] sm:$0xff] }
 0x158   : > { %7296 = vst [vmem:[#allocation33_spill] sm:$0xff] %v6284_v26  ;;  %7299 = vst [vmem:[#allocation36_spill] sm:$0xff] %v6296_v47  ;;  %v6298_v26 = vpop.f32.mrb[27].mxu0  ;;  %v6310_v24 = vpop.f32.mrb[27].mxu1  ;;  %v6320_v47 = vld [vmem:[%s6174_s12 + $0x280] sm:$0xff]  ;;  %v3291_v62 = vunpack.c.h.bf16 %v3274_v5 }
 0x159   : > { %7300 = vst [vmem:[#allocation37_spill] sm:$0xff] %v6298_v26  ;;  %7303 = vst [vmem:[#allocation40_spill] sm:$0xff] %v6310_v24  ;;  %v5024_v26 = vld [vmem:[%s7225_s3 + $0xa4] ss:$8 sps:$4 sm:$0xff]   ;;  %v5022_v24 = vld [vmem:[%s7225_s3 + $0xa0] ss:$8 sps:$4 sm:$0xff]  }
 0x15a   : > { %7304 = vst [vmem:[#allocation41_spill] sm:$0xff] %v6320_v47  ;;  %4410 = vmatprep.subr.bf16.mxu0 %v5024_v26  ;;  %4938 = vmatprep.subr.bf16.mxu1 %v5024_v26 }
 0x15b   : > { %4411 = vmatpush1.bf16.msra.mxu0 %v5022_v24  ;;  %4954 = vmatpush1.bf16.msra.mxu1 %v5022_v24  ;;  %v5028_v24 = vld [vmem:[%s7225_s3 + $0xc0] ss:$8 sps:$4 sm:$0xff]  }
 0x15c   : > { %v6358_v20 = vpop.f32.mrb[28].mxu0  ;;  %v6370_v1 = vpop.f32.mrb[28].mxu1  ;;  %4412 = vmatprep.subr.bf16.mxu0 %v5027_v16  ;;  %4939 = vmatprep.subr.bf16.mxu1 %v5027_v16  ;;  %v3290_v16 = vunpack.c.l.bf16 %v3274_v5  ;;  %v3293_v5 = vunpack.c.h.bf16 %v3275_v9 }
 0x15d   : > { %7312 = vst [vmem:[#allocation49_spill] sm:$0xff] %v6358_v20  ;;  %7314 = vst [vmem:[#allocation51_spill] sm:$0xff] %v6370_v1  ;;  %v6373_v20 = vld [vmem:[%s6174_s12 + $0x388] sm:$0xff]  ;;  %v6375_v7 = vpop.f32.mrb[29].mxu0  ;;  %v6384_v1 = vpop.f32.mrb[29].mxu1 }
 0x15e   : > { %7315 = vst [vmem:[#allocation52_spill] sm:$0xff] %v6373_v20  ;;  %7316 = vst [vmem:[#allocation53_spill] sm:$0xff] %v6375_v7  ;;  %v6386_v47 = vpop.f32.mrb[30].mxu0  ;;  %v6389_v7 = vld [vmem:[%s6174_s12 + $0x3c0] sm:$0xff]  ;;  %v6396_v23 = vpop.f32.mrb[30].mxu1  ;;  %v6428_v20 = vld [vmem:[%s6174_s12 + $0x90] sm:$0xff] }
 0x15f   : > { %7317 = vst [vmem:[#allocation54_spill] sm:$0xff] %v6384_v1  ;;  %7318 = vst [vmem:[#allocation55_spill] sm:$0xff] %v6386_v47  ;;  %v6399_v1 = vld [vmem:[%s6174_s12 + $0x3c8] sm:$0xff]  ;;  %v6401_v47 = vpop.f32.mrb[31].mxu0  ;;  %v6408_v26 = vpop.f32.mrb[31].mxu1  ;;  %4413 = vmatpush1.bf16.msra.mxu0 %v5025_v25  ;;  %4955 = vmatpush1.bf16.msra.mxu1 %v5025_v25  ;;  %v3130_v25 = vmul.f32 %v7324_v14, %v6039_v13  ;;  %v7327_v13 = vunpack.c.h.bf16 %v6196_v54 }
 0x160   : > { %7319 = vst [vmem:[#allocation56_spill] sm:$0xff] %v6389_v7  ;;  %7320 = vst [vmem:[#allocation57_spill] sm:$0xff] %v6396_v23  ;;  %4414 = vmatprep.subr.bf16.mxu0 %v5030_v18  ;;  %4940 = vmatprep.subr.bf16.mxu1 %v5030_v18  ;;  %v3437_v18 = vunpack.c.h.bf16 %v6412_v11 }
 0x161   : > { %7321 = vst [vmem:[#allocation58_spill] sm:$0xff] %v6399_v1  ;;  %7322 = vst [vmem:[#allocation59_spill] sm:$0xff] %v6401_v47  ;;  %v7326_v47 = vunpack.c.h.bf16 %v6193_v52  ;;  %v3243_v14 = vmul.f32 %v7327_v13, %v6045_v33 }
 0x162   : > { %7323 = vst [vmem:[#allocation60_spill] sm:$0xff] %v6408_v26  ;;  %v7325_v26 = vunpack.c.l.bf16 %v6196_v54 }
 0x163   : > { %4415 = vmatpush1.bf16.msra.mxu0 %v5028_v24  ;;  %v3131_v1 = vmul.f32 %v7326_v47, %v6043_v61  ;;  %4956 = vmatpush1.bf16.msra.mxu1 %v5028_v24  ;;  %v7329_v61 = vunpack.c.l.bf16 %v6206_v41 }
 0x164   : > { %v3242_v23 = vmul.f32 %v7325_v26, %v6041_v32  ;;  %v2150_v7 = vpop.f32.mrb[32].mxu0  ;;  %v7328_v32 = vunpack.c.l.bf16 %v6203_v35  ;;  %v2263_v31 = vpop.f32.mrb[32].mxu1  ;;  %4416 = vmatprep.subr.bf16.mxu0 %v5033_v19  ;;  %4941 = vmatprep.subr.bf16.mxu1 %v5033_v19  ;;  %v3421_v19 = vld [vmem:[%s6174_s12 + $0xd8] sm:$0xff] }
 0x165   : > { %v3354_v9 = vmul.f32 %v3290_v16, %v2150_v7  ;;  %v2152_v11 = vpop.f32.mrb[33].mxu0  ;;  %v3244_v47 = vmul.f32 %v7329_v61, %v6049_v36  ;;  %v3498_v52 = vmul.f32 %v3434_v12, %v2263_v31  ;;  %v2265_v33 = vpop.f32.mrb[33].mxu1  ;;  %v7330_v7 = vunpack.c.h.bf16 %v6203_v35  ;;  %v3420_v31 = vld [vmem:[%s6174_s12 + $0x98] sm:$0xff] }
 0x166   : > { %v3132_v26 = vmul.f32 %v7328_v32, %v6047_v34  ;;  %v3355_v54 = vmul.f32 %v3291_v62, %v2152_v11  ;;  %v2154_v13 = vpop.f32.mrb[34].mxu0  ;;  %v3294_v34 = vunpack.c.l.bf16 %v6428_v20  ;;  %v3499_v24 = vmul.f32 %v3435_v21, %v2265_v33  ;;  %v2267_v3 = vpop.f32.mrb[34].mxu1  ;;  %v5039_v33 = vld [vmem:[%s7225_s3 + $0xf4] ss:$8 sps:$4 sm:$0xff]  }
 0x167   : > { %v3133_v16 = vmul.f32 %v7330_v7, %v6051_v37  ;;  %v6459_v32 = vadd.f32 %v3354_v9, %v3130_v25  ;;  %v3356_v49 = vmul.f32 %v3292_v4, %v2154_v13  ;;  %v2156_v36 = vpop.f32.mrb[35].mxu0  ;;  %v6462_v62 = vadd.f32 %v3498_v52, %v3242_v23  ;;  %v2269_v48 = vpop.f32.mrb[35].mxu1  ;;  %4417 = vmatpush1.bf16.msra.mxu0 %v5031_v6  ;;  %v5036_v37 = vld [vmem:[%s7225_s3 + $0xe4] ss:$8 sps:$4 sm:$0xff]  }
 0x168   : > { %v6464_v12 = vadd.f32 %v3355_v54, %v3131_v1  ;;  %v3500_v11 = vmul.f32 %v3436_v8, %v2267_v3  ;;  %v3357_v61 = vmul.f32 %v3293_v5, %v2156_v36  ;;  %v7331_v35 = vunpack.c.h.bf16 %v6206_v41  ;;  %v5034_v3 = vld [vmem:[%s7225_s3 + $0xe0] ss:$8 sps:$4 sm:$0xff]   ;;  %4957 = vmatpush1.bf16.msra.mxu1 %v5031_v6  ;;  %4418 = vmatprep.subr.bf16.mxu0 %v5036_v37 }
 0x169   : > { %v6474_v4 = vadd.f32 %v3499_v24, %v3243_v14  ;;  %v6476_v23 = vadd.f32 %v3356_v49, %v3132_v26  ;;  %v3501_v1 = vmul.f32 %v3437_v18, %v2269_v48  ;;  %v3438_v5 = vunpack.c.l.bf16 %v3420_v31  ;;  %4942 = vmatprep.subr.bf16.mxu1 %v5036_v37  ;;  %v6489_v48 = vld [vmem:[%s6174_s12 + $0x110] sm:$0xff] }
 0x16a   : > { %v3245_v21 = vmul.f32 %v7331_v35, %v6053_v38  ;;  %v6481_v8 = vadd.f32 %v3500_v11, %v3244_v47  ;;  %v6483_v25 = vadd.f32 %v3357_v61, %v3133_v16  ;;  %v3295_v9 = vunpack.c.h.bf16 %v6428_v20  ;;  %v5037_v11 = vld [vmem:[%s7225_s3 + $0xf0] ss:$8 sps:$4 sm:$0xff]  }
 0x16b   : > { %v3439_v41 = vunpack.c.h.bf16 %v3420_v31  ;;  %v3296_v49 = vunpack.c.l.bf16 %v3277_v2  ;;  %v3440_v14 = vunpack.c.l.bf16 %v3421_v19  ;;  %v7332_v18 = vunpack.c.l.bf16 %v6214_v46  ;;  %4419 = vmatpush1.bf16.msra.mxu0 %v5034_v3 }
 0x16c   : > { %v6486_v38 = vadd.f32 %v3501_v1, %v3245_v21  ;;  %v7333_v26 = vunpack.c.l.bf16 %v6217_v50  ;;  %v2160_v52 = vpop.f32.mrb[36].mxu0  ;;  %v3297_v54 = vunpack.c.h.bf16 %v3277_v2  ;;  %v3441_v20 = vunpack.c.h.bf16 %v3421_v19  ;;  %v2273_v2 = vpop.f32.mrb[36].mxu1  ;;  %4958 = vmatpush1.bf16.msra.mxu1 %v5034_v3  ;;  %4420 = vmatprep.subr.bf16.mxu0 %v5039_v33 }
 0x16d   : > { %v3134_v6 = vmul.f32 %v7332_v18, %v6057_v10  ;;  %v7334_v13 = vunpack.c.h.bf16 %v6214_v46  ;;  %v7335_v16 = vunpack.c.h.bf16 %v6217_v50  ;;  %v7336_v24 = vunpack.c.l.bf16 %v6225_v22  ;;  %v2162_v31 = vpop.f32.mrb[37].mxu0  ;;  %4943 = vmatprep.subr.bf16.mxu1 %v5039_v33  ;;  %v3279_v33 = vld [vmem:[%s6174_s12 + $0x150] sm:$0xff] }
 0x16e   : > { %v3246_v47 = vmul.f32 %v7333_v26, %v6059_v39  ;;  %v3358_v36 = vmul.f32 %v3294_v34, %v2160_v52  ;;  %v3502_v61 = vmul.f32 %v3438_v5, %v2273_v2  ;;  %v3359_v50 = vmul.f32 %v3295_v9, %v2162_v31  ;;  %v2164_v19 = vpop.f32.mrb[38].mxu0  ;;  %v3422_v5 = vld [vmem:[%s6174_s12 + $0x118] sm:$0xff] }
 0x16f   : > { %v3135_v7 = vmul.f32 %v7334_v13, %v6061_v40  ;;  %v3247_v10 = vmul.f32 %v7335_v16, %v6063_v42  ;;  %v3136_v39 = vmul.f32 %v7336_v24, %v6065_v43  ;;  %v7337_v40 = vunpack.c.l.bf16 %v6228_v27  ;;  %v2275_v42 = vpop.f32.mrb[37].mxu1  ;;  %v2166_v3 = vpop.f32.mrb[39].mxu0  ;;  %v3423_v16 = vld [vmem:[%s6174_s12 + $0x158] sm:$0xff]  ;;  %4421 = vmatpush1.bf16.msra.mxu0 %v5037_v11  ;;  %v6536_v24 = vld [vmem:[%s6174_s12 + $0x190] sm:$0xff] }
 0x170   : > { %v3298_v43 = vunpack.c.l.bf16 %v6489_v48  ;;  %v7338_v34 = vunpack.c.h.bf16 %v6225_v22  ;;  %v6519_v35 = vadd.f32 %v3358_v36, %v3134_v6  ;;  %v3503_v21 = vmul.f32 %v3439_v41, %v2275_v42  ;;  %4959 = vmatpush1.bf16.msra.mxu1 %v5037_v11 }
 0x171   : > { %v3248_v46 = vmul.f32 %v7337_v40, %v6067_v44  ;;  %v3360_v1 = vmul.f32 %v3296_v49, %v2164_v19  ;;  %v2277_v44 = vpop.f32.mrb[38].mxu1  ;;  %v6522_v9 = vadd.f32 %v3502_v61, %v3246_v47  ;;  %v6524_v18 = vadd.f32 %v3359_v50, %v3135_v7 }
 0x172   : > { %v3137_v37 = vmul.f32 %v7338_v34, %v6069_v17  ;;  %v3504_v26 = vmul.f32 %v3440_v14, %v2277_v44  ;;  %v3361_v52 = vmul.f32 %v3297_v54, %v2166_v3  ;;  %v2279_v13 = vpop.f32.mrb[39].mxu1  ;;  %v7339_v17 = vunpack.c.h.bf16 %v6228_v27 }
 0x173   : > { %v6531_v41 = vadd.f32 %v3503_v21, %v3247_v10  ;;  %v6533_v49 = vadd.f32 %v3360_v1, %v3136_v39  ;;  %v3505_v6 = vmul.f32 %v3441_v20, %v2279_v13  ;;  %v3442_v54 = vunpack.c.l.bf16 %v3422_v5 }
 0x174   : > { %v3249_v22 = vmul.f32 %v7339_v17, %v6071_v45  ;;  %v6538_v47 = vadd.f32 %v3504_v26, %v3248_v46  ;;  %v6540_v14 = vadd.f32 %v3361_v52, %v3137_v37  ;;  %v3299_v7 = vunpack.c.h.bf16 %v6489_v48  ;;  %v2170_v20 = vpop.f32.mrb[40].mxu0 }
 0x175   : > { %v3443_v2 = vunpack.c.h.bf16 %v3422_v5  ;;  %v3300_v27 = vunpack.c.l.bf16 %v3279_v33  ;;  %v3444_v45 = vunpack.c.l.bf16 %v3423_v16  ;;  %v7340_v10 = vunpack.c.l.bf16 %v6235_v15  ;;  %v2172_v37 = vpop.f32.mrb[41].mxu0 }
 0x176   : > { %v6543_v36 = vadd.f32 %v3505_v6, %v3249_v22  ;;  %v3301_v31 = vunpack.c.h.bf16 %v3279_v33  ;;  %v3445_v40 = vunpack.c.h.bf16 %v3423_v16  ;;  %v3302_v11 = vunpack.c.l.bf16 %v6536_v24  ;;  %v2174_v5 = vpop.f32.mrb[42].mxu0  ;;  %v3424_v33 = vld [vmem:[%s6174_s12 + $0x198] sm:$0xff] }
 0x177   : > { %v3138_v39 = vmul.f32 %v7340_v10, %v6081_v51  ;;  %v7341_v46 = vunpack.c.l.bf16 %v6238_v63  ;;  %v7342_v48 = vunpack.c.h.bf16 %v6235_v15  ;;  %v7343_v42 = vunpack.c.h.bf16 %v6238_v63  ;;  %v2283_v51 = vpop.f32.mrb[40].mxu1  ;;  %v2176_v13 = vpop.f32.mrb[43].mxu0 }
 0x178   : > { %v3362_v34 = vmul.f32 %v3298_v43, %v2170_v20  ;;  %v7344_v21 = vunpack.c.l.bf16 %v6245_v60  ;;  %v7345_v44 = vunpack.c.l.bf16 %v6248_v30  ;;  %v3506_v3 = vmul.f32 %v3442_v54, %v2283_v51  ;;  %v3281_v54 = vld [vmem:[%s6174_s12 + $0x1d0] sm:$0xff] }
 0x179   : > { %v3250_v61 = vmul.f32 %v7341_v46, %v6086_v53  ;;  %v3139_v50 = vmul.f32 %v7342_v48, %v6088_v29  ;;  %v3251_v19 = vmul.f32 %v7343_v42, %v6093_v55  ;;  %v3363_v15 = vmul.f32 %v3299_v7, %v2172_v37  ;;  %v2285_v29 = vpop.f32.mrb[41].mxu1  ;;  %v3425_v7 = vld [vmem:[%s6174_s12 + $0x1d8] sm:$0xff]  ;;  %v7349_v37 = vld [vmem:[#allocation3_spill] sm:$0xff] }
 0x17a   : > { %v3140_v1 = vmul.f32 %v7344_v21, %v6095_v28  ;;  %v3252_v53 = vmul.f32 %v7345_v44, %v6097_v57  ;;  %v7346_v55 = vunpack.c.h.bf16 %v6245_v60  ;;  %v6567_v43 = vadd.f32 %v3362_v34, %v3138_v39  ;;  %v2287_v28 = vpop.f32.mrb[42].mxu1  ;;  %v6584_v39 = vld [vmem:[%s6174_s12 + $0x210] sm:$0xff]  ;;  %v7350_v21 = vld [vmem:[#allocation27_spill] sm:$0xff] }
 0x17b   : > { %v3507_v26 = vmul.f32 %v3443_v2, %v2285_v29  ;;  %v3364_v52 = vmul.f32 %v3300_v27, %v2174_v5  ;;  %v6570_v16 = vadd.f32 %v3506_v3, %v3250_v61  ;;  %v6572_v57 = vadd.f32 %v3363_v15, %v3139_v50  ;;  %v2289_v6 = vpop.f32.mrb[43].mxu1  ;;  %v7354_v15 = vld [vmem:[#allocation5_spill] sm:$0xff] }
 0x17c   : > { %v3141_v63 = vmul.f32 %v7346_v55, %v6099_v58  ;;  %v3508_v17 = vmul.f32 %v3444_v45, %v2287_v28  ;;  %v3365_v22 = vmul.f32 %v3301_v31, %v2176_v13  ;;  %v7347_v58 = vunpack.c.h.bf16 %v6248_v30 }
 0x17d   : > { %v6579_v10 = vadd.f32 %v3507_v26, %v3251_v19  ;;  %v6581_v2 = vadd.f32 %v3364_v52, %v3140_v1  ;;  %v3509_v27 = vmul.f32 %v3445_v40, %v2289_v6  ;;  %v3446_v45 = vunpack.c.l.bf16 %v3424_v33  ;;  %v2180_v19 = vpop.f32.mrb[44].mxu0  ;;  %v7356_v26 = vld [vmem:[#allocation6_spill] sm:$0xff] }
 0x17e   : > { %v3253_v60 = vmul.f32 %v7347_v58, %v6101_v59  ;;  %v6586_v20 = vadd.f32 %v3508_v17, %v3252_v53  ;;  %v6588_v46 = vadd.f32 %v3365_v22, %v3141_v63  ;;  %v3303_v31 = vunpack.c.h.bf16 %v6536_v24  ;;  %v7352_v53 = vld [vmem:[#allocation4_spill] sm:$0xff]  ;;  %v2182_v63 = vpop.f32.mrb[45].mxu0  ;;  %v7357_v52 = vld [vmem:[#allocation30_spill] sm:$0xff]  ;;  %v7360_v17 = vld [vmem:[#allocation31_spill] sm:$0xff] }
 0x17f   : > { %v3447_v48 = vunpack.c.h.bf16 %v3424_v33  ;;  %v3304_v50 = vunpack.c.l.bf16 %v3281_v54  ;;  %v3448_v30 = vunpack.c.l.bf16 %v3425_v7  ;;  %v7348_v59 = vunpack.c.l.bf16 %v6260_v56  ;;  %v7359_v33 = vld [vmem:[#allocation7_spill] sm:$0xff]  ;;  %v2184_v58 = vpop.f32.mrb[46].mxu0 }
 0x180   : > { %v6591_v61 = vadd.f32 %v3509_v27, %v3253_v60  ;;  %v3305_v40 = vunpack.c.h.bf16 %v3281_v54  ;;  %v3449_v34 = vunpack.c.h.bf16 %v3425_v7  ;;  %v3306_v51 = vunpack.c.l.bf16 %v6584_v39  ;;  %v7362_v60 = vld [vmem:[#allocation8_spill] sm:$0xff] }
 0x181   : > { %v3142_v42 = vmul.f32 %v7348_v59, %v6111_v0  ;;  %v7351_v1 = vunpack.c.l.bf16 %v7350_v21  ;;  %v7353_v24 = vunpack.c.h.bf16 %v6260_v56  ;;  %v7355_v29 = vunpack.c.h.bf16 %v7350_v21  ;;  %v2293_v0 = vpop.f32.mrb[44].mxu1 }
 0x182   : > { %v3366_v55 = vmul.f32 %v3302_v11, %v2180_v19  ;;  %v7358_v28 = vunpack.c.l.bf16 %v7357_v52  ;;  %v7361_v22 = vunpack.c.l.bf16 %v7360_v17  ;;  %v3510_v54 = vmul.f32 %v3446_v45, %v2293_v0  ;;  %v2295_v7 = vpop.f32.mrb[45].mxu1  ;;  %v3283_v0 = vld [vmem:[%s6174_s12 + $0x250] sm:$0xff] }
 0x183   : > { %v3254_v44 = vmul.f32 %v7351_v1, %v7349_v37  ;;  %v3143_v3 = vmul.f32 %v7353_v24, %v7352_v53  ;;  %v3255_v5 = vmul.f32 %v7355_v29, %v7354_v15  ;;  %v3367_v56 = vmul.f32 %v3303_v31, %v2182_v63  ;;  %v2297_v21 = vpop.f32.mrb[46].mxu1  ;;  %v2186_v1 = vpop.f32.mrb[47].mxu0  ;;  %v3426_v53 = vld [vmem:[%s6174_s12 + $0x218] sm:$0xff] }
 0x184   : > { %v3144_v13 = vmul.f32 %v7358_v28, %v7356_v26  ;;  %v3256_v6 = vmul.f32 %v7361_v22, %v7359_v33  ;;  %v7363_v27 = vunpack.c.h.bf16 %v7357_v52  ;;  %v6615_v59 = vadd.f32 %v3366_v55, %v3142_v42  ;;  %v2299_v29 = vpop.f32.mrb[47].mxu1  ;;  %v3427_v63 = vld [vmem:[%s6174_s12 + $0x258] sm:$0xff]  ;;  %v7364_v26 = vld [vmem:[#allocation9_spill] sm:$0xff] }
 0x185   : > { %v3511_v19 = vmul.f32 %v3447_v48, %v2295_v7  ;;  %v3368_v37 = vmul.f32 %v3304_v50, %v2184_v58  ;;  %v6618_v24 = vadd.f32 %v3510_v54, %v3254_v44  ;;  %v6620_v45 = vadd.f32 %v3367_v56, %v3143_v3  ;;  %v6632_v28 = vld [vmem:[%s6174_s12 + $0x290] sm:$0xff]  ;;  %v7371_v56 = vld [vmem:[#allocation10_spill] sm:$0xff]  ;;  %v2190_v58 = vpop.f32.mrb[48].mxu0 }
 0x186   : > { %v3145_v11 = vmul.f32 %v7363_v27, %v7362_v60  ;;  %v3512_v31 = vmul.f32 %v3448_v30, %v2297_v21  ;;  %v3369_v15 = vmul.f32 %v3305_v40, %v2186_v1  ;;  %v7365_v52 = vunpack.c.h.bf16 %v7360_v17  ;;  %v7374_v27 = vld [vmem:[#allocation11_spill] sm:$0xff]  ;;  %v7377_v21 = vld [vmem:[#allocation12_spill] sm:$0xff] }
 0x187   : > { %v6627_v55 = vadd.f32 %v3511_v19, %v3255_v5  ;;  %v6629_v48 = vadd.f32 %v3368_v37, %v3144_v13  ;;  %v3513_v50 = vmul.f32 %v3449_v34, %v2299_v29  ;;  %v3450_v30 = vunpack.c.l.bf16 %v3426_v53  ;;  %v7372_v5 = vld [vmem:[#allocation34_spill] sm:$0xff] }
 0x188   : > { %v3257_v42 = vmul.f32 %v7365_v52, %v7364_v26  ;;  %v6634_v44 = vadd.f32 %v3512_v31, %v3256_v6  ;;  %v6636_v3 = vadd.f32 %v3369_v15, %v3145_v11  ;;  %v3307_v40 = vunpack.c.h.bf16 %v6584_v39  ;;  %v7375_v11 = vld [vmem:[#allocation35_spill] sm:$0xff]  ;;  %v2303_v26 = vpop.f32.mrb[48].mxu1  ;;  %v2192_v52 = vpop.f32.mrb[49].mxu0 }
 0x189   : > { %7366 = vst [vmem:[#allocation3_spill] sm:$0xff] %v6627_v55  ;;  %7367 = vst [vmem:[#allocation27_spill] sm:$0xff] %v6629_v48  ;;  %v3451_v22 = vunpack.c.h.bf16 %v3426_v53  ;;  %v3308_v54 = vunpack.c.l.bf16 %v3283_v0  ;;  %v3452_v17 = vunpack.c.l.bf16 %v3427_v63  ;;  %v7373_v7 = vunpack.c.l.bf16 %v7372_v5  ;;  %v7379_v53 = vld [vmem:[#allocation13_spill] sm:$0xff] }
 0x18a   : > { %7368 = vst [vmem:[#allocation4_spill] sm:$0xff] %v6634_v44  ;;  %7369 = vst [vmem:[#allocation5_spill] sm:$0xff] %v6636_v3  ;;  %v6639_v33 = vadd.f32 %v3513_v50, %v3257_v42  ;;  %v3309_v34 = vunpack.c.h.bf16 %v3283_v0  ;;  %v3453_v60 = vunpack.c.h.bf16 %v3427_v63  ;;  %v3310_v6 = vunpack.c.l.bf16 %v6632_v28  ;;  %v7381_v0 = vld [vmem:[#allocation14_spill] sm:$0xff]  ;;  %v7392_v55 = vld [vmem:[#allocation17_spill] sm:$0xff] }
 0x18b   : > { %v3146_v13 = vmul.f32 %v7373_v7, %v7371_v56  ;;  %v7376_v19 = vunpack.c.l.bf16 %v7375_v11  ;;  %v7378_v39 = vunpack.c.h.bf16 %v7372_v5  ;;  %v7380_v31 = vunpack.c.h.bf16 %v7375_v11  ;;  %v7382_v63 = vld [vmem:[#allocation38_spill] sm:$0xff]  ;;  %v7384_v56 = vld [vmem:[#allocation15_spill] sm:$0xff]  ;;  %v7387_v11 = vld [vmem:[#allocation16_spill] sm:$0xff] }
 0x18c   : > { %7370 = vst [vmem:[#allocation6_spill] sm:$0xff] %v6639_v33  ;;  %v3370_v29 = vmul.f32 %v3306_v51, %v2190_v58  ;;  %v7383_v42 = vunpack.c.l.bf16 %v7382_v63  ;;  %v7385_v7 = vld [vmem:[#allocation39_spill] sm:$0xff]  ;;  %v3371_v5 = vmul.f32 %v3307_v40, %v2192_v52  ;;  %v3428_v44 = vld [vmem:[%s6174_s12 + $0x298] sm:$0xff]  ;;  %v3285_v52 = vld [vmem:[%s6174_s12 + $0x2d0] sm:$0xff] }
 0x18d   : > { %v3258_v37 = vmul.f32 %v7376_v19, %v7374_v27  ;;  %v3147_v1 = vmul.f32 %v7378_v39, %v7377_v21  ;;  %v3259_v15 = vmul.f32 %v7380_v31, %v7379_v53  ;;  %v7386_v33 = vunpack.c.l.bf16 %v7385_v7  ;;  %v2305_v21 = vpop.f32.mrb[49].mxu1  ;;  %v2194_v39 = vpop.f32.mrb[50].mxu0 }
 0x18e   : > { %v3148_v50 = vmul.f32 %v7383_v42, %v7381_v0  ;;  %v3514_v19 = vmul.f32 %v3450_v30, %v2303_v26  ;;  %v7388_v53 = vunpack.c.h.bf16 %v7382_v63  ;;  %v6663_v58 = vadd.f32 %v3370_v29, %v3146_v13  ;;  %v2307_v0 = vpop.f32.mrb[50].mxu1  ;;  %v2196_v42 = vpop.f32.mrb[51].mxu0 }
 0x18f   : > { %v3260_v27 = vmul.f32 %v7386_v33, %v7384_v56  ;;  %v3515_v31 = vmul.f32 %v3451_v22, %v2305_v21  ;;  %v3372_v3 = vmul.f32 %v3308_v54, %v2194_v39  ;;  %v6668_v30 = vadd.f32 %v3371_v5, %v3147_v1  ;;  %v2309_v26 = vpop.f32.mrb[51].mxu1  ;;  %v3429_v56 = vld [vmem:[%s6174_s12 + $0x2d8] sm:$0xff]  ;;  %v6680_v21 = vld [vmem:[%s6174_s12 + $0x310] sm:$0xff] }
 0x190   : > { %v3149_v51 = vmul.f32 %v7388_v53, %v7387_v11  ;;  %7389 = vst [vmem:[#allocation30_spill] sm:$0xff] %v6663_v58  ;;  %v6666_v48 = vadd.f32 %v3514_v19, %v3258_v37  ;;  %v3516_v40 = vmul.f32 %v3452_v17, %v2307_v0  ;;  %v3373_v33 = vmul.f32 %v3309_v34, %v2196_v42  ;;  %v7420_v58 = vld [vmem:[#allocation25_spill] sm:$0xff] }
 0x191   : > { %7391 = vst [vmem:[#allocation31_spill] sm:$0xff] %v6668_v30  ;;  %v7393_v63 = vunpack.c.h.bf16 %v7385_v7  ;;  %v6675_v29 = vadd.f32 %v3515_v31, %v3259_v15  ;;  %v6677_v22 = vadd.f32 %v3372_v3, %v3148_v50  ;;  %v3517_v54 = vmul.f32 %v3453_v60, %v2309_v26  ;;  %v7400_v15 = vld [vmem:[#allocation41_spill] sm:$0xff]  ;;  %v2200_v50 = vpop.f32.mrb[52].mxu0  ;;  %v7402_v31 = vld [vmem:[#allocation19_spill] sm:$0xff]  ;;  %v3430_v30 = vld [vmem:[%s6174_s12 + $0x318] sm:$0xff] }
 0x192   : > { %7390 = vst [vmem:[#allocation7_spill] sm:$0xff] %v6666_v48  ;;  %v6682_v37 = vadd.f32 %v3516_v40, %v3260_v27  ;;  %v6684_v1 = vadd.f32 %v3373_v33, %v3149_v51  ;;  %v3454_v17 = vunpack.c.l.bf16 %v3428_v44  ;;  %v3311_v34 = vunpack.c.h.bf16 %v6632_v28  ;;  %v7403_v51 = vld [vmem:[#allocation42_spill] sm:$0xff]  ;;  %v7405_v40 = vld [vmem:[#allocation20_spill] sm:$0xff] }
 0x193   : > { %v3261_v13 = vmul.f32 %v7393_v63, %v7392_v55  ;;  %7394 = vst [vmem:[#allocation8_spill] sm:$0xff] %v6675_v29  ;;  %7395 = vst [vmem:[#allocation9_spill] sm:$0xff] %v6677_v22  ;;  %v3455_v5 = vunpack.c.h.bf16 %v3428_v44  ;;  %v3312_v39 = vunpack.c.l.bf16 %v3285_v52  ;;  %v3456_v7 = vunpack.c.l.bf16 %v3429_v56  ;;  %v7399_v55 = vld [vmem:[#allocation18_spill] sm:$0xff]  ;;  %v7407_v44 = vld [vmem:[#allocation21_spill] sm:$0xff] }
 0x194   : > { %7396 = vst [vmem:[#allocation10_spill] sm:$0xff] %v6682_v37  ;;  %7397 = vst [vmem:[#allocation34_spill] sm:$0xff] %v6684_v1  ;;  %v7401_v11 = vunpack.c.l.bf16 %v7400_v15  ;;  %v3313_v60 = vunpack.c.h.bf16 %v3285_v52  ;;  %v3457_v53 = vunpack.c.h.bf16 %v3429_v56  ;;  %v3314_v27 = vunpack.c.l.bf16 %v6680_v21  ;;  %v7409_v52 = vld [vmem:[#allocation22_spill] sm:$0xff]  ;;  %v7410_v56 = vld [vmem:[#allocation43_spill] sm:$0xff] }
 0x195   : > { %v6687_v19 = vadd.f32 %v3517_v54, %v3261_v13  ;;  %v7404_v0 = vunpack.c.l.bf16 %v7403_v51  ;;  %v7406_v28 = vunpack.c.h.bf16 %v7400_v15  ;;  %v7408_v26 = vunpack.c.h.bf16 %v7403_v51  ;;  %v2313_v54 = vpop.f32.mrb[52].mxu1  ;;  %v7412_v1 = vld [vmem:[#allocation23_spill] sm:$0xff]  ;;  %v7413_v37 = vld [vmem:[#allocation44_spill] sm:$0xff] }
 0x196   : > { %v3150_v3 = vmul.f32 %v7401_v11, %v7399_v55  ;;  %v3374_v13 = vmul.f32 %v3310_v6, %v2200_v50  ;;  %v2202_v55 = vpop.f32.mrb[53].mxu0  ;;  %v7411_v11 = vunpack.c.l.bf16 %v7410_v56  ;;  %v7414_v22 = vunpack.c.l.bf16 %v7413_v37  ;;  %v7415_v51 = vld [vmem:[#allocation24_spill] sm:$0xff] }
 0x197   : > { %7398 = vst [vmem:[#allocation11_spill] sm:$0xff] %v6687_v19  ;;  %v3262_v42 = vmul.f32 %v7404_v0, %v7402_v31  ;;  %v3151_v33 = vmul.f32 %v7406_v28, %v7405_v40  ;;  %v3263_v63 = vmul.f32 %v7408_v26, %v7407_v44  ;;  %v3518_v0 = vmul.f32 %v3454_v17, %v2313_v54  ;;  %v2315_v40 = vpop.f32.mrb[53].mxu1  ;;  %v2204_v28 = vpop.f32.mrb[54].mxu0  ;;  %v3287_v54 = vld [vmem:[%s6174_s12 + $0x350] sm:$0xff] }
 0x198   : > { %v3152_v19 = vmul.f32 %v7411_v11, %v7409_v52  ;;  %v3264_v31 = vmul.f32 %v7414_v22, %v7412_v1  ;;  %v3375_v15 = vmul.f32 %v3311_v34, %v2202_v55  ;;  %v7416_v44 = vunpack.c.h.bf16 %v7410_v56  ;;  %v2317_v52 = vpop.f32.mrb[54].mxu1  ;;  %v2206_v11 = vpop.f32.mrb[55].mxu0  ;;  %v3431_v55 = vld [vmem:[%s6174_s12 + $0x358] sm:$0xff] }
 0x199   : > { %v6711_v50 = vadd.f32 %v3374_v13, %v3150_v3  ;;  %v3519_v26 = vmul.f32 %v3455_v5, %v2315_v40  ;;  %v3376_v29 = vmul.f32 %v3312_v39, %v2204_v28  ;;  %v6714_v48 = vadd.f32 %v3518_v0, %v3262_v42  ;;  %v2319_v34 = vpop.f32.mrb[55].mxu1  ;;  %v6728_v40 = vld [vmem:[%s6174_s12 + $0x390] sm:$0xff] }
 0x19a   : > { %v3153_v6 = vmul.f32 %v7416_v44, %v7415_v51  ;;  %v6716_v22 = vadd.f32 %v3375_v15, %v3151_v33  ;;  %v3520_v1 = vmul.f32 %v3456_v7, %v2317_v52  ;;  %v3377_v17 = vmul.f32 %v3313_v60, %v2206_v11 }
 0x19b   : > { %7417 = vst [vmem:[#allocation35_spill] sm:$0xff] %v6711_v50  ;;  %7418 = vst [vmem:[#allocation12_spill] sm:$0xff] %v6714_v48  ;;  %v7421_v56 = vunpack.c.h.bf16 %v7413_v37  ;;  %v6723_v13 = vadd.f32 %v3519_v26, %v3263_v63  ;;  %v6725_v5 = vadd.f32 %v3376_v29, %v3152_v19  ;;  %v3521_v39 = vmul.f32 %v3457_v53, %v2319_v34  ;;  %v7428_v63 = vld [vmem:[#allocation45_spill] sm:$0xff]  ;;  %v2210_v19 = vpop.f32.mrb[56].mxu0  ;;  %v7430_v26 = vld [vmem:[#allocation28_spill] sm:$0xff] }
 0x19c   : > { %7419 = vst [vmem:[#allocation13_spill] sm:$0xff] %v6716_v22  ;;  %v6730_v42 = vadd.f32 %v3520_v1, %v3264_v31  ;;  %v6732_v33 = vadd.f32 %v3377_v17, %v3153_v6  ;;  %v3458_v7 = vunpack.c.l.bf16 %v3430_v30  ;;  %v3315_v60 = vunpack.c.h.bf16 %v6680_v21  ;;  %v7431_v6 = vld [vmem:[#allocation46_spill] sm:$0xff]  ;;  %v7433_v1 = vld [vmem:[#allocation29_spill] sm:$0xff]  ;;  %v7447_v50 = vld [vmem:[#allocation40_spill] sm:$0xff] }
 0x19d   : > { %v3265_v3 = vmul.f32 %v7421_v56, %v7420_v58  ;;  %7422 = vst [vmem:[#allocation14_spill] sm:$0xff] %v6723_v13  ;;  %7423 = vst [vmem:[#allocation38_spill] sm:$0xff] %v6725_v5  ;;  %v3459_v15 = vunpack.c.h.bf16 %v3430_v30  ;;  %v3316_v28 = vunpack.c.l.bf16 %v3287_v54  ;;  %v3460_v37 = vunpack.c.l.bf16 %v3431_v55  ;;  %v7427_v58 = vld [vmem:[#allocation26_spill] sm:$0xff]  ;;  %v7435_v30 = vld [vmem:[#allocation32_spill] sm:$0xff] }
 0x19e   : > { %7424 = vst [vmem:[#allocation15_spill] sm:$0xff] %v6730_v42  ;;  %7425 = vst [vmem:[#allocation39_spill] sm:$0xff] %v6732_v33  ;;  %v7429_v51 = vunpack.c.l.bf16 %v7428_v63  ;;  %v3317_v53 = vunpack.c.h.bf16 %v3287_v54  ;;  %v3461_v44 = vunpack.c.h.bf16 %v3431_v55  ;;  %v3318_v31 = vunpack.c.l.bf16 %v6728_v40  ;;  %v7437_v54 = vld [vmem:[#allocation33_spill] sm:$0xff]  ;;  %v7438_v55 = vld [vmem:[#allocation47_spill] sm:$0xff] }
 0x19f   : > { %v6735_v0 = vadd.f32 %v3521_v39, %v3265_v3  ;;  %v7432_v52 = vunpack.c.l.bf16 %v7431_v6  ;;  %v7434_v21 = vunpack.c.h.bf16 %v7428_v63  ;;  %v7436_v34 = vunpack.c.h.bf16 %v7431_v6  ;;  %v2323_v39 = vpop.f32.mrb[56].mxu1  ;;  %v7440_v33 = vld [vmem:[#allocation36_spill] sm:$0xff]  ;;  %v7443_v6 = vld [vmem:[#allocation37_spill] sm:$0xff]  ;;  %v3432_v22 = vld [vmem:[%s6174_s12 + $0x398] sm:$0xff] }
 0x1a0   : > { %v3154_v29 = vmul.f32 %v7429_v51, %v7427_v58  ;;  %v3378_v3 = vmul.f32 %v3314_v27, %v2210_v19  ;;  %v2212_v58 = vpop.f32.mrb[57].mxu0  ;;  %v7439_v51 = vunpack.c.l.bf16 %v7438_v55  ;;  %v7441_v42 = vld [vmem:[#allocation48_spill] sm:$0xff] }
 0x1a1   : > { %7426 = vst [vmem:[#allocation16_spill] sm:$0xff] %v6735_v0  ;;  %v3266_v11 = vmul.f32 %v7432_v52, %v7430_v26  ;;  %v3155_v17 = vmul.f32 %v7434_v21, %v7433_v1  ;;  %v3267_v56 = vmul.f32 %v7436_v34, %v7435_v30  ;;  %v7442_v5 = vunpack.c.l.bf16 %v7441_v42  ;;  %v2325_v1 = vpop.f32.mrb[57].mxu1  ;;  %v2214_v21 = vpop.f32.mrb[58].mxu0 }
 0x1a2   : > { %v3156_v0 = vmul.f32 %v7439_v51, %v7437_v54  ;;  %v3522_v52 = vmul.f32 %v3458_v7, %v2323_v39  ;;  %v3379_v63 = vmul.f32 %v3315_v60, %v2212_v58  ;;  %v7444_v30 = vunpack.c.h.bf16 %v7438_v55  ;;  %v2327_v54 = vpop.f32.mrb[58].mxu1  ;;  %v2216_v51 = vpop.f32.mrb[59].mxu0  ;;  %v3289_v39 = vld [vmem:[%s6174_s12 + $0x3d0] sm:$0xff]  ;;  %v3433_v58 = vld [vmem:[%s6174_s12 + $0x3d8] sm:$0xff] }
 0x1a3   : > { %v3268_v26 = vmul.f32 %v7442_v5, %v7440_v33  ;;  %v6759_v19 = vadd.f32 %v3378_v3, %v3154_v29  ;;  %v3523_v34 = vmul.f32 %v3459_v15, %v2325_v1  ;;  %v3380_v13 = vmul.f32 %v3316_v28, %v2214_v21  ;;  %v2329_v60 = vpop.f32.mrb[59].mxu1  ;;  %v3562_v1 = vld [vmem:[%s6174_s12 + $0x20] sm:$0xff] }
 0x1a4   : > { %v3157_v27 = vmul.f32 %v7444_v30, %v7443_v6  ;;  %v6762_v48 = vadd.f32 %v3522_v52, %v3266_v11  ;;  %v6764_v5 = vadd.f32 %v3379_v63, %v3155_v17  ;;  %v3524_v33 = vmul.f32 %v3460_v37, %v2327_v54  ;;  %v7458_v54 = vld [vmem:[#allocation52_spill] sm:$0xff] }
 0x1a5   : > { %v3381_v7 = vmul.f32 %v3317_v53, %v2216_v51  ;;  %v7448_v55 = vunpack.c.h.bf16 %v7441_v42  ;;  %v6771_v3 = vadd.f32 %v3523_v34, %v3267_v56  ;;  %v6773_v15 = vadd.f32 %v3380_v13, %v3156_v0  ;;  %v7454_v42 = vld [vmem:[#allocation49_spill] sm:$0xff]  ;;  %v2220_v13 = vpop.f32.mrb[60].mxu0 }
 0x1a6   : > { %7445 = vst [vmem:[#allocation17_spill] sm:$0xff] %v6762_v48  ;;  %7446 = vst [vmem:[#allocation18_spill] sm:$0xff] %v6764_v5  ;;  %v3525_v28 = vmul.f32 %v3461_v44, %v2329_v60  ;;  %v6776_v21 = vadd.f32 %v3524_v33, %v3268_v26  ;;  %v3462_v17 = vunpack.c.l.bf16 %v3432_v22  ;;  %v3319_v37 = vunpack.c.h.bf16 %v6728_v40  ;;  %v7457_v26 = vld [vmem:[#allocation51_spill] sm:$0xff]  ;;  %v7460_v33 = vld [vmem:[#allocation53_spill] sm:$0xff] }
 0x1a7   : > { %v3269_v29 = vmul.f32 %v7448_v55, %v7447_v50  ;;  %7449 = vst [vmem:[#allocation41_spill] sm:$0xff] %v6771_v3  ;;  %7450 = vst [vmem:[#allocation19_spill] sm:$0xff] %v6773_v15  ;;  %v6778_v11 = vadd.f32 %v3381_v7, %v3157_v27  ;;  %v3463_v52 = vunpack.c.h.bf16 %v3432_v22  ;;  %v3320_v63 = vunpack.c.l.bf16 %v3289_v39  ;;  %v7455_v50 = vld [vmem:[#allocation50_spill] sm:$0xff]  ;;  %v7470_v3 = vld [vmem:[#allocation59_spill] sm:$0xff] }
 0x1a8   : > { %7451 = vst [vmem:[#allocation42_spill] sm:$0xff] %v6776_v21  ;;  %v3464_v6 = vunpack.c.l.bf16 %v3433_v58  ;;  %v7456_v56 = vunpack.c.l.bf16 %v7455_v50  ;;  %v3321_v0 = vunpack.c.h.bf16 %v3289_v39  ;;  %v3465_v44 = vunpack.c.h.bf16 %v3433_v58  ;;  %v7462_v60 = vld [vmem:[#allocation54_spill] sm:$0xff]  ;;  %v7465_v39 = vld [vmem:[#allocation56_spill] sm:$0xff] }
 0x1a9   : > { %7452 = vst [vmem:[#allocation20_spill] sm:$0xff] %v6778_v11  ;;  %v6781_v53 = vadd.f32 %v3525_v28, %v3269_v29  ;;  %v3578_v34 = vunpack.c.l.bf16 %v3562_v1  ;;  %v7459_v27 = vunpack.c.l.bf16 %v7458_v54  ;;  %v7461_v40 = vunpack.c.h.bf16 %v7455_v50  ;;  %v2333_v28 = vpop.f32.mrb[60].mxu1  ;;  %v7467_v11 = vld [vmem:[#allocation57_spill] sm:$0xff]  ;;  %v7468_v21 = vld [vmem:[#allocation58_spill] sm:$0xff] }
 0x1aa   : > { %v3158_v30 = vmul.f32 %v7456_v56, %v7454_v42  ;;  %v7463_v22 = vunpack.c.h.bf16 %v7458_v54  ;;  %v3382_v29 = vmul.f32 %v3318_v31, %v2220_v13  ;;  %v2222_v42 = vpop.f32.mrb[61].mxu0  ;;  %v7464_v56 = vld [vmem:[#allocation55_spill] sm:$0xff]  ;;  %v7466_v58 = vunpack.c.l.bf16 %v7465_v39 }
 0x1ab   : > { %7453 = vst [vmem:[#allocation21_spill] sm:$0xff] %v6781_v53  ;;  %v3270_v51 = vmul.f32 %v7459_v27, %v7457_v26  ;;  %v3159_v7 = vmul.f32 %v7461_v40, %v7460_v33  ;;  %v7469_v15 = vunpack.c.l.bf16 %v7468_v21  ;;  %v3526_v27 = vmul.f32 %v3462_v17, %v2333_v28  ;;  %v2335_v33 = vpop.f32.mrb[61].mxu1  ;;  %v2224_v40 = vpop.f32.mrb[62].mxu0  ;;  %v3563_v28 = vld [vmem:[%s6174_s12 + $0x60] sm:$0xff] }
 0x1ac   : > { %v3271_v55 = vmul.f32 %v7463_v22, %v7462_v60  ;;  %v3160_v53 = vmul.f32 %v7466_v58, %v7464_v56  ;;  %v3383_v50 = vmul.f32 %v3319_v37, %v2222_v42  ;;  %v7471_v54 = vunpack.c.h.bf16 %v7465_v39  ;;  %v2337_v5 = vpop.f32.mrb[62].mxu1  ;;  %v2226_v56 = vpop.f32.mrb[63].mxu0  ;;  %v3706_v58 = vld [vmem:[%s6174_s12 + $0x28] sm:$0xff] }
 0x1ad   : > { %v3272_v26 = vmul.f32 %v7469_v15, %v7467_v11  ;;  %v6804_v31 = vadd.f32 %v3382_v29, %v3158_v30  ;;  %v3527_v13 = vmul.f32 %v3463_v52, %v2335_v33  ;;  %v3384_v22 = vmul.f32 %v3320_v63, %v2224_v40  ;;  %v2339_v37 = vpop.f32.mrb[63].mxu1  ;;  %v7472_v42 = vld [vmem:[#allocation60_spill] sm:$0xff] }
 0x1ae   : > { %v3161_v60 = vmul.f32 %v7471_v54, %v7470_v3  ;;  %v6807_v48 = vadd.f32 %v3526_v27, %v3270_v51  ;;  %v6809_v15 = vadd.f32 %v3383_v50, %v3159_v7  ;;  %v3528_v11 = vmul.f32 %v3464_v6, %v2337_v5  ;;  %v3707_v63 = vld [vmem:[%s6174_s12 + $0x68] sm:$0xff]  ;;  %v2376_v50 = vpop.f32.mrb[64].mxu0 }
 0x1af   : > { %v3385_v17 = vmul.f32 %v3321_v0, %v2226_v56  ;;  %v7473_v39 = vunpack.c.h.bf16 %v7468_v21  ;;  %v6815_v30 = vadd.f32 %v3527_v13, %v3271_v55  ;;  %v6817_v29 = vadd.f32 %v3384_v22, %v3160_v53  ;;  %v2489_v53 = vpop.f32.mrb[64].mxu1  ;;  %v2378_v54 = vpop.f32.mrb[65].mxu0  ;;  %v3564_v56 = vld [vmem:[%s6174_s12 + $0xa0] sm:$0xff] }
 0x1b0   : > { %v3529_v52 = vmul.f32 %v3465_v44, %v2339_v37  ;;  %v6820_v33 = vadd.f32 %v3528_v11, %v3272_v26  ;;  %v3722_v7 = vunpack.c.l.bf16 %v3706_v58  ;;  %v3579_v5 = vunpack.c.h.bf16 %v3562_v1  ;;  %v2380_v22 = vpop.f32.mrb[66].mxu0 }
 0x1b1   : > { %v3273_v3 = vmul.f32 %v7473_v39, %v7472_v42  ;;  %v6822_v51 = vadd.f32 %v3385_v17, %v3161_v60  ;;  %v3723_v0 = vunpack.c.h.bf16 %v3706_v58  ;;  %v3580_v27 = vunpack.c.l.bf16 %v3563_v28  ;;  %v2491_v60 = vpop.f32.mrb[65].mxu1  ;;  %v2382_v37 = vpop.f32.mrb[67].mxu0  ;;  %v3708_v42 = vld [vmem:[%s6174_s12 + $0xa8] sm:$0xff] }
 0x1b2   : > { %v3724_v21 = vunpack.c.l.bf16 %v3707_v63  ;;  %v3581_v55 = vunpack.c.h.bf16 %v3563_v28  ;;  %v3642_v40 = vmul.f32 %v3578_v34, %v2376_v50  ;;  %v3725_v44 = vunpack.c.h.bf16 %v3707_v63  ;;  %v2493_v17 = vpop.f32.mrb[66].mxu1  ;;  %v3565_v63 = vld [vmem:[%s6174_s12 + $0xe0] sm:$0xff] }
 0x1b3   : > { %v6824_v6 = vadd.f32 %v3529_v52, %v3273_v3  ;;  %v3786_v13 = vmul.f32 %v3722_v7, %v2489_v53  ;;  %v3643_v26 = vmul.f32 %v3579_v5, %v2378_v54  ;;  %v3787_v58 = vmul.f32 %v3723_v0, %v2491_v60  ;;  %v2495_v52 = vpop.f32.mrb[67].mxu1  ;;  %v2386_v53 = vpop.f32.mrb[68].mxu0 }
 0x1b4   : > { %v6828_v1 = vadd.f32 %v3642_v40, %v6459_v32  ;;  %v3644_v11 = vmul.f32 %v3580_v27, %v2380_v22  ;;  %v3788_v39 = vmul.f32 %v3724_v21, %v2493_v17  ;;  %v3645_v3 = vmul.f32 %v3581_v55, %v2382_v37  ;;  %v3709_v27 = vld [vmem:[%s6174_s12 + $0xe8] sm:$0xff] }
 0x1b5   : > { %v6832_v34 = vadd.f32 %v3786_v13, %v6462_v62  ;;  %v6835_v28 = vadd.f32 %v3643_v26, %v6464_v12  ;;  %v6839_v7 = vadd.f32 %v3787_v58, %v6474_v4  ;;  %v3789_v5 = vmul.f32 %v3725_v44, %v2495_v52  ;;  %v2499_v13 = vpop.f32.mrb[68].mxu1  ;;  %v2388_v26 = vpop.f32.mrb[69].mxu0 }
 0x1b6   : > { %v6842_v32 = vadd.f32 %v3644_v11, %v6476_v23  ;;  %v3582_v0 = vunpack.c.l.bf16 %v3564_v56  ;;  %v6846_v50 = vadd.f32 %v3788_v39, %v6481_v8  ;;  %v6849_v62 = vadd.f32 %v3645_v3, %v6483_v25  ;;  %v2501_v22 = vpop.f32.mrb[69].mxu1  ;;  %v2390_v58 = vpop.f32.mrb[70].mxu0  ;;  %v3566_v11 = vld [vmem:[%s6174_s12 + $0x120] sm:$0xff]  ;;  %v3710_v39 = vld [vmem:[%s6174_s12 + $0x128] sm:$0xff] }
 0x1b7   : > { %v3726_v12 = vunpack.c.l.bf16 %v3708_v42  ;;  %v3583_v21 = vunpack.c.h.bf16 %v3564_v56  ;;  %v6852_v55 = vadd.f32 %v3789_v5, %v6486_v38  ;;  %v3727_v4 = vunpack.c.h.bf16 %v3708_v42  ;;  %v2503_v37 = vpop.f32.mrb[70].mxu1  ;;  %v2392_v42 = vpop.f32.mrb[71].mxu0 }
 0x1b8   : > { %v3584_v40 = vunpack.c.l.bf16 %v3565_v63  ;;  %v3728_v23 = vunpack.c.l.bf16 %v3709_v27  ;;  %v3585_v54 = vunpack.c.h.bf16 %v3565_v63  ;;  %v3646_v44 = vmul.f32 %v3582_v0, %v2386_v53  ;;  %v2505_v0 = vpop.f32.mrb[71].mxu1 }
 0x1b9   : > { %v3729_v8 = vunpack.c.h.bf16 %v3709_v27  ;;  %v3790_v60 = vmul.f32 %v3726_v12, %v2499_v13  ;;  %v3647_v25 = vmul.f32 %v3583_v21, %v2388_v26  ;;  %v3791_v38 = vmul.f32 %v3727_v4, %v2501_v22  ;;  %v3567_v27 = vld [vmem:[%s6174_s12 + $0x160] sm:$0xff]  ;;  %v2396_v13 = vpop.f32.mrb[72].mxu0 }
 0x1ba   : > { %v6856_v56 = vadd.f32 %v3646_v44, %v6519_v35  ;;  %v3648_v17 = vmul.f32 %v3584_v40, %v2390_v58  ;;  %v3792_v63 = vmul.f32 %v3728_v23, %v2503_v37  ;;  %v3649_v5 = vmul.f32 %v3585_v54, %v2392_v42  ;;  %v3711_v40 = vld [vmem:[%s6174_s12 + $0x168] sm:$0xff] }
 0x1bb   : > { %v6860_v3 = vadd.f32 %v3790_v60, %v6522_v9  ;;  %v6863_v52 = vadd.f32 %v3647_v25, %v6524_v18  ;;  %v6867_v12 = vadd.f32 %v3791_v38, %v6531_v41  ;;  %v3793_v21 = vmul.f32 %v3729_v8, %v2505_v0  ;;  %v2509_v60 = vpop.f32.mrb[72].mxu1  ;;  %v2398_v25 = vpop.f32.mrb[73].mxu0 }
 0x1bc   : > { %v6870_v35 = vadd.f32 %v3648_v17, %v6533_v49  ;;  %v3586_v4 = vunpack.c.l.bf16 %v3566_v11  ;;  %v6874_v53 = vadd.f32 %v3792_v63, %v6538_v47  ;;  %v6877_v9 = vadd.f32 %v3649_v5, %v6540_v14  ;;  %v2511_v58 = vpop.f32.mrb[73].mxu1  ;;  %v2400_v38 = vpop.f32.mrb[74].mxu0  ;;  %v3568_v17 = vld [vmem:[%s6174_s12 + $0x1a0] sm:$0xff]  ;;  %v3712_v63 = vld [vmem:[%s6174_s12 + $0x1a8] sm:$0xff] }
 0x1bd   : > { %v3730_v18 = vunpack.c.l.bf16 %v3710_v39  ;;  %v3587_v23 = vunpack.c.h.bf16 %v3566_v11  ;;  %v6880_v54 = vadd.f32 %v3793_v21, %v6543_v36  ;;  %v3731_v41 = vunpack.c.h.bf16 %v3710_v39  ;;  %v2513_v42 = vpop.f32.mrb[74].mxu1  ;;  %v2402_v39 = vpop.f32.mrb[75].mxu0 }
 0x1be   : > { %v3588_v44 = vunpack.c.l.bf16 %v3567_v27  ;;  %v3732_v49 = vunpack.c.l.bf16 %v3711_v40  ;;  %v3589_v26 = vunpack.c.h.bf16 %v3567_v27  ;;  %v3650_v8 = vmul.f32 %v3586_v4, %v2396_v13  ;;  %v2515_v4 = vpop.f32.mrb[75].mxu1 }
 0x1bf   : > { %v3733_v47 = vunpack.c.h.bf16 %v3711_v40  ;;  %v3794_v22 = vmul.f32 %v3730_v18, %v2509_v60  ;;  %v3651_v14 = vmul.f32 %v3587_v23, %v2398_v25  ;;  %v3795_v36 = vmul.f32 %v3731_v41, %v2511_v58  ;;  %v3569_v40 = vld [vmem:[%s6174_s12 + $0x1e0] sm:$0xff]  ;;  %v2406_v60 = vpop.f32.mrb[76].mxu0 }
 0x1c0   : > { %v6884_v11 = vadd.f32 %v3650_v8, %v6567_v43  ;;  %v3652_v37 = vmul.f32 %v3588_v44, %v2400_v38  ;;  %v3796_v27 = vmul.f32 %v3732_v49, %v2513_v42  ;;  %v3653_v21 = vmul.f32 %v3589_v26, %v2402_v39  ;;  %v3713_v44 = vld [vmem:[%s6174_s12 + $0x1e8] sm:$0xff] }
 0x1c1   : > { %v6888_v5 = vadd.f32 %v3794_v22, %v6570_v16  ;;  %v6891_v0 = vadd.f32 %v3651_v14, %v6572_v57  ;;  %v6895_v18 = vadd.f32 %v3795_v36, %v6579_v10  ;;  %v3797_v23 = vmul.f32 %v3733_v47, %v2515_v4  ;;  %v2519_v22 = vpop.f32.mrb[76].mxu1  ;;  %v2408_v14 = vpop.f32.mrb[77].mxu0 }
 0x1c2   : > { %v6898_v43 = vadd.f32 %v3652_v37, %v6581_v2  ;;  %v3590_v41 = vunpack.c.l.bf16 %v3568_v17  ;;  %v6902_v13 = vadd.f32 %v3796_v27, %v6586_v20  ;;  %v6905_v16 = vadd.f32 %v3653_v21, %v6588_v46  ;;  %v2521_v38 = vpop.f32.mrb[77].mxu1  ;;  %v2410_v36 = vpop.f32.mrb[78].mxu0  ;;  %v3570_v37 = vld [vmem:[%s6174_s12 + $0x220] sm:$0xff]  ;;  %v3714_v27 = vld [vmem:[%s6174_s12 + $0x228] sm:$0xff] }
 0x1c3   : > { %v3734_v57 = vunpack.c.l.bf16 %v3712_v63  ;;  %v3591_v49 = vunpack.c.h.bf16 %v3568_v17  ;;  %v6908_v26 = vadd.f32 %v3797_v23, %v6591_v61  ;;  %v3735_v10 = vunpack.c.h.bf16 %v3712_v63  ;;  %v2523_v39 = vpop.f32.mrb[78].mxu1  ;;  %v2412_v63 = vpop.f32.mrb[79].mxu0 }
 0x1c4   : > { %v3592_v8 = vunpack.c.l.bf16 %v3569_v40  ;;  %v3736_v2 = vunpack.c.l.bf16 %v3713_v44  ;;  %v3593_v25 = vunpack.c.h.bf16 %v3569_v40  ;;  %v3654_v47 = vmul.f32 %v3590_v41, %v2406_v60  ;;  %v2525_v41 = vpop.f32.mrb[79].mxu1 }
 0x1c5   : > { %v3737_v20 = vunpack.c.h.bf16 %v3713_v44  ;;  %v3798_v58 = vmul.f32 %v3734_v57, %v2519_v22  ;;  %v3655_v46 = vmul.f32 %v3591_v49, %v2408_v14  ;;  %v3799_v61 = vmul.f32 %v3735_v10, %v2521_v38  ;;  %v3571_v44 = vld [vmem:[%s6174_s12 + $0x260] sm:$0xff]  ;;  %v7478_v22 = vld [vmem:[#allocation4_spill] sm:$0xff] }
 0x1c6   : > { %v6912_v17 = vadd.f32 %v3654_v47, %v6615_v59  ;;  %v3656_v42 = vmul.f32 %v3592_v8, %v2410_v36  ;;  %v3800_v40 = vmul.f32 %v3736_v2, %v2523_v39  ;;  %v3657_v23 = vmul.f32 %v3593_v25, %v2412_v63  ;;  %v7474_v57 = vld [vmem:[#allocation3_spill] sm:$0xff]  ;;  %v3715_v47 = vld [vmem:[%s6174_s12 + $0x268] sm:$0xff]  ;;  %v7482_v25 = vld [vmem:[#allocation6_spill] sm:$0xff]  ;;  %v2529_v63 = vpop.f32.mrb[80].mxu1 }
 0x1c7   : > { %v6916_v21 = vadd.f32 %v3798_v58, %v6618_v24  ;;  %v6919_v4 = vadd.f32 %v3655_v46, %v6620_v45  ;;  %v6923_v49 = vadd.f32 %v3799_v61, %v7474_v57  ;;  %v7476_v59 = vld [vmem:[#allocation27_spill] sm:$0xff]  ;;  %v3801_v10 = vmul.f32 %v3737_v20, %v2525_v41  ;;  %v7480_v24 = vld [vmem:[#allocation5_spill] sm:$0xff]  ;;  %v2416_v61 = vpop.f32.mrb[80].mxu0 }
 0x1c8   : > { %v6926_v60 = vadd.f32 %v3656_v42, %v7476_v59  ;;  %v3594_v8 = vunpack.c.l.bf16 %v3570_v37  ;;  %v6930_v14 = vadd.f32 %v3800_v40, %v7478_v22  ;;  %v6933_v58 = vadd.f32 %v3657_v23, %v7480_v24  ;;  %v2418_v41 = vpop.f32.mrb[81].mxu0  ;;  %v2531_v59 = vpop.f32.mrb[81].mxu1  ;;  %v3572_v24 = vld [vmem:[%s6174_s12 + $0x2a0] sm:$0xff] }
 0x1c9   : > { %7475 = vst [vmem:[#allocation22_spill] sm:$0xff] %v6923_v49  ;;  %v3738_v45 = vunpack.c.l.bf16 %v3714_v27  ;;  %v3595_v2 = vunpack.c.h.bf16 %v3570_v37  ;;  %v6936_v46 = vadd.f32 %v3801_v10, %v7482_v25  ;;  %v3739_v38 = vunpack.c.h.bf16 %v3714_v27  ;;  %v2420_v22 = vpop.f32.mrb[82].mxu0  ;;  %v7484_v37 = vld [vmem:[#allocation30_spill] sm:$0xff]  ;;  %v2533_v25 = vpop.f32.mrb[82].mxu1 }
 0x1ca   : > { %7477 = vst [vmem:[#allocation43_spill] sm:$0xff] %v6926_v60  ;;  %7479 = vst [vmem:[#allocation23_spill] sm:$0xff] %v6930_v14  ;;  %v3596_v36 = vunpack.c.l.bf16 %v3571_v44  ;;  %v3740_v42 = vunpack.c.l.bf16 %v3715_v47  ;;  %v3597_v20 = vunpack.c.h.bf16 %v3571_v44  ;;  %v3658_v39 = vmul.f32 %v3594_v8, %v2416_v61  ;;  %v3716_v14 = vld [vmem:[%s6174_s12 + $0x2a8] sm:$0xff]  ;;  %v7486_v44 = vld [vmem:[#allocation7_spill] sm:$0xff] }
 0x1cb   : > { %7481 = vst [vmem:[#allocation44_spill] sm:$0xff] %v6933_v58  ;;  %7483 = vst [vmem:[#allocation24_spill] sm:$0xff] %v6936_v46  ;;  %v3741_v40 = vunpack.c.h.bf16 %v3715_v47  ;;  %v3802_v57 = vmul.f32 %v3738_v45, %v2529_v63  ;;  %v3659_v23 = vmul.f32 %v3595_v2, %v2418_v41  ;;  %v3803_v27 = vmul.f32 %v3739_v38, %v2531_v59  ;;  %v2422_v46 = vpop.f32.mrb[83].mxu0  ;;  %v7488_v61 = vld [vmem:[#allocation31_spill] sm:$0xff]  ;;  %v2535_v63 = vpop.f32.mrb[83].mxu1  ;;  %v7490_v60 = vld [vmem:[#allocation8_spill] sm:$0xff] }
 0x1cc   : > { %v6940_v58 = vadd.f32 %v3658_v39, %v7484_v37  ;;  %v3660_v10 = vmul.f32 %v3596_v36, %v2420_v22  ;;  %v3804_v45 = vmul.f32 %v3740_v42, %v2533_v25  ;;  %v3661_v2 = vmul.f32 %v3597_v20, %v2422_v46  ;;  %v3573_v41 = vld [vmem:[%s6174_s12 + $0x2e0] sm:$0xff]  ;;  %v7492_v39 = vld [vmem:[#allocation9_spill] sm:$0xff]  ;;  %v3717_v59 = vld [vmem:[%s6174_s12 + $0x2e8] sm:$0xff]  ;;  %v2426_v25 = vpop.f32.mrb[84].mxu0 }
 0x1cd   : > { %v6944_v8 = vadd.f32 %v3802_v57, %v7486_v44  ;;  %v6947_v47 = vadd.f32 %v3659_v23, %v7488_v61  ;;  %v6951_v49 = vadd.f32 %v3803_v27, %v7490_v60  ;;  %v3805_v38 = vmul.f32 %v3741_v40, %v2535_v63  ;;  %v7494_v22 = vld [vmem:[#allocation10_spill] sm:$0xff]  ;;  %v7498_v42 = vld [vmem:[#allocation11_spill] sm:$0xff]  ;;  %v2539_v63 = vpop.f32.mrb[84].mxu1 }
 0x1ce   : > { %7485 = vst [vmem:[#allocation25_spill] sm:$0xff] %v6940_v58  ;;  %v6954_v37 = vadd.f32 %v3660_v10, %v7492_v39  ;;  %v3598_v36 = vunpack.c.l.bf16 %v3572_v24  ;;  %v6958_v58 = vadd.f32 %v3804_v45, %v7494_v22  ;;  %v7496_v57 = vld [vmem:[#allocation34_spill] sm:$0xff]  ;;  %v3742_v23 = vunpack.c.l.bf16 %v3716_v14  ;;  %v2428_v39 = vpop.f32.mrb[85].mxu0 }
 0x1cf   : > { %7487 = vst [vmem:[#allocation26_spill] sm:$0xff] %v6944_v8  ;;  %7489 = vst [vmem:[#allocation45_spill] sm:$0xff] %v6947_v47  ;;  %v6961_v44 = vadd.f32 %v3661_v2, %v7496_v57  ;;  %v3599_v46 = vunpack.c.h.bf16 %v3572_v24  ;;  %v6964_v20 = vadd.f32 %v3805_v38, %v7498_v42  ;;  %v3743_v60 = vunpack.c.h.bf16 %v3716_v14  ;;  %v2541_v57 = vpop.f32.mrb[85].mxu1  ;;  %v7500_v24 = vld [vmem:[#allocation35_spill] sm:$0xff]  ;;  %v7505_v47 = vld [vmem:[#allocation14_spill] sm:$0xff] }
 0x1d0   : > { %7491 = vst [vmem:[#allocation28_spill] sm:$0xff] %v6951_v49  ;;  %7493 = vst [vmem:[#allocation46_spill] sm:$0xff] %v6954_v37  ;;  %v3600_v27 = vunpack.c.l.bf16 %v3573_v41  ;;  %v3744_v10 = vunpack.c.l.bf16 %v3717_v59  ;;  %v3601_v40 = vunpack.c.h.bf16 %v3573_v41  ;;  %v3662_v61 = vmul.f32 %v3598_v36, %v2426_v25  ;;  %v2543_v42 = vpop.f32.mrb[86].mxu1  ;;  %v3718_v49 = vld [vmem:[%s6174_s12 + $0x328] sm:$0xff]  ;;  %v7503_v25 = vld [vmem:[#allocation13_spill] sm:$0xff] }
 0x1d1   : > { %7495 = vst [vmem:[#allocation29_spill] sm:$0xff] %v6958_v58  ;;  %7497 = vst [vmem:[#allocation32_spill] sm:$0xff] %v6961_v44  ;;  %v3745_v45 = vunpack.c.h.bf16 %v3717_v59  ;;  %v3806_v22 = vmul.f32 %v3742_v23, %v2539_v63  ;;  %v3663_v2 = vmul.f32 %v3599_v46, %v2428_v39  ;;  %v2430_v44 = vpop.f32.mrb[86].mxu0  ;;  %v3574_v58 = vld [vmem:[%s6174_s12 + $0x320] sm:$0xff]  ;;  %v3807_v14 = vmul.f32 %v3743_v60, %v2541_v57  ;;  %v7502_v41 = vld [vmem:[#allocation12_spill] sm:$0xff]  ;;  %v2545_v63 = vpop.f32.mrb[87].mxu1 }
 0x1d2   : > { %7499 = vst [vmem:[#allocation33_spill] sm:$0xff] %v6964_v20  ;;  %v6968_v37 = vadd.f32 %v3662_v61, %v7500_v24  ;;  %v3664_v38 = vmul.f32 %v3600_v27, %v2430_v44  ;;  %v2432_v20 = vpop.f32.mrb[87].mxu0  ;;  %v3808_v23 = vmul.f32 %v3744_v10, %v2543_v42  ;;  %v3575_v39 = vld [vmem:[%s6174_s12 + $0x360] sm:$0xff]  ;;  %v7507_v61 = vld [vmem:[#allocation38_spill] sm:$0xff]  ;;  %v3602_v60 = vunpack.c.l.bf16 %v3574_v58  ;;  %v3719_v27 = vld [vmem:[%s6174_s12 + $0x368] sm:$0xff] }
 0x1d3   : > { %v6972_v36 = vadd.f32 %v3806_v22, %v7502_v41  ;;  %v6975_v59 = vadd.f32 %v3663_v2, %v7503_v25  ;;  %v3665_v46 = vmul.f32 %v3601_v40, %v2432_v20  ;;  %v6979_v8 = vadd.f32 %v3807_v14, %v7505_v47  ;;  %v7509_v57 = vld [vmem:[#allocation15_spill] sm:$0xff]  ;;  %v7513_v10 = vld [vmem:[#allocation16_spill] sm:$0xff] }
 0x1d4   : > { %7501 = vst [vmem:[#allocation47_spill] sm:$0xff] %v6968_v37  ;;  %v6982_v24 = vadd.f32 %v3664_v38, %v7507_v61  ;;  %v3809_v44 = vmul.f32 %v3745_v45, %v2545_v63  ;;  %v6986_v37 = vadd.f32 %v3808_v23, %v7509_v57  ;;  %v7511_v22 = vld [vmem:[#allocation39_spill] sm:$0xff]  ;;  %v3746_v2 = vunpack.c.l.bf16 %v3718_v49  ;;  %v2436_v42 = vpop.f32.mrb[88].mxu0  ;;  %v2549_v63 = vpop.f32.mrb[88].mxu1 }
 0x1d5   : > { %7504 = vst [vmem:[#allocation36_spill] sm:$0xff] %v6975_v59  ;;  %7506 = vst [vmem:[#allocation48_spill] sm:$0xff] %v6979_v8  ;;  %v6989_v41 = vadd.f32 %v3665_v46, %v7511_v22  ;;  %v3603_v20 = vunpack.c.h.bf16 %v3574_v58  ;;  %v3747_v47 = vunpack.c.h.bf16 %v3718_v49  ;;  %v3604_v14 = vunpack.c.l.bf16 %v3575_v39  ;;  %v2438_v61 = vpop.f32.mrb[89].mxu0  ;;  %v2551_v22 = vpop.f32.mrb[89].mxu1  ;;  %v7518_v8 = vld [vmem:[#allocation41_spill] sm:$0xff] }
 0x1d6   : > { %7508 = vst [vmem:[#allocation37_spill] sm:$0xff] %v6982_v24  ;;  %7510 = vst [vmem:[#allocation40_spill] sm:$0xff] %v6986_v37  ;;  %v6992_v40 = vadd.f32 %v3809_v44, %v7513_v10  ;;  %v3748_v38 = vunpack.c.l.bf16 %v3719_v27  ;;  %v3605_v45 = vunpack.c.h.bf16 %v3575_v39  ;;  %v3666_v25 = vmul.f32 %v3602_v60, %v2436_v42  ;;  %v3576_v37 = vld [vmem:[%s6174_s12 + $0x3a0] sm:$0xff]  ;;  %v2553_v10 = vpop.f32.mrb[90].mxu1  ;;  %v3720_v24 = vld [vmem:[%s6174_s12 + $0x3a8] sm:$0xff] }
 0x1d7   : > { %7512 = vst [vmem:[#allocation49_spill] sm:$0xff] %v6989_v41  ;;  %v3749_v23 = vunpack.c.h.bf16 %v3719_v27  ;;  %v3810_v57 = vmul.f32 %v3746_v2, %v2549_v63  ;;  %v3667_v46 = vmul.f32 %v3603_v20, %v2438_v61  ;;  %v2440_v41 = vpop.f32.mrb[90].mxu0  ;;  %v3811_v49 = vmul.f32 %v3747_v47, %v2551_v22  ;;  %v7516_v39 = vld [vmem:[#allocation17_spill] sm:$0xff]  ;;  %v7517_v42 = vld [vmem:[#allocation18_spill] sm:$0xff]  ;;  %v2555_v63 = vpop.f32.mrb[91].mxu1  ;;  %v3577_v61 = vld [vmem:[%s6174_s12 + $0x3e0] sm:$0xff] }
 0x1d8   : > { %7514 = vst [vmem:[#allocation50_spill] sm:$0xff] %v6992_v40  ;;  %v6996_v58 = vadd.f32 %v3666_v25, %v6759_v19  ;;  %v3668_v44 = vmul.f32 %v3604_v14, %v2440_v41  ;;  %v2442_v40 = vpop.f32.mrb[91].mxu0  ;;  %v3812_v2 = vmul.f32 %v3748_v38, %v2553_v10  ;;  %v7519_v19 = vld [vmem:[#allocation19_spill] sm:$0xff]  ;;  %v3606_v47 = vunpack.c.l.bf16 %v3576_v37  ;;  %v3721_v14 = vld [vmem:[%s6174_s12 + $0x3e8] sm:$0xff]  ;;  %v7521_v22 = vld [vmem:[#allocation42_spill] sm:$0xff] }
 0x1d9   : > { %v7000_v60 = vadd.f32 %v3810_v57, %v7516_v39  ;;  %v7003_v27 = vadd.f32 %v3667_v46, %v7517_v42  ;;  %v3669_v20 = vmul.f32 %v3605_v45, %v2442_v40  ;;  %v7007_v59 = vadd.f32 %v3811_v49, %v7518_v8  ;;  %v7523_v57 = vld [vmem:[#allocation20_spill] sm:$0xff]  ;;  %v7525_v38 = vld [vmem:[#allocation21_spill] sm:$0xff] }
 0x1da   : > { %7515 = vst [vmem:[#allocation51_spill] sm:$0xff] %v6996_v58  ;;  %v7010_v25 = vadd.f32 %v3668_v44, %v7519_v19  ;;  %v3813_v41 = vmul.f32 %v3749_v23, %v2555_v63  ;;  %v7014_v58 = vadd.f32 %v3812_v2, %v7521_v22  ;;  %v3750_v46 = vunpack.c.l.bf16 %v3720_v24 }
 0x1db   : > { %v7017_v39 = vadd.f32 %v3669_v20, %v7523_v57  ;;  %v3607_v40 = vunpack.c.h.bf16 %v3576_v37  ;;  %v3751_v8 = vunpack.c.h.bf16 %v3720_v24  ;;  %v3608_v49 = vunpack.c.l.bf16 %v3577_v61 }
 0x1dc   : > { %7520 = vst [vmem:[#allocation52_spill] sm:$0xff] %v7010_v25  ;;  %7522 = vst [vmem:[#allocation53_spill] sm:$0xff] %v7014_v58  ;;  %v7020_v45 = vadd.f32 %v3813_v41, %v7525_v38  ;;  %v2446_v10 = vpop.f32.mrb[92].mxu0  ;;  %v3752_v44 = vunpack.c.l.bf16 %v3721_v14  ;;  %v3609_v23 = vunpack.c.h.bf16 %v3577_v61  ;;  %v2559_v63 = vpop.f32.mrb[92].mxu1  ;;  %v3753_v2 = vunpack.c.h.bf16 %v3721_v14  ;;  %v3850_v58 = vld [vmem:[%s6174_s12 + $0x30] sm:$0xff]  ;;  %v3994_v25 = vld [vmem:[%s6174_s12 + $0x38] sm:$0xff] }
 0x1dd   : > { %7524 = vst [vmem:[#allocation54_spill] sm:$0xff] %v7017_v39  ;;  %v3670_v42 = vmul.f32 %v3606_v47, %v2446_v10  ;;  %v2448_v19 = vpop.f32.mrb[93].mxu0  ;;  %v3814_v22 = vmul.f32 %v3750_v46, %v2559_v63  ;;  %v2561_v57 = vpop.f32.mrb[93].mxu1  ;;  %v3851_v10 = vld [vmem:[%s6174_s12 + $0x70] sm:$0xff] }
 0x1de   : > { %7526 = vst [vmem:[#allocation55_spill] sm:$0xff] %v7020_v45  ;;  %v3671_v20 = vmul.f32 %v3607_v40, %v2448_v19  ;;  %v2450_v39 = vpop.f32.mrb[94].mxu0  ;;  %v3815_v24 = vmul.f32 %v3751_v8, %v2561_v57  ;;  %v2563_v38 = vpop.f32.mrb[94].mxu1  ;;  %v3868_v63 = vunpack.c.l.bf16 %v3851_v10 }
 0x1df   : > { %v7024_v37 = vadd.f32 %v3670_v42, %v6804_v31  ;;  %v3672_v41 = vmul.f32 %v3608_v49, %v2450_v39  ;;  %v2452_v45 = vpop.f32.mrb[95].mxu0  ;;  %v7028_v61 = vadd.f32 %v3814_v22, %v6807_v48  ;;  %v3816_v14 = vmul.f32 %v3752_v44, %v2563_v38  ;;  %v2565_v40 = vpop.f32.mrb[95].mxu1  ;;  %v3995_v42 = vld [vmem:[%s6174_s12 + $0x78] sm:$0xff] }
 0x1e0   : > { %v7031_v47 = vadd.f32 %v3671_v20, %v6809_v15  ;;  %v3673_v46 = vmul.f32 %v3609_v23, %v2452_v45  ;;  %v7035_v31 = vadd.f32 %v3815_v24, %v6815_v30  ;;  %v3817_v39 = vmul.f32 %v3753_v2, %v2565_v40  ;;  %v3852_v2 = vld [vmem:[%s6174_s12 + $0xb0] sm:$0xff] }
 0x1e1   : > { %v7038_v8 = vadd.f32 %v3672_v41, %v6817_v29  ;;  %v3866_v49 = vunpack.c.l.bf16 %v3850_v58  ;;  %v7042_v48 = vadd.f32 %v3816_v14, %v6820_v33  ;;  %v4010_v44 = vunpack.c.l.bf16 %v3994_v25 }
 0x1e2   : > { %v7045_v15 = vadd.f32 %v3673_v46, %v6822_v51  ;;  %v3867_v45 = vunpack.c.h.bf16 %v3850_v58  ;;  %v7048_v23 = vadd.f32 %v3817_v39, %v6824_v6  ;;  %v4011_v30 = vunpack.c.h.bf16 %v3994_v25  ;;  %v3996_v58 = vld [vmem:[%s6174_s12 + $0xb8] sm:$0xff] }
 0x1e3   : > { %v4012_v29 = vunpack.c.l.bf16 %v3995_v42  ;;  %v3869_v22 = vunpack.c.h.bf16 %v3851_v10  ;;  %v4013_v33 = vunpack.c.h.bf16 %v3995_v42 }
 0x1e4   : > { %7527 = vst [vmem:[#allocation56_spill] sm:$0xff] %v7048_v23  ;;  %v2602_v19 = vpop.f32.mrb[96].mxu0  ;;  %v2715_v57 = vpop.f32.mrb[96].mxu1  ;;  %v3870_v23 = vunpack.c.l.bf16 %v3852_v2 }
 0x1e5   : > { %v3930_v20 = vmul.f32 %v3866_v49, %v2602_v19  ;;  %v2604_v24 = vpop.f32.mrb[97].mxu0  ;;  %v4074_v41 = vmul.f32 %v4010_v44, %v2715_v57  ;;  %v2717_v38 = vpop.f32.mrb[97].mxu1 }
 0x1e6   : > { %v3931_v51 = vmul.f32 %v3867_v45, %v2604_v24  ;;  %v2606_v14 = vpop.f32.mrb[98].mxu0  ;;  %v4075_v6 = vmul.f32 %v4011_v30, %v2717_v38  ;;  %v2719_v40 = vpop.f32.mrb[98].mxu1  ;;  %v3853_v45 = vld [vmem:[%s6174_s12 + $0xf0] sm:$0xff]  ;;  %v3997_v30 = vld [vmem:[%s6174_s12 + $0xf8] sm:$0xff] }
 0x1e7   : > { %v3962_v46 = vadd.f32 %v3930_v20, %v6828_v1  ;;  %v3932_v25 = vmul.f32 %v3868_v63, %v2606_v14  ;;  %v2608_v39 = vpop.f32.mrb[99].mxu0  ;;  %v4106_v10 = vadd.f32 %v4074_v41, %v6832_v34  ;;  %v4076_v19 = vmul.f32 %v4012_v29, %v2719_v40  ;;  %v2721_v44 = vpop.f32.mrb[99].mxu1 }
 0x1e8   : > { %v3963_v49 = vadd.f32 %v3931_v51, %v6835_v28  ;;  %v3933_v42 = vmul.f32 %v3869_v22, %v2608_v39  ;;  %v4107_v57 = vadd.f32 %v4075_v6, %v6839_v7  ;;  %v4077_v1 = vmul.f32 %v4013_v33, %v2721_v44  ;;  %v3854_v51 = vld [vmem:[%s6174_s12 + $0x130] sm:$0xff] }
 0x1e9   : > { %v3964_v24 = vadd.f32 %v3932_v25, %v6842_v32  ;;  %v4014_v20 = vunpack.c.l.bf16 %v3996_v58  ;;  %v4138_v63 = vadd.f32 %v4106_v10, %v3962_v46  ;;  %v4108_v38 = vadd.f32 %v4076_v19, %v6846_v50 }
 0x1ea   : > { %v3965_v14 = vadd.f32 %v3933_v42, %v6849_v62  ;;  %v3871_v34 = vunpack.c.h.bf16 %v3852_v2  ;;  %v4139_v41 = vadd.f32 %v4107_v57, %v3963_v49  ;;  %v4109_v28 = vadd.f32 %v4077_v1, %v6852_v55 }
 0x1eb   : > { %v4015_v29 = vunpack.c.h.bf16 %v3996_v58  ;;  %v3872_v22 = vunpack.c.l.bf16 %v3853_v45  ;;  %v4140_v40 = vadd.f32 %v4108_v38, %v3964_v24  ;;  %v4016_v6 = vunpack.c.l.bf16 %v3997_v30  ;;  %v3998_v58 = vld [vmem:[%s6174_s12 + $0x138] sm:$0xff] }
 0x1ec   : > { %v2612_v7 = vpop.f32.mrb[100].mxu0  ;;  %v3873_v32 = vunpack.c.h.bf16 %v3853_v45  ;;  %v4141_v33 = vadd.f32 %v4109_v28, %v3965_v14  ;;  %v2725_v39 = vpop.f32.mrb[100].mxu1  ;;  %v4017_v10 = vunpack.c.h.bf16 %v3997_v30  ;;  %v3874_v55 = vunpack.c.l.bf16 %v3854_v51  ;;  %v3855_v14 = vld [vmem:[%s6174_s12 + $0x170] sm:$0xff] }
 0x1ed   : > { %v3934_v25 = vmul.f32 %v3870_v23, %v2612_v7  ;;  %v2614_v46 = vpop.f32.mrb[101].mxu0  ;;  %v4170_v50 = vpack.c.bf16 %v4140_v40, %v4138_v63  ;;  %v4078_v19 = vmul.f32 %v4014_v20, %v2725_v39  ;;  %v2727_v2 = vpop.f32.mrb[101].mxu1 }
 0x1ee   : > { %v3935_v62 = vmul.f32 %v3871_v34, %v2614_v46  ;;  %v2616_v49 = vpop.f32.mrb[102].mxu0  ;;  %v4079_v44 = vmul.f32 %v4015_v29, %v2727_v2  ;;  %v2729_v24 = vpop.f32.mrb[102].mxu1  ;;  %v4171_v1 = vpack.c.bf16 %v4141_v33, %v4139_v41  ;;  %v4018_v29 = vunpack.c.l.bf16 %v3998_v58 }
 0x1ef   : > { %v3966_v42 = vadd.f32 %v3934_v25, %v6856_v56  ;;  %v3936_v57 = vmul.f32 %v3872_v22, %v2616_v49  ;;  %v2618_v45 = vpop.f32.mrb[103].mxu0  ;;  %v4110_v23 = vadd.f32 %v4078_v19, %v6860_v3  ;;  %v4080_v63 = vmul.f32 %v4016_v6, %v2729_v24  ;;  %v2731_v38 = vpop.f32.mrb[103].mxu1  ;;  %v3999_v22 = vld [vmem:[%s6174_s12 + $0x178] sm:$0xff]  ;;  %v3856_v25 = vld [vmem:[%s6174_s12 + $0x1b0] sm:$0xff] }
 0x1f0   : > { %v3967_v30 = vadd.f32 %v3935_v62, %v6863_v52  ;;  %v3937_v20 = vmul.f32 %v3873_v32, %v2618_v45  ;;  %v4111_v34 = vadd.f32 %v4079_v44, %v6867_v12  ;;  %v4081_v56 = vmul.f32 %v4017_v10, %v2731_v38  ;;  %4422 = vmatprep.mubr.bf16.mxu0 %v4171_v1 }
 0x1f1   : > { %v3968_v28 = vadd.f32 %v3936_v57, %v6870_v35  ;;  %v4142_v40 = vadd.f32 %v4110_v23, %v3966_v42  ;;  %v4112_v41 = vadd.f32 %v4080_v63, %v6874_v53  ;;  %4423 = vmatmul.mubr.bf16.vlgmr.msra.gmra.mrb[128].mxu0 %v4170_v50  ;;  %v3875_v52 = vunpack.c.h.bf16 %v3854_v51 }
 0x1f2   : > { %v3969_v3 = vadd.f32 %v3937_v20, %v6877_v9  ;;  %v4143_v7 = vadd.f32 %v4111_v34, %v3967_v30  ;;  %v4113_v6 = vadd.f32 %v4081_v56, %v6880_v54  ;;  %v4019_v32 = vunpack.c.h.bf16 %v3998_v58  ;;  %v4000_v58 = vld [vmem:[%s6174_s12 + $0x1b8] sm:$0xff] }
 0x1f3   : > { %v3876_v33 = vunpack.c.l.bf16 %v3855_v14  ;;  %v4144_v12 = vadd.f32 %v4112_v41, %v3968_v28  ;;  %v4020_v39 = vunpack.c.l.bf16 %v3999_v22  ;;  %v3877_v46 = vunpack.c.h.bf16 %v3855_v14  ;;  %v3857_v14 = vld [vmem:[%s6174_s12 + $0x1f0] sm:$0xff] }
 0x1f4   : > { %v2622_v35 = vpop.f32.mrb[104].mxu0  ;;  %v4145_v10 = vadd.f32 %v4113_v6, %v3969_v3  ;;  %v2735_v62 = vpop.f32.mrb[104].mxu1  ;;  %v4021_v53 = vunpack.c.h.bf16 %v3999_v22  ;;  %v3878_v54 = vunpack.c.l.bf16 %v3856_v25  ;;  %v4022_v56 = vunpack.c.l.bf16 %v4000_v58  ;;  %v3858_v6 = vld [vmem:[%s6174_s12 + $0x230] sm:$0xff] }
 0x1f5   : > { %v3938_v19 = vmul.f32 %v3874_v55, %v2622_v35  ;;  %v2624_v2 = vpop.f32.mrb[105].mxu0  ;;  %v4082_v49 = vmul.f32 %v4018_v29, %v2735_v62  ;;  %v2737_v50 = vpop.f32.mrb[105].mxu1  ;;  %v4172_v42 = vpack.c.bf16 %v4144_v12, %v4142_v40  ;;  %v4001_v29 = vld [vmem:[%s6174_s12 + $0x1f8] sm:$0xff] }
 0x1f6   : > { %v3939_v9 = vmul.f32 %v3875_v52, %v2624_v2  ;;  %v2626_v51 = vpop.f32.mrb[106].mxu0  ;;  %v4083_v57 = vmul.f32 %v4019_v32, %v2737_v50  ;;  %v2739_v45 = vpop.f32.mrb[106].mxu1  ;;  %v4173_v23 = vpack.c.bf16 %v4145_v10, %v4143_v7  ;;  %v4023_v52 = vunpack.c.h.bf16 %v4000_v58  ;;  %v4002_v2 = vld [vmem:[%s6174_s12 + $0x238] sm:$0xff] }
 0x1f7   : > { %v3970_v44 = vadd.f32 %v3938_v19, %v6884_v11  ;;  %v3940_v24 = vmul.f32 %v3876_v33, %v2626_v51  ;;  %v2628_v1 = vpop.f32.mrb[107].mxu0  ;;  %v4114_v55 = vadd.f32 %v4082_v49, %v6888_v5  ;;  %v4084_v63 = vmul.f32 %v4020_v39, %v2739_v45  ;;  %v2741_v38 = vpop.f32.mrb[107].mxu1  ;;  %v3859_v45 = vld [vmem:[%s6174_s12 + $0x270] sm:$0xff] }
 0x1f8   : > { %v3971_v30 = vadd.f32 %v3939_v9, %v6891_v0  ;;  %v3941_v20 = vmul.f32 %v3877_v46, %v2628_v1  ;;  %v4115_v34 = vadd.f32 %v4083_v57, %v6895_v18  ;;  %v4085_v11 = vmul.f32 %v4021_v53, %v2741_v38  ;;  %4432 = vmatprep.mubr.bf16.mxu0 %v4173_v23  ;;  %v7528_v1 = vld [vmem:[#allocation22_spill] sm:$0xff] }
 0x1f9   : > { %v3972_v28 = vadd.f32 %v3940_v24, %v6898_v43  ;;  %v4146_v22 = vadd.f32 %v4114_v55, %v3970_v44  ;;  %v4116_v40 = vadd.f32 %v4084_v63, %v6902_v13  ;;  %4433 = vmatmul.mubr.bf16.gmra.mrb[132].mxu0 %v4172_v42  ;;  %v3879_v0 = vunpack.c.h.bf16 %v3856_v25  ;;  %v7529_v55 = vld [vmem:[#allocation43_spill] sm:$0xff] }
 0x1fa   : > { %v3973_v5 = vadd.f32 %v3941_v20, %v6905_v16  ;;  %v4147_v41 = vadd.f32 %v4115_v34, %v3971_v30  ;;  %v4117_v3 = vadd.f32 %v4085_v11, %v6908_v26  ;;  %v3880_v7 = vunpack.c.l.bf16 %v3857_v14  ;;  %v4003_v20 = vld [vmem:[%s6174_s12 + $0x278] sm:$0xff] }
 0x1fb   : > { %v4148_v18 = vadd.f32 %v4116_v40, %v3972_v28  ;;  %v4024_v32 = vunpack.c.l.bf16 %v4001_v29  ;;  %v3881_v33 = vunpack.c.h.bf16 %v3857_v14  ;;  %v4025_v13 = vunpack.c.h.bf16 %v4001_v29  ;;  %v7530_v14 = vld [vmem:[#allocation23_spill] sm:$0xff]  ;;  %v7531_v28 = vld [vmem:[#allocation44_spill] sm:$0xff] }
 0x1fc   : > { %v2632_v43 = vpop.f32.mrb[108].mxu0  ;;  %v4149_v12 = vadd.f32 %v4117_v3, %v3973_v5  ;;  %v2745_v39 = vpop.f32.mrb[108].mxu1  ;;  %v3882_v26 = vunpack.c.l.bf16 %v3858_v6  ;;  %v4026_v63 = vunpack.c.l.bf16 %v4002_v2  ;;  %v3884_v40 = vunpack.c.l.bf16 %v3859_v45  ;;  %v3860_v5 = vld [vmem:[%s6174_s12 + $0x2b0] sm:$0xff] }
 0x1fd   : > { %v3942_v35 = vmul.f32 %v3878_v54, %v2632_v43  ;;  %v2634_v46 = vpop.f32.mrb[109].mxu0  ;;  %v4086_v10 = vmul.f32 %v4022_v56, %v2745_v39  ;;  %v2747_v19 = vpop.f32.mrb[109].mxu1  ;;  %v4174_v62 = vpack.c.bf16 %v4148_v18, %v4146_v22  ;;  %v7532_v56 = vld [vmem:[#allocation24_spill] sm:$0xff]  ;;  %v4027_v22 = vunpack.c.h.bf16 %v4002_v2 }
 0x1fe   : > { %v3943_v16 = vmul.f32 %v3879_v0, %v2634_v46  ;;  %v2636_v25 = vpop.f32.mrb[110].mxu0  ;;  %v4087_v49 = vmul.f32 %v4023_v52, %v2747_v19  ;;  %v2749_v50 = vpop.f32.mrb[110].mxu1  ;;  %v4175_v42 = vpack.c.bf16 %v4149_v12, %v4147_v41  ;;  %v4028_v3 = vunpack.c.l.bf16 %v4003_v20 }
 0x1ff   : > { %v3974_v53 = vadd.f32 %v3942_v35, %v6912_v17  ;;  %v3944_v9 = vmul.f32 %v3880_v7, %v2636_v25  ;;  %v2638_v51 = vpop.f32.mrb[111].mxu0  ;;  %v4118_v54 = vadd.f32 %v4086_v10, %v6916_v21  ;;  %v4088_v44 = vmul.f32 %v4024_v32, %v2749_v50  ;;  %v2751_v24 = vpop.f32.mrb[111].mxu1  ;;  %v4004_v10 = vld [vmem:[%s6174_s12 + $0x2b8] sm:$0xff]  ;;  %v7535_v50 = vld [vmem:[#allocation45_spill] sm:$0xff] }
 0x200   : > { %v3975_v58 = vadd.f32 %v3943_v16, %v6919_v4  ;;  %v3945_v57 = vmul.f32 %v3881_v33, %v2638_v51  ;;  %v4119_v23 = vadd.f32 %v4087_v49, %v7528_v1  ;;  %v4089_v17 = vmul.f32 %v4025_v13, %v2751_v24  ;;  %4442 = vmatprep.mubr.bf16.mxu0 %v4175_v42  ;;  %v7533_v16 = vld [vmem:[#allocation25_spill] sm:$0xff] }
 0x201   : > { %v3976_v30 = vadd.f32 %v3944_v9, %v7529_v55  ;;  %v4150_v38 = vadd.f32 %v4118_v54, %v3974_v53  ;;  %v4120_v34 = vadd.f32 %v4088_v44, %v7530_v14  ;;  %4443 = vmatmul.mubr.bf16.gmra.mrb[136].mxu0 %v4174_v62  ;;  %v3883_v4 = vunpack.c.h.bf16 %v3858_v6  ;;  %v3861_v44 = vld [vmem:[%s6174_s12 + $0x2f0] sm:$0xff] }
 0x202   : > { %v3977_v21 = vadd.f32 %v3945_v57, %v7531_v28  ;;  %v4151_v11 = vadd.f32 %v4119_v23, %v3975_v58  ;;  %v4121_v29 = vadd.f32 %v4089_v17, %v7532_v56  ;;  %v3885_v52 = vunpack.c.h.bf16 %v3859_v45  ;;  %v7536_v57 = vld [vmem:[#allocation28_spill] sm:$0xff]  ;;  %v7537_v45 = vld [vmem:[#allocation46_spill] sm:$0xff] }
 0x203   : > { %v4152_v0 = vadd.f32 %v4120_v34, %v3976_v30  ;;  %v4029_v33 = vunpack.c.h.bf16 %v4003_v20  ;;  %v3886_v13 = vunpack.c.l.bf16 %v3860_v5  ;;  %v4030_v55 = vunpack.c.l.bf16 %v4004_v10  ;;  %v4005_v30 = vld [vmem:[%s6174_s12 + $0x2f8] sm:$0xff] }
 0x204   : > { %v2642_v41 = vpop.f32.mrb[112].mxu0  ;;  %v4153_v7 = vadd.f32 %v4121_v29, %v3977_v21  ;;  %v2755_v43 = vpop.f32.mrb[112].mxu1  ;;  %v3887_v34 = vunpack.c.h.bf16 %v3860_v5  ;;  %v7540_v21 = vld [vmem:[#allocation33_spill] sm:$0xff]  ;;  %v3888_v56 = vunpack.c.l.bf16 %v3861_v44 }
 0x205   : > { %v3946_v18 = vmul.f32 %v3882_v26, %v2642_v41  ;;  %v2644_v32 = vpop.f32.mrb[113].mxu0  ;;  %v4090_v12 = vmul.f32 %v4026_v63, %v2755_v43  ;;  %v2757_v39 = vpop.f32.mrb[113].mxu1  ;;  %v4176_v46 = vpack.c.bf16 %v4152_v0, %v4150_v38  ;;  %v7534_v26 = vld [vmem:[#allocation26_spill] sm:$0xff]  ;;  %v7538_v63 = vld [vmem:[#allocation29_spill] sm:$0xff]  ;;  %v7539_v38 = vld [vmem:[#allocation32_spill] sm:$0xff]  ;;  %v4032_v0 = vunpack.c.l.bf16 %v4005_v30 }
 0x206   : > { %v3947_v35 = vmul.f32 %v3883_v4, %v2644_v32  ;;  %v2646_v6 = vpop.f32.mrb[114].mxu0  ;;  %v4091_v25 = vmul.f32 %v4027_v22, %v2757_v39  ;;  %v2759_v2 = vpop.f32.mrb[114].mxu1  ;;  %v4177_v49 = vpack.c.bf16 %v4153_v7, %v4151_v11  ;;  %v4031_v11 = vunpack.c.h.bf16 %v4004_v10  ;;  %v3862_v29 = vld [vmem:[%s6174_s12 + $0x330] sm:$0xff] }
 0x207   : > { %v3978_v19 = vadd.f32 %v3946_v18, %v7533_v16  ;;  %v3948_v62 = vmul.f32 %v3884_v40, %v2646_v6  ;;  %v2648_v53 = vpop.f32.mrb[115].mxu0  ;;  %v4122_v9 = vadd.f32 %v4090_v12, %v7534_v26  ;;  %v4092_v42 = vmul.f32 %v4028_v3, %v2759_v2  ;;  %v2761_v58 = vpop.f32.mrb[115].mxu1  ;;  %v4006_v6 = vld [vmem:[%s6174_s12 + $0x338] sm:$0xff] }
 0x208   : > { %v3979_v51 = vadd.f32 %v3947_v35, %v7535_v50  ;;  %v3949_v54 = vmul.f32 %v3885_v52, %v2648_v53  ;;  %v4123_v24 = vadd.f32 %v4091_v25, %v7536_v57  ;;  %v4093_v23 = vmul.f32 %v4029_v33, %v2761_v58  ;;  %4452 = vmatprep.mubr.bf16.mxu0 %v4177_v49  ;;  %v7542_v53 = vld [vmem:[#allocation36_spill] sm:$0xff]  ;;  %v7544_v58 = vld [vmem:[#allocation37_spill] sm:$0xff] }
 0x209   : > { %v3980_v1 = vadd.f32 %v3948_v62, %v7537_v45  ;;  %v4154_v17 = vadd.f32 %v4122_v9, %v3978_v19  ;;  %v4124_v20 = vadd.f32 %v4092_v42, %v7538_v63  ;;  %4453 = vmatmul.mubr.bf16.gmra.mrb[140].mxu0 %v4176_v46  ;;  %v3889_v41 = vunpack.c.h.bf16 %v3861_v44  ;;  %v7541_v46 = vld [vmem:[#allocation47_spill] sm:$0xff]  ;;  %v7543_v42 = vld [vmem:[#allocation48_spill] sm:$0xff]  ;;  %v4007_v45 = vld [vmem:[%s6174_s12 + $0x378] sm:$0xff] }
 0x20a   : > { %v3981_v14 = vadd.f32 %v3949_v54, %v7539_v38  ;;  %v4155_v28 = vadd.f32 %v4123_v24, %v3979_v51  ;;  %v4125_v4 = vadd.f32 %v4093_v23, %v7540_v21  ;;  %v4033_v43 = vunpack.c.h.bf16 %v4005_v30  ;;  %v3863_v51 = vld [vmem:[%s6174_s12 + $0x370] sm:$0xff]  ;;  %v7545_v23 = vld [vmem:[#allocation40_spill] sm:$0xff] }
 0x20b   : > { %v4156_v22 = vadd.f32 %v4124_v20, %v3980_v1  ;;  %v3890_v39 = vunpack.c.l.bf16 %v3862_v29  ;;  %v4034_v24 = vunpack.c.l.bf16 %v4006_v6  ;;  %v7546_v30 = vld [vmem:[#allocation49_spill] sm:$0xff]  ;;  %v7547_v20 = vld [vmem:[#allocation50_spill] sm:$0xff] }
 0x20c   : > { %v2652_v40 = vpop.f32.mrb[116].mxu0  ;;  %v4157_v3 = vadd.f32 %v4125_v4, %v3981_v14  ;;  %v2765_v7 = vpop.f32.mrb[116].mxu1  ;;  %v4035_v14 = vunpack.c.h.bf16 %v4006_v6 }
 0x20d   : > { %v3950_v52 = vmul.f32 %v3886_v13, %v2652_v40  ;;  %v2654_v18 = vpop.f32.mrb[117].mxu0  ;;  %v4178_v32 = vpack.c.bf16 %v4156_v22, %v4154_v17  ;;  %v4094_v33 = vmul.f32 %v4030_v55, %v2765_v7  ;;  %v2767_v5 = vpop.f32.mrb[117].mxu1  ;;  %v3891_v17 = vunpack.c.h.bf16 %v3862_v29 }
 0x20e   : > { %v3951_v12 = vmul.f32 %v3887_v34, %v2654_v18  ;;  %v2656_v35 = vpop.f32.mrb[118].mxu0  ;;  %v4095_v16 = vmul.f32 %v4031_v11, %v2767_v5  ;;  %v2769_v25 = vpop.f32.mrb[118].mxu1  ;;  %v4179_v2 = vpack.c.bf16 %v4157_v3, %v4155_v28  ;;  %v3892_v34 = vunpack.c.l.bf16 %v3863_v51  ;;  %v3864_v28 = vld [vmem:[%s6174_s12 + $0x3b0] sm:$0xff] }
 0x20f   : > { %v3982_v10 = vadd.f32 %v3950_v52, %v7541_v46  ;;  %v3952_v19 = vmul.f32 %v3888_v56, %v2656_v35  ;;  %v2658_v62 = vpop.f32.mrb[119].mxu0  ;;  %v4126_v13 = vadd.f32 %v4094_v33, %v6972_v36  ;;  %v4096_v26 = vmul.f32 %v4032_v0, %v2769_v25  ;;  %v2771_v50 = vpop.f32.mrb[119].mxu1  ;;  %v4008_v33 = vld [vmem:[%s6174_s12 + $0x3b8] sm:$0xff] }
 0x210   : > { %v3983_v49 = vadd.f32 %v3951_v12, %v7542_v53  ;;  %v3953_v9 = vmul.f32 %v3889_v41, %v2658_v62  ;;  %v4127_v54 = vadd.f32 %v4095_v16, %v7543_v42  ;;  %v4097_v57 = vmul.f32 %v4033_v43, %v2771_v50  ;;  %4462 = vmatprep.mubr.bf16.mxu1 %v4179_v2  ;;  %v7548_v12 = vld [vmem:[#allocation51_spill] sm:$0xff] }
 0x211   : > { %v3984_v44 = vadd.f32 %v3952_v19, %v7544_v58  ;;  %v4158_v1 = vadd.f32 %v4126_v13, %v3982_v10  ;;  %v4128_v55 = vadd.f32 %v4096_v26, %v7545_v23  ;;  %4463 = vmatmul.mubr.bf16.vlgmr.msra.gmra.mrb[128].mxu1 %v4178_v32  ;;  %v4036_v11 = vunpack.c.l.bf16 %v4007_v45  ;;  %v3865_v13 = vld [vmem:[%s6174_s12 + $0x3f0] sm:$0xff] }
 0x212   : > { %v3985_v36 = vadd.f32 %v3953_v9, %v7546_v30  ;;  %v4159_v63 = vadd.f32 %v4127_v54, %v3983_v49  ;;  %v4129_v38 = vadd.f32 %v4097_v57, %v7547_v20  ;;  %v3893_v56 = vunpack.c.h.bf16 %v3863_v51  ;;  %v7549_v49 = vld [vmem:[#allocation52_spill] sm:$0xff]  ;;  %v4009_v51 = vld [vmem:[%s6174_s12 + $0x3f8] sm:$0xff]  ;;  %v7550_v54 = vld [vmem:[#allocation53_spill] sm:$0xff] }
 0x213   : > { %v4160_v21 = vadd.f32 %v4128_v55, %v3984_v44  ;;  %v4037_v3 = vunpack.c.h.bf16 %v4007_v45  ;;  %v3894_v32 = vunpack.c.l.bf16 %v3864_v28  ;;  %v4038_v50 = vunpack.c.l.bf16 %v4008_v33  ;;  %v7551_v44 = vld [vmem:[#allocation54_spill] sm:$0xff] }
 0x214   : > { %v2662_v4 = vpop.f32.mrb[120].mxu0  ;;  %v4161_v22 = vadd.f32 %v4129_v38, %v3985_v36  ;;  %v2775_v0 = vpop.f32.mrb[120].mxu1  ;;  %v3896_v23 = vunpack.c.l.bf16 %v3865_v13  ;;  %v4040_v30 = vunpack.c.l.bf16 %v4009_v51  ;;  %v3897_v36 = vunpack.c.h.bf16 %v3865_v13 }
 0x215   : > { %v3954_v40 = vmul.f32 %v3890_v39, %v2662_v4  ;;  %v2664_v41 = vpop.f32.mrb[121].mxu0  ;;  %v4098_v52 = vmul.f32 %v4034_v24, %v2775_v0  ;;  %v2777_v18 = vpop.f32.mrb[121].mxu1  ;;  %v4180_v43 = vpack.c.bf16 %v4160_v21, %v4158_v1  ;;  %v7552_v24 = vld [vmem:[#allocation55_spill] sm:$0xff]  ;;  %v4039_v1 = vunpack.c.h.bf16 %v4008_v33 }
 0x216   : > { %v3955_v7 = vmul.f32 %v3891_v17, %v2664_v41  ;;  %v2666_v29 = vpop.f32.mrb[122].mxu0  ;;  %v4099_v35 = vmul.f32 %v4035_v14, %v2777_v18  ;;  %v2779_v46 = vpop.f32.mrb[122].mxu1  ;;  %v4181_v16 = vpack.c.bf16 %v4161_v22, %v4159_v63  ;;  %v4041_v14 = vunpack.c.h.bf16 %v4009_v51 }
 0x217   : > { %v3986_v5 = vadd.f32 %v3954_v40, %v7548_v12  ;;  %v3956_v6 = vmul.f32 %v3892_v34, %v2666_v29  ;;  %v2668_v10 = vpop.f32.mrb[123].mxu0  ;;  %v4130_v39 = vadd.f32 %v4098_v52, %v7000_v60  ;;  %v4100_v25 = vmul.f32 %v4036_v11, %v2779_v46  ;;  %v2781_v2 = vpop.f32.mrb[123].mxu1 }
 0x218   : > { %v3987_v19 = vadd.f32 %v3955_v7, %v7003_v27  ;;  %v3957_v62 = vmul.f32 %v3893_v56, %v2668_v10  ;;  %v4131_v53 = vadd.f32 %v4099_v35, %v7007_v59  ;;  %v4101_v9 = vmul.f32 %v4037_v3, %v2781_v2  ;;  %4472 = vmatprep.mubr.bf16.mxu1 %v4181_v16 }
 0x219   : > { %v3988_v26 = vadd.f32 %v3956_v6, %v7549_v49  ;;  %v4162_v42 = vadd.f32 %v4130_v39, %v3986_v5  ;;  %v4132_v58 = vadd.f32 %v4100_v25, %v7550_v54  ;;  %4473 = vmatmul.mubr.bf16.gmra.mrb[132].mxu1 %v4180_v43  ;;  %v3895_v60 = vunpack.c.h.bf16 %v3864_v28 }
 0x21a   : > { %v3989_v57 = vadd.f32 %v3957_v62, %v7551_v44  ;;  %v4163_v27 = vadd.f32 %v4131_v53, %v3987_v19  ;;  %v4133_v45 = vadd.f32 %v4101_v9, %v7552_v24 }
 0x21b   : > { %v4164_v55 = vadd.f32 %v4132_v58, %v3988_v26 }
 0x21c   : > { %v2672_v59 = vpop.f32.mrb[124].mxu0  ;;  %v4165_v17 = vadd.f32 %v4133_v45, %v3989_v57  ;;  %v2785_v20 = vpop.f32.mrb[124].mxu1 }
 0x21d   : > { %v3958_v63 = vmul.f32 %v3894_v32, %v2672_v59  ;;  %v2674_v38 = vpop.f32.mrb[125].mxu0  ;;  %v4102_v34 = vmul.f32 %v4038_v50, %v2785_v20  ;;  %v2787_v4 = vpop.f32.mrb[125].mxu1  ;;  %v4182_v56 = vpack.c.bf16 %v4164_v55, %v4162_v42 }
 0x21e   : > { %v3959_v21 = vmul.f32 %v3895_v60, %v2674_v38  ;;  %v2676_v11 = vpop.f32.mrb[126].mxu0  ;;  %v4103_v22 = vmul.f32 %v4039_v1, %v2787_v4  ;;  %v2789_v0 = vpop.f32.mrb[126].mxu1  ;;  %v4183_v3 = vpack.c.bf16 %v4165_v17, %v4163_v27 }
 0x21f   : > { %v3990_v28 = vadd.f32 %v3958_v63, %v7024_v37  ;;  %v3960_v40 = vmul.f32 %v3896_v23, %v2676_v11  ;;  %v2678_v41 = vpop.f32.mrb[127].mxu0  ;;  %v4134_v52 = vadd.f32 %v4102_v34, %v7028_v61  ;;  %v4104_v18 = vmul.f32 %v4040_v30, %v2789_v0  ;;  %v2791_v43 = vpop.f32.mrb[127].mxu1  ;;  %v7553_v61 = vld [vmem:[#allocation56_spill] sm:$0xff] }
 0x220   : > { %v3991_v7 = vadd.f32 %v3959_v21, %v7031_v47  ;;  %v3961_v29 = vmul.f32 %v3897_v36, %v2678_v41  ;;  %v4135_v32 = vadd.f32 %v4103_v22, %v7035_v31  ;;  %v4105_v12 = vmul.f32 %v4041_v14, %v2791_v43  ;;  %4482 = vmatprep.mubr.bf16.mxu1 %v4183_v3 }
 0x221   : > { %v3992_v33 = vadd.f32 %v3960_v40, %v7038_v8  ;;  %v4166_v5 = vadd.f32 %v4134_v52, %v3990_v28  ;;  %v4136_v37 = vadd.f32 %v4104_v18, %v7042_v48  ;;  %4483 = vmatmul.mubr.bf16.gmra.mrb[136].mxu1 %v4182_v56  ;;  %v4220_v31 = vlaneseq  ;;  %v4218_v48 = vld [vmem:[%s7226_s4] sm:$0x3] }
 0x222   : > { %v3993_v35 = vadd.f32 %v3961_v29, %v7045_v15  ;;  %v4167_v6 = vadd.f32 %v4135_v32, %v3991_v7  ;;  %v4137_v46 = vadd.f32 %v4105_v12, %v7553_v61 }
 0x223   : > { %v4168_v47 = vadd.f32 %v4136_v37, %v3992_v33  ;;  %v4221_v8 = vshrl.u32 %v4220_v31, 7 }
 0x224   : > { %v4169_v10 = vadd.f32 %v4137_v46, %v3993_v35 }
 0x225   : > { %v4184_v16 = vpack.c.bf16 %v4168_v47, %v4166_v5  ;;  %v4222_v19 = vsub.s32 0, %v4221_v8  ;;  %v4226_v25 = vsub.s32 1, %v4221_v8 }
 0x226   : > { %v4185_v39 = vpack.c.bf16 %v4169_v10, %v4167_v6 }
 0x227   : > { %v7146_v15 = vrot.slane %v4218_v48, %v4222_v19  ;;  %v7148_v62 = vrot.slane %v4218_v48, %v4226_v25 }
 0x228   : > { %4492 = vmatprep.mubr.bf16.mxu1 %v4185_v39 }
 0x229   : > { %4493 = vmatmul.mubr.bf16.gmra.mrb[140].mxu1 %v4184_v16 }
 0x2c4   : > { %v4424_v2 = vpop.f32.mrb[128].mxu0 }
 0x2c5   : > { %v4425_v13 = vadd.f32 %v4424_v2, %v7146_v15  ;;  %v4426_v53 = vpop.f32.mrb[129].mxu0 }
 0x2c6   : > { %v4427_v49 = vadd.f32 %v4426_v53, %v7148_v62  ;;  %v4428_v26 = vpop.f32.mrb[130].mxu0 }
 0x2c7   : > { %4503 = vst [vmem:[%s7153_s7] sm:$0xff] %v4425_v13  ;;  %v4429_v9 = vadd.f32 %v4428_v26, %v7146_v15  ;;  %v4430_v50 = vpop.f32.mrb[131].mxu0 }
 0x2c8   : > { %4504 = vst [vmem:[%s7153_s7 + $0x8] sm:$0xff] %v4427_v49  ;;  %v4431_v51 = vadd.f32 %v4430_v50, %v7148_v62 }
 0x2c9   : > { %4505 = vst [vmem:[%s7153_s7 + $0x10] sm:$0xff] %v4429_v9 }
 0x2ca   : > { %4506 = vst [vmem:[%s7153_s7 + $0x18] sm:$0xff] %v4431_v51 }
 0x2cc   : > { %v4434_v42 = vpop.f32.mrb[132].mxu0 }
 0x2cd   : > { %v4435_v54 = vadd.f32 %v4434_v42, %v7146_v15  ;;  %v4436_v58 = vpop.f32.mrb[133].mxu0 }
 0x2ce   : > { %v4437_v44 = vadd.f32 %v4436_v58, %v7148_v62  ;;  %v4438_v57 = vpop.f32.mrb[134].mxu0 }
 0x2cf   : > { %4507 = vst [vmem:[%s7153_s7 + $0x20] sm:$0xff] %v4435_v54  ;;  %v4439_v60 = vadd.f32 %v4438_v57, %v7146_v15  ;;  %v4440_v27 = vpop.f32.mrb[135].mxu0 }
 0x2d0   : > { %4508 = vst [vmem:[%s7153_s7 + $0x28] sm:$0xff] %v4437_v44  ;;  %v4441_v24 = vadd.f32 %v4440_v27, %v7148_v62 }
 0x2d1   : > { %4509 = vst [vmem:[%s7153_s7 + $0x30] sm:$0xff] %v4439_v60 }
 0x2d2   : > { %4510 = vst [vmem:[%s7153_s7 + $0x38] sm:$0xff] %v4441_v24 }
 0x2d4   : > { %v4444_v45 = vpop.f32.mrb[136].mxu0 }
 0x2d5   : > { %v4445_v1 = vadd.f32 %v4444_v45, %v7146_v15  ;;  %v4446_v23 = vpop.f32.mrb[137].mxu0 }
 0x2d6   : > { %v4447_v55 = vadd.f32 %v4446_v23, %v7148_v62  ;;  %v4448_v59 = vpop.f32.mrb[138].mxu0 }
 0x2d7   : > { %4511 = vst [vmem:[%s7153_s7 + $0x40] sm:$0xff] %v4445_v1  ;;  %v4449_v30 = vadd.f32 %v4448_v59, %v7146_v15  ;;  %v4450_v36 = vpop.f32.mrb[139].mxu0 }
 0x2d8   : > { %4512 = vst [vmem:[%s7153_s7 + $0x48] sm:$0xff] %v4447_v55  ;;  %v4451_v17 = vadd.f32 %v4450_v36, %v7148_v62 }
 0x2d9   : > { %4513 = vst [vmem:[%s7153_s7 + $0x50] sm:$0xff] %v4449_v30 }
 0x2da   : > { %4514 = vst [vmem:[%s7153_s7 + $0x58] sm:$0xff] %v4451_v17 }
 0x2dc   : > { %v4454_v63 = vpop.f32.mrb[140].mxu0 }
 0x2dd   : > { %v4455_v20 = vadd.f32 %v4454_v63, %v7146_v15  ;;  %v4456_v38 = vpop.f32.mrb[141].mxu0 }
 0x2de   : > { %v4457_v14 = vadd.f32 %v4456_v38, %v7148_v62  ;;  %v4458_v34 = vpop.f32.mrb[142].mxu0 }
 0x2df   : > { %4515 = vst [vmem:[%s7153_s7 + $0x60] sm:$0xff] %v4455_v20  ;;  %v4459_v21 = vadd.f32 %v4458_v34, %v7146_v15  ;;  %v4460_v4 = vpop.f32.mrb[143].mxu0 }
 0x2e0   : > { %4516 = vst [vmem:[%s7153_s7 + $0x68] sm:$0xff] %v4457_v14  ;;  %v4461_v11 = vadd.f32 %v4460_v4, %v7148_v62 }
 0x2e1   : > { %4517 = vst [vmem:[%s7153_s7 + $0x70] sm:$0xff] %v4459_v21 }
 0x2e2   : > { %4518 = vst [vmem:[%s7153_s7 + $0x78] sm:$0xff] %v4461_v11 }
 0x2e4   : > { %v4464_v56 = vpop.f32.mrb[128].mxu1 }
 0x2e5   : > { %v4465_v28 = vadd.f32 %v4464_v56, %v7146_v15  ;;  %v4466_v22 = vpop.f32.mrb[129].mxu1 }
 0x2e6   : > { %v4467_v40 = vadd.f32 %v4466_v22, %v7148_v62  ;;  %v4468_v0 = vpop.f32.mrb[130].mxu1 }
 0x2e7   : > { %4519 = vst [vmem:[%s7153_s7 + $0x80] sm:$0xff] %v4465_v28  ;;  %v4469_v41 = vadd.f32 %v4468_v0, %v7146_v15  ;;  %v4470_v3 = vpop.f32.mrb[131].mxu1 }
 0x2e8   : > { %4520 = vst [vmem:[%s7153_s7 + $0x88] sm:$0xff] %v4467_v40  ;;  %v4471_v52 = vadd.f32 %v4470_v3, %v7148_v62 }
 0x2e9   : > { %4521 = vst [vmem:[%s7153_s7 + $0x90] sm:$0xff] %v4469_v41 }
 0x2ea   : > { %4522 = vst [vmem:[%s7153_s7 + $0x98] sm:$0xff] %v4471_v52 }
 0x2ec   : > { %v4474_v7 = vpop.f32.mrb[132].mxu1 }
 0x2ed   : > { %v4475_v18 = vadd.f32 %v4474_v7, %v7146_v15  ;;  %v4476_v29 = vpop.f32.mrb[133].mxu1 }
 0x2ee   : > { %v4477_v43 = vadd.f32 %v4476_v29, %v7148_v62  ;;  %v4478_v32 = vpop.f32.mrb[134].mxu1 }
 0x2ef   : > { %4523 = vst [vmem:[%s7153_s7 + $0xa0] sm:$0xff] %v4475_v18  ;;  %v4479_v33 = vadd.f32 %v4478_v32, %v7146_v15  ;;  %v4480_v12 = vpop.f32.mrb[135].mxu1 }
 0x2f0   : > { %4524 = vst [vmem:[%s7153_s7 + $0xa8] sm:$0xff] %v4477_v43  ;;  %v4481_v5 = vadd.f32 %v4480_v12, %v7148_v62 }
 0x2f1   : > { %4525 = vst [vmem:[%s7153_s7 + $0xb0] sm:$0xff] %v4479_v33 }
 0x2f2   : > { %4526 = vst [vmem:[%s7153_s7 + $0xb8] sm:$0xff] %v4481_v5 }
 0x2f4   : > { %v4484_v37 = vpop.f32.mrb[136].mxu1 }
 0x2f5   : > { %v4485_v35 = vadd.f32 %v4484_v37, %v7146_v15  ;;  %v4486_v6 = vpop.f32.mrb[137].mxu1 }
 0x2f6   : > { %v4487_v61 = vadd.f32 %v4486_v6, %v7148_v62  ;;  %v4488_v46 = vpop.f32.mrb[138].mxu1 }
 0x2f7   : > { %4527 = vst [vmem:[%s7153_s7 + $0xc0] sm:$0xff] %v4485_v35  ;;  %v4489_v47 = vadd.f32 %v4488_v46, %v7146_v15  ;;  %v4490_v10 = vpop.f32.mrb[139].mxu1 }
 0x2f8   : > { %4528 = vst [vmem:[%s7153_s7 + $0xc8] sm:$0xff] %v4487_v61  ;;  %v4491_v16 = vadd.f32 %v4490_v10, %v7148_v62 }
 0x2f9   : > { %4529 = vst [vmem:[%s7153_s7 + $0xd0] sm:$0xff] %v4489_v47 }
 0x2fa   : > { %4530 = vst [vmem:[%s7153_s7 + $0xd8] sm:$0xff] %v4491_v16 }
 0x2fc   : > { %v4494_v39 = vpop.f32.mrb[140].mxu1 }
 0x2fd   : > { %v4495_v31 = vadd.f32 %v4494_v39, %v7146_v15  ;;  %v4496_v8 = vpop.f32.mrb[141].mxu1 }
 0x2fe   : > { %v4497_v19 = vadd.f32 %v4496_v8, %v7148_v62  ;;  %v4498_v48 = vpop.f32.mrb[142].mxu1 }
 0x2ff   : > { %4531 = vst [vmem:[%s7153_s7 + $0xe0] sm:$0xff] %v4495_v31  ;;  %v4499_v25 = vadd.f32 %v4498_v48, %v7146_v15  ;;  %v4500_v2 = vpop.f32.mrb[143].mxu1 }
 0x300   : > { %4532 = vst [vmem:[%s7153_s7 + $0xe8] sm:$0xff] %v4497_v19  ;;  %v4501_v13 = vadd.f32 %v4500_v2, %v7148_v62 }
 0x301   : > { %4533 = vst [vmem:[%s7153_s7 + $0xf0] sm:$0xff] %v4499_v25 }
 0x302   : > { %4534 = vst [vmem:[%s7153_s7 + $0xf8] sm:$0xff] %v4501_v13 }
 0x303 PF: > { %s15_s18 = sadd.s32 1, %s5062_s18  }
 0x304   : > { %p12_p4 = scmp.ge.s32.totalorder %s15_s18, 4  }
 0x306   :  { %14 = sbr.rel (!%p12_p4) target bundleno = 1 (0x1), region = 73 }

</bundles_post_ra>
